<compile_context>
chip_gen: v5e
topology: v5e:2x2
jax: 0.10.0
libtpu: 0.0.40
codegen_flags: <defaults>
</compile_context>

<pallas_src>
import jax
import jax.numpy as jnp
from jax.experimental import pallas as pl
from jax.experimental.pallas import tpu as pltpu


def time_embedding_kernel(t_ref, f_ref, o_ref):
    # t_ref: (TN, 1), f_ref: (1, D), o_ref: (TN, 2*D)
    tf = t_ref[...] * f_ref[...]                      # broadcast -> (TN, D), VPU
    # One full-width (lane-dense) store: no masked vst.msk partial stores.
    # TODO(synk): if a bundle dump shows this kernel VALU-bound (likely on
    # v7x), replace independent jnp.sin / jnp.cos with a shared
    # range-reduction sincos to cut the polynomial work ~30-40%.
    o_ref[...] = jnp.concatenate(
        [jnp.sin(tf), jnp.cos(tf)], axis=-1
    ).astype(o_ref.dtype)


def time_embedding(t, freqs, *, tile_n=4096, out_dtype=jnp.float32):
    """t: (N,) float, freqs: (D,) float -> (N, 2*D) out_dtype."""
    N = t.shape[0]
    D = freqs.shape[0]

    # Tile choice: as large as reasonable (amortizes ~0.35us/grid-step overhead
    # and DMA setup), but keep >=2 grid steps when N allows so the "parallel"
    # axis can still shard across both TensorCores on v7x.  Sublane (row) dim
    # of the block must be a multiple of 8.
    tn = min(int(tile_n), max(8, pl.cdiv(N, 2)))
    tn = ((tn + 7) // 8) * 8
    grid = (pl.cdiv(N, tn),)  # partial last tile: Pallas masks OOB reads/writes

    t2 = t.reshape(N, 1).astype(jnp.float32)
    f2 = freqs.reshape(1, D).astype(jnp.float32)

    return pl.pallas_call(
        time_embedding_kernel,
        out_shape=jax.ShapeDtypeStruct((N, 2 * D), out_dtype),
        grid_spec=pl.GridSpec(
            grid=grid,
            in_specs=[
                pl.BlockSpec((tn, 1), lambda i: (i, 0)),
                # Constant index_map: freqs block is VMEM-resident, not
                # re-DMA'd per grid step.
                pl.BlockSpec((1, D), lambda i: (0, 0)),
            ],
            out_specs=pl.BlockSpec((tn, 2 * D), lambda i: (i, 0)),
        ),
        compiler_params=pltpu.CompilerParams(
            dimension_semantics=("parallel",),
            # Headroom for double-buffered (tn, 2*D) f32 output blocks plus the
            # lane-padded (tn, 1) t blocks; 32 MiB is the v6e/v7x default and
            # lifts v5e above its 16 MiB default.
            vmem_limit_bytes=32 * 1024 * 1024,
        ),
    )(t2, f2)


if __name__ == "__main__":
    key = jax.random.PRNGKey(0)
    k_t, k_f = jax.random.split(key)

    num_edges = 300   # deliberately NOT a multiple of the tile: exercises the cdiv/tail path
    time_dim = 64     # output dim 2*time_dim = 128 -> one full lane-width row

    # Deterministic inputs / parameters (randn-like init for freqs).
    t = jax.random.normal(k_t, (num_edges,), dtype=jnp.float32) * 10.0
    freqs = jax.random.normal(k_f, (time_dim,), dtype=jnp.float32)

    out = time_embedding(t, freqs)
    out = jax.block_until_ready(out)

    # Reference check in plain JAX.
    tf = t[:, None] * freqs[None, :]
    ref = jnp.concatenate([jnp.sin(tf), jnp.cos(tf)], axis=-1)
    assert out.shape == (num_edges, 2 * time_dim)
    assert jnp.allclose(out, ref, atol=1e-5, rtol=1e-5), float(
        jnp.max(jnp.abs(out - ref))
    )

    print("KERNEL_OK")
</pallas_src>

<mosaic_0001>
module attributes {stable_mosaic.version = 11 : i64} {
  func.func @time_embedding_kernel(%arg0: i32, %arg1: memref<152x1xf32, #tpu.memory_space<vmem>>, %arg2: memref<1x64xf32, #tpu.memory_space<vmem>>, %arg3: memref<152x128xf32, #tpu.memory_space<vmem>>) attributes {dimension_semantics = [#tpu.dimension_semantics<parallel>], iteration_bounds = array<i64: 2>, scalar_prefetch = 0 : i64, scratch_operands = 0 : i64, tpu.core_type = #tpu.core_type<tc>, window_params = [{transform_indices = @transform_0, window_bounds = array<i64: 152, 1>}, {pipeline_mode = #tpu.pipeline_mode<synchronous>, transform_indices = @transform_1, window_bounds = array<i64: 1, 64>}, {transform_indices = @transform_2, window_bounds = array<i64: 152, 128>}]} {
    %c0 = arith.constant 0 : index
    %c0_0 = arith.constant 0 : index
    %0 = vector.load %arg1[%c0, %c0_0] : memref<152x1xf32, #tpu.memory_space<vmem>>, vector<152x1xf32>
    %c0_1 = arith.constant 0 : index
    %c0_2 = arith.constant 0 : index
    %1 = vector.load %arg2[%c0_1, %c0_2] : memref<1x64xf32, #tpu.memory_space<vmem>>, vector<1x64xf32>
    %2 = vector.broadcast %0 : vector<152x1xf32> to vector<152x64xf32>
    %3 = vector.broadcast %1 : vector<1x64xf32> to vector<152x64xf32>
    %4 = arith.mulf %2, %3 : vector<152x64xf32>
    %5 = math.sin %4 : vector<152x64xf32>
    %6 = math.cos %4 : vector<152x64xf32>
    %7 = tpu.concatenate %5, %6 in 1 : vector<152x64xf32>, vector<152x64xf32> -> vector<152x128xf32>
    %c0_3 = arith.constant 0 : index
    %c0_4 = arith.constant 0 : index
    %8 = vector.load %arg3[%c0_3, %c0_4] : memref<152x128xf32, #tpu.memory_space<vmem>>, vector<152x128xf32>
    tpu.vector_store %arg3[%c0_3, %c0_4], %7 {strides = array<i32>} : memref<152x128xf32, #tpu.memory_space<vmem>>, vector<152x128xf32>,
    return
  }
  func.func @transform_0(%arg0: i32) -> (i32, i32) {
    %c0_i32 = arith.constant 0 : i32
    %c0_i32_0 = arith.constant 0 : i32
    return %arg0, %c0_i32 : i32, i32
  }
  func.func @transform_1(%arg0: i32) -> (i32, i32) {
    %c0_i32 = arith.constant 0 : i32
    %c0_i32_0 = arith.constant 0 : i32
    %c0_i32_1 = arith.constant 0 : i32
    return %c0_i32, %c0_i32_0 : i32, i32
  }
  func.func @transform_2(%arg0: i32) -> (i32, i32) {
    %c0_i32 = arith.constant 0 : i32
    %c0_i32_0 = arith.constant 0 : i32
    return %arg0, %c0_i32 : i32, i32
  }
}

</mosaic_0001>

<bundles_post_ra>
// kernel: tpu_custom_call.1
= control target key start
LH: loop header
LB: loop body
LE: loop exit
PB: predicated region body
PF: predicated region fallthrough
CT: control target
= control target key end

     0   :  { %7 = vsyncpa [#allocation3], 0  ;;  %s10424_s0 = inlined_call_operand.vmem [shape: f32[300,1], index: 0, kind: input, shape index: {}]   ;;  %s10425_s1 = inlined_call_operand.vmem [shape: f32[1,64], index: 1, kind: input, shape index: {}]   ;;  %s10426_s2 = inlined_call_operand.hbm [shape: f32[300,128], index: 2, kind: output, shape index: {}]  }
   0x1   :  { %9 = vsyncpa [#allocation3 + $0x1], 0  ;;  %s6613_s9 = smov 0   ;;  %s6615_s10 = smov 0  }
   0x2   :  { %s6617_s11 = smov 0   ;;  %s6619_s12 = smov 0  }
   0x3 LB: > { %s6634_s13 = sadd.s32 4294967295, %s6586_s12   ;;  %s6346_s14 = sadd.s32 4294967294, %s6586_s12   ;;  %s6586_s12 = sphi %s6619_s12, %s11192_s12   ;;  %s6582_s11 = sphi %s6617_s11, %s11191_s11   ;;  %s6578_s10 = sphi %s6615_s10, %s11190_s10   ;;  %s6574_s9 = sphi %s6613_s9, %s11189_s9  }
   0x4   : > { %s6638_s15 = sadd.s32 1, %s6586_s12   ;;  %s69_s16 = sadd.s32 1, %s6582_s11 }
   0x5   : > { %s66_s17 = ssub.s32 %s6586_s12, %s6638_s15  ;;  %p79_p0 = scmp.ne.s32.totalorder %s6582_s11, %s6578_s10 }
   0x6   : > { %p67_p1 = scmp.eq.s32.totalorder %s66_s17, 0  ;;  %p80_p2 = scmp.eq.s32.totalorder %s6634_s13, 1 }
   0x7   : > { %p85_p3 = scmp.ne.s32.totalorder %s6578_s10, %s6574_s9  ;;  %p86_p4 = scmp.eq.s32.totalorder %s6346_s14, 1 }
   0x8   : > { %s6649_s18 = scalar_select %p67_p1, %s6582_s11, %s69_s16  }
   0x9   : > { %p6651_p5 = por %p80_p2, %p79_p0  ;;  %p6655_p6 = por %p86_p4, %p85_p3 }
   0xa   : > { %p6349_p7 = scmp.ge.s32.totalorder %s6586_s12, 1  ;;  %p116_p8 = scmp.lt.s32.totalorder %s6586_s12, 3 }
   0xc   : > { %p117_p9 = pnand %p6349_p7, %p116_p8 }
   0xe   : > { %120 = sbr.rel (%p117_p9) target bundleno = 1051 (0x41b), region = 28 }
  0x13   : > { %s138_s21 = smul.u32 19, %s6634_s13  ;;  %v10431_v0 = vmov 0   ;;  %v6692_v20 = vld [vmem:[%s10425_s1] ss:$0 sm:$0xff]  ;;  %v10453_v48 = vmov 683565275  }
  0x14   : > { %6521 = vset.pattern.permute.xlu2 %v10431_v0  ;;  %6520 = vset.pattern.permute.xlu1 %v10431_v0  ;;  %v10442_v50 = vmov 2475754826   ;;  %v10440_v53 = vmov 2131351028   ;;  %v10438_v61 = vmov 2102212464  }
  0x15   : > { %6519 = vset.pattern.permute.xlu0 %v10431_v0  ;;  %p139_p10 = scmp.lt.s32.totalorder %s138_s21, 37  ;;  %s6595_s30 = smov 64  }
  0x16   : > { %s135_s3 = sand.u32 1, %s6578_s10   ;;  %s6468_s6 = smul.u32 152, %s6634_s13 }
  0x17   : > { %s11194_s21 = smov (!%p139_p10, %s138_s21), 37  ;;  %s6469_s4 = smul.u32 152, %s135_s3 }
  0x18   : > { %s6350_s22 = sshll.u32 %s11194_s21, 3  ;;  %s6280_s14 = scalar_lea.hbm %s10426_s2, %s6468_s6 }
  0x19   : > { %s6668_s25 = scalar_lea.vmem %s10424_s0, %s6350_s22  ;;  %s10328_s5 = scalar_lea.vmem [#allocation2], %s6469_s4 }
  0x1a   : > { %v149_v1 = vld [vmem:[%s6668_s25 + $0x20] sm:$0xff]  ;;  %v147_v2 = vld [vmem:[%s6668_s25 + $0x10] sm:$0xff]  ;;  %v150_v4 = vld [vmem:[%s6668_s25 + $0x28] sm:$0xff]  ;;  %s6281_s16 = sshll.u32 %s10328_s5, 4  ;;  %s6283_s17 = sshll.u32 %s6280_s14, 4  ;;  %s6282_s16 = int_to_ptr.vmem [resolvable:$true] %s6281_s16  ;;  %s6284_s17 = int_to_ptr.hbm [resolvable:$true] %s6283_s17 }
  0x1b   : > { %v145_v3 = vld [vmem:[%s6668_s25] sm:$0xff]  ;;  %187 = vperm.xlu2 %6521, %v149_v1   ;;  %177 = vperm.xlu1 %6520, %v147_v2   ;;  %v148_v5 = vld [vmem:[%s6668_s25 + $0x18] sm:$0xff]  ;;  %v146_v6 = vld [vmem:[%s6668_s25 + $0x8] sm:$0xff]  ;;  %v10435_v1 = vmov 920167782   ;;  %s6269_s21 = scalar_lea.sflag [#allocation3], %s135_s3 }
  0x1c   : > { %167 = vperm.xlu0 %6519, %v145_v3   ;;  %v153_v7 = vld [vmem:[%s6668_s25 + $0x40] sm:$0xff]  ;;  %v152_v8 = vld [vmem:[%s6668_s25 + $0x38] sm:$0xff]  ;;  %v151_v9 = vld [vmem:[%s6668_s25 + $0x30] sm:$0xff]  ;;  %s6538_s22 = sshra.s32 %s6284_s17, 4  ;;  %s6539_s22 = int_to_ptr.hbm [resolvable:$true] %s6538_s22 }
  0x1d   : > { %v156_v10 = vld [vmem:[%s6668_s25 + $0x58] sm:$0xff]  ;;  %v155_v11 = vld [vmem:[%s6668_s25 + $0x50] sm:$0xff]  ;;  %v154_v12 = vld [vmem:[%s6668_s25 + $0x48] sm:$0xff]  ;;  %s6540_s23 = scalar_lea.hbm %s6539_s22, 152  ;;  %p6545_p0 = scmp.lt.s32.totalorder %s6539_s22, %s10426_s2 }
  0x1e   : > { %v159_v13 = vld [vmem:[%s6668_s25 + $0x70] sm:$0xff]  ;;  %v158_v14 = vld [vmem:[%s6668_s25 + $0x68] sm:$0xff]  ;;  %v157_v15 = vld [vmem:[%s6668_s25 + $0x60] sm:$0xff]  ;;  %p6541_p11 = scmp.ne.s32.totalorder %s6539_s22, %s6540_s23 }
  0x1f   : > { %v162_v16 = vld [vmem:[%s6668_s25 + $0x88] sm:$0xff]  ;;  %v161_v17 = vld [vmem:[%s6668_s25 + $0x80] sm:$0xff]  ;;  %v160_v18 = vld [vmem:[%s6668_s25 + $0x78] sm:$0xff] }
  0x20   : > { %v163_v19 = vld [vmem:[%s6668_s25 + $0x90] sm:$0xff]  ;;  %p6542_p12 = pnand %p6541_p11, %p6651_p5  ;;  %s6544_s25 = scalar_lea.hbm %s10426_s2, 304 }
  0x21   : > { %p6546_p1 = scmp.lt.s32.totalorder %s6544_s25, %s6540_s23 }
  0x22   : > { %p6543_p13 = pneg %p6542_p12 }
  0x23   : > { %192 = vperm.xlu2 %6521, %v150_v4   ;;  %182 = vperm.xlu1 %6520, %v148_v5   ;;  %p6547_p2 = por %p6546_p1, %p6545_p0 }
  0x24   : > { %172 = vperm.xlu0 %6519, %v146_v6   ;;  %v10433_v6 = vmov 1326507024  }
  0x25   : > { %p6548_p3 = pnand %p6547_p2, %p6543_p13 }
  0x2b   : > { %207 = vperm.xlu2 %6521, %v153_v7   ;;  %202 = vperm.xlu1 %6520, %v152_v8  }
  0x2c   : > { %197 = vperm.xlu0 %6519, %v151_v9  }
  0x33   : > { %222 = vperm.xlu2 %6521, %v156_v10   ;;  %217 = vperm.xlu1 %6520, %v155_v11  }
  0x34   : > { %212 = vperm.xlu0 %6519, %v154_v12  }
  0x3b   : > { %237 = vperm.xlu2 %6521, %v159_v13   ;;  %232 = vperm.xlu1 %6520, %v158_v14  }
  0x3c   : > { %227 = vperm.xlu0 %6519, %v157_v15  }
  0x43   : > { %252 = vperm.xlu2 %6521, %v162_v16   ;;  %247 = vperm.xlu1 %6520, %v161_v17  }
  0x44   : > { %242 = vperm.xlu0 %6519, %v160_v18  }
  0x4c   : > { %257 = vperm.xlu0 %6519, %v163_v19  }
  0x75   : > { %v188_v21 = vpop.permute.xlu2 %187 }
  0x76   : > { %v6695_v22 = vmul.f32 %v6692_v20, %v188_v21 }
  0x78   : > { %10664 = vst [vmem:[#allocation5_spill] sm:$0xff] %v6695_v22  ;;  %v905_v23 = vand.u32 2139095040, %v6695_v22  ;;  %v10428_v34 = vand.u32 2147483647, %v6695_v22  ;;  %v10707_v22 = vmov 2131351028  }
  0x7a   : > { %v906_v25 = vshrl.u32 %v905_v23, 23  ;;  %v909_v38 = vand.u32 8388607, %v10428_v34 }
  0x7c   : > { %v6363_v27 = vadd.s32 4294967169, %v906_v25  ;;  %v910_v43 = vor.u32 8388608, %v909_v38 }
  0x7d   : > { %v193_v24 = vpop.permute.xlu2 %192 }
  0x7e   : > { %v6699_v26 = vmul.f32 %v6692_v20, %v193_v24  ;;  %v912_v29 = vadd.s32 1, %v6363_v27  ;;  %v6726_v58 = vshll.u32 %v910_v43, 8 }
  0x80   : > { %10665 = vst [vmem:[#allocation6_spill] sm:$0xff] %v6699_v26  ;;  %v1060_v28 = vand.u32 2139095040, %v6699_v26  ;;  %vm913_vm0 = vcmp.gt.s32.totalorder %v912_v29, 0  ;;  %v10430_v40 = vand.u32 2147483647, %v6699_v26  ;;  %v6746_v12 = vand.u32 65535, %v6726_v58 }
  0x81   : > { %v914_v33 = vsel %vm913_vm0, %v912_v29, 0  ;;  %10670 = vst [vmem:[#allocation11_spill] sm:$0xff] %v6726_v58  ;;  %v6749_v13 = vshrl.u32 %v6726_v58, 16 }
  0x82   : > { %v1061_v30 = vshrl.u32 %v1060_v28, 23  ;;  %v916_v37 = vand.u32 31, %v914_v33  ;;  %v1064_v47 = vand.u32 8388607, %v10430_v40  ;;  %v6723_v55 = vshrl.u32 %v914_v33, 5  ;;  %10674 = vst [vmem:[#allocation15_spill] sm:$0xff] %v6746_v12 }
  0x83   : > { %10675 = vst [vmem:[#allocation16_spill] sm:$0xff] %v6749_v13 }
  0x84   : > { %v6366_v32 = vadd.s32 4294967169, %v1061_v30  ;;  %v6710_v42 = vsub.s32 32, %v916_v37  ;;  %v919_v49 = vshll.u32 %v10453_v48, %v916_v37  ;;  %v922_v52 = vshll.u32 %v10442_v50, %v916_v37  ;;  %10669 = vst [vmem:[#allocation10_spill] sm:$0xff] %v6723_v55 }
  0x85   : > { %v208_v31 = vpop.permute.xlu2 %207  ;;  %v925_v57 = vshll.u32 %v10440_v53, %v916_v37  ;;  %v928_v63 = vshll.u32 %v10438_v61, %v916_v37  ;;  %v931_v3 = vshll.u32 %v10435_v1, %v916_v37  ;;  %v1065_v8 = vor.u32 8388608, %v1064_v47 }
  0x86   : > { %v6704_v35 = vmul.f32 %v6692_v20, %v208_v31  ;;  %v1067_v36 = vadd.s32 1, %v6366_v32  ;;  %10667 = vst [vmem:[#allocation8_spill] sm:$0xff] %v6710_v42  ;;  %v920_v51 = vshrl.u32 %v10442_v50, %v6710_v42  ;;  %v923_v54 = vshrl.u32 %v10440_v53, %v6710_v42 }
  0x87   : > { %v926_v62 = vshrl.u32 %v10438_v61, %v6710_v42  ;;  %v929_v2 = vshrl.u32 %v10435_v1, %v6710_v42  ;;  %v932_v7 = vshrl.u32 %v10433_v6, %v6710_v42  ;;  %vm10506_vm2 = vcmp.lt.s32.totalorder %v6723_v55, 1 }
  0x88   : > { %10666 = vst [vmem:[#allocation7_spill] sm:$0xff] %v6704_v35  ;;  %v1525_v39 = vand.u32 2139095040, %v6704_v35  ;;  %vm1068_vm1 = vcmp.gt.s32.totalorder %v1067_v36, 0  ;;  %v6735_v4 = vor.u32 %v920_v51, %v919_v49  ;;  %v6737_v5 = vor.u32 %v923_v54, %v922_v52 }
  0x89   : > { %v1069_v44 = vsel %vm1068_vm1, %v1067_v36, 0  ;;  %v10429_v11 = vand.u32 2147483647, %v6704_v35  ;;  %v6751_v16 = vor.u32 %v926_v62, %v925_v57  ;;  %vm10503_vm3 = vcmp.lt.s32.totalorder %v6723_v55, 3 }
  0x8a   : > { %v1526_v45 = vshrl.u32 %v1525_v39, 23  ;;  %v1071_v56 = vand.u32 31, %v1069_v44  ;;  %10671 = vst [vmem:[#allocation12_spill] sm:$0xff] %v6735_v4  ;;  %vm10507_vm4 = vcmp.lt.s32.totalorder %v6723_v55, 4  ;;  %v930_v18 = vor.u32 %v929_v2, %v928_v63 }
  0x8b   : > { %10672 = vst [vmem:[#allocation13_spill] sm:$0xff] %v6737_v5  ;;  %v933_v19 = vor.u32 %v932_v7, %v931_v3  ;;  %v6762_v21 = vsel %vm10506_vm2, %v6735_v4, %v6737_v5  ;;  %v6764_v23 = vshll.u32 %v1065_v8, 8  ;;  %v1529_v28 = vand.u32 8388607, %v10429_v11 }
  0x8c   : > { %v6375_v59 = vadd.s32 4294967169, %v1526_v45  ;;  %v6742_v10 = vsub.s32 32, %v1071_v56  ;;  %10676 = vst [vmem:[#allocation17_spill] sm:$0xff] %v6751_v16  ;;  %v1083_v24 = vshll.u32 %v10438_v61, %v1071_v56  ;;  %v1086_v27 = vshll.u32 %v10435_v1, %v1071_v56 }
  0x8d   : > { %v223_v41 = vpop.permute.xlu2 %222  ;;  %v178_v9 = vpop.permute.xlu1 %177  ;;  %10678 = vst [vmem:[#allocation19_spill] sm:$0xff] %v6762_v21  ;;  %v6775_v32 = vshrl.u32 %v1069_v44, 5  ;;  %v1074_v33 = vshll.u32 %v10453_v48, %v1071_v56  ;;  %v1077_v36 = vshll.u32 %v10442_v50, %v1071_v56  ;;  %v943_v44 = vsel %vm10507_vm4, %v930_v18, 920167782 }
  0x8e   : > { %v6713_v46 = vmul.f32 %v6692_v20, %v223_v41  ;;  %10673 = vst [vmem:[#allocation14_spill] sm:$0xff] %v6742_v10  ;;  %v1532_v14 = vadd.s32 1, %v6375_v59  ;;  %v6756_v17 = vmul.f32 %v6692_v20, %v178_v9  ;;  %v1084_v25 = vshrl.u32 %v10435_v1, %v6742_v10  ;;  %v168_v45 = vpop.permute.xlu0 %167 }
  0x8f   : > { %10679 = vst [vmem:[#allocation20_spill] sm:$0xff] %v6764_v23  ;;  %v1087_v29 = vshrl.u32 %v10433_v6, %v6742_v10  ;;  %v1075_v38 = vshrl.u32 %v10442_v50, %v6742_v10  ;;  %v1078_v39 = vshrl.u32 %v10440_v53, %v6742_v10  ;;  %v1080_v41 = vshll.u32 %v10440_v53, %v1071_v56 }
  0x90   : > { %10668 = vst [vmem:[#allocation9_spill] sm:$0xff] %v6713_v46  ;;  %v1990_v60 = vand.u32 2139095040, %v6713_v46  ;;  %vm1533_vm5 = vcmp.gt.s32.totalorder %v1532_v14, 0  ;;  %v10427_v30 = vand.u32 2147483647, %v6713_v46  ;;  %v595_v37 = vand.u32 2139095040, %v6756_v17 }
  0x91   : > { %10677 = vst [vmem:[#allocation18_spill] sm:$0xff] %v6756_v17  ;;  %v1081_v43 = vshrl.u32 %v10438_v61, %v6742_v10  ;;  %v6793_v47 = vsel %vm10506_vm2, %v6737_v5, %v6751_v16  ;;  %v1530_v49 = vor.u32 8388608, %v1529_v28  ;;  %v1534_v51 = vsel %vm1533_vm5, %v1532_v14, 0 }
  0x92   : > { %v1991_v15 = vshrl.u32 %v1990_v60, 23  ;;  %10680 = vst [vmem:[#allocation21_spill] sm:$0xff] %v6775_v32  ;;  %v1085_v52 = vor.u32 %v1084_v25, %v1083_v24  ;;  %v1088_v54 = vor.u32 %v1087_v29, %v1086_v27  ;;  %v1994_v56 = vand.u32 8388607, %v10427_v30 }
  0x93   : > { %10681 = vst [vmem:[#allocation22_spill] sm:$0xff] %v6793_v47  ;;  %v947_v59 = vsel %vm10507_vm4, %v933_v19, 1326507024  ;;  %vm1092_vm6 = vcmp.lt.s32.totalorder %v6775_v32, 4  ;;  %v596_v60 = vshrl.u32 %v595_v37, 23  ;;  %v6801_v62 = vmul.f32 %v6692_v20, %v168_v45 }
  0x94   : > { %v6384_v31 = vadd.s32 4294967169, %v1991_v15  ;;  %v6803_v63 = vor.u32 %v1075_v38, %v1074_v33  ;;  %v6805_v2 = vor.u32 %v1078_v39, %v1077_v36  ;;  %v6807_v3 = vor.u32 %v1081_v43, %v1080_v41 }
  0x95   : > { %10682 = vst [vmem:[#allocation23_spill] sm:$0xff] %v6801_v62  ;;  %v1536_v7 = vand.u32 31, %v1534_v51  ;;  %v6812_v8 = vsel %vm10503_vm3, %v6751_v16, %v943_v44  ;;  %vm1089_vm7 = vcmp.lt.s32.totalorder %v6775_v32, 1  ;;  %vm1091_vm8 = vcmp.lt.s32.totalorder %v6775_v32, 3  ;;  %v183_v42 = vpop.permute.xlu1 %182 }
  0x96   : > { %v1997_v57 = vadd.s32 1, %v6384_v31  ;;  %10683 = vst [vmem:[#allocation24_spill] sm:$0xff] %v6803_v63  ;;  %v6816_v9 = vshll.u32 %v1530_v49, 8  ;;  %v1098_v14 = vsel %vm1092_vm6, %v1085_v52, 920167782  ;;  %v1995_v19 = vor.u32 8388608, %v1994_v56 }
  0x97   : > { %10684 = vst [vmem:[#allocation25_spill] sm:$0xff] %v6805_v2  ;;  %v1102_v15 = vsel %vm1092_vm6, %v1088_v54, 1326507024  ;;  %v6824_v24 = vsel %vm10503_vm3, %v930_v18, %v947_v59  ;;  %v6827_v25 = vand.u32 65535, %v6764_v23  ;;  %v6357_v27 = vadd.s32 4294967169, %v596_v60 }
  0x98   : > { %10685 = vst [vmem:[#allocation26_spill] sm:$0xff] %v6807_v3  ;;  %vm1998_vm9 = vcmp.gt.s32.totalorder %v1997_v57, 0  ;;  %v285_v28 = vand.u32 2139095040, %v6801_v62  ;;  %v6834_v29 = vsel %vm1089_vm7, %v6803_v63, %v6805_v2  ;;  %v6840_v31 = vsel %vm1089_vm7, %v6805_v2, %v6807_v3 }
  0x99   : > { %10686 = vst [vmem:[#allocation27_spill] sm:$0xff] %v6812_v8  ;;  %v6843_v18 = vshrl.u32 %v6764_v23, 16  ;;  %v6845_v33 = vsub.s32 32, %v1536_v7  ;;  %v6850_v36 = vsel %vm1091_vm8, %v6807_v3, %v1098_v14  ;;  %v6854_v37 = vsel %vm1091_vm8, %v1085_v52, %v1102_v15  ;;  %v238_v52 = vpop.permute.xlu2 %237  ;;  %v173_v8 = vpop.permute.xlu0 %172 }
  0x9a   : > { %10687 = vst [vmem:[#allocation28_spill] sm:$0xff] %v6816_v9  ;;  %v6857_v38 = vand.u32 65535, %v6816_v9  ;;  %v1999_v39 = vsel %vm1998_vm9, %v1997_v57, 0  ;;  %v6859_v41 = vshrl.u32 %v1534_v51, 5  ;;  %v1539_v43 = vshll.u32 %v10453_v48, %v1536_v7 }
  0x9b   : > { %10688 = vst [vmem:[#allocation29_spill] sm:$0xff] %v6824_v24  ;;  %v6862_v45 = vshll.u32 %v1995_v19, 8  ;;  %v10437_v44 = vand.u32 2147483647, %v6756_v17  ;;  %v1542_v49 = vshll.u32 %v10442_v50, %v1536_v7  ;;  %v1545_v54 = vshll.u32 %v10440_v53, %v1536_v7 }
  0x9c   : > { %10689 = vst [vmem:[#allocation30_spill] sm:$0xff] %v6827_v25  ;;  %v602_v56 = vadd.s32 1, %v6357_v27  ;;  %v286_v59 = vshrl.u32 %v285_v28, 23  ;;  %v1540_v60 = vshrl.u32 %v10442_v50, %v6845_v33  ;;  %v1548_v57 = vshll.u32 %v10438_v61, %v1536_v7 }
  0x9d   : > { %10690 = vst [vmem:[#allocation31_spill] sm:$0xff] %v6834_v29  ;;  %v1551_v51 = vshll.u32 %v10435_v1, %v1536_v7  ;;  %v2001_v14 = vand.u32 31, %v1999_v39  ;;  %v1543_v15 = vshrl.u32 %v10440_v53, %v6845_v33  ;;  %v1546_v19 = vshrl.u32 %v10438_v61, %v6845_v33 }
  0x9e   : > { %10691 = vst [vmem:[#allocation32_spill] sm:$0xff] %v6840_v31  ;;  %v1549_v30 = vshrl.u32 %v10435_v1, %v6845_v33  ;;  %v1552_v27 = vshrl.u32 %v10433_v6, %v6845_v33  ;;  %v6880_v28 = vshrl.u32 %v6816_v9, 16  ;;  %v599_v34 = vand.u32 8388607, %v10437_v44 }
  0x9f   : > { %10692 = vst [vmem:[#allocation33_spill] sm:$0xff] %v6843_v18  ;;  %v6886_v11 = vmul.f32 %v6692_v20, %v238_v52  ;;  %vm10536_vm10 = vcmp.lt.s32.totalorder %v6859_v41, 1  ;;  %vm10530_vm11 = vcmp.lt.s32.totalorder %v6859_v41, 3  ;;  %vm603_vm12 = vcmp.gt.s32.totalorder %v602_v56, 0 }
  0xa0   : > { %10693 = vst [vmem:[#allocation34_spill] sm:$0xff] %v6845_v33  ;;  %v6351_v40 = vadd.s32 4294967169, %v286_v59  ;;  %v6890_v0 = vor.u32 %v1540_v60, %v1539_v43  ;;  %vm10537_vm13 = vcmp.lt.s32.totalorder %v6859_v41, 4  ;;  %v6893_v6 = vsub.s32 32, %v2001_v14 }
  0xa1   : > { %10694 = vst [vmem:[#allocation35_spill] sm:$0xff] %v6850_v36  ;;  %v6896_v1 = vand.u32 65535, %v6862_v45  ;;  %v6898_v44 = vor.u32 %v1543_v15, %v1542_v49  ;;  %v6900_v7 = vor.u32 %v1546_v19, %v1545_v54  ;;  %v1550_v52 = vor.u32 %v1549_v30, %v1548_v57 }
  0xa2   : > { %10695 = vst [vmem:[#allocation36_spill] sm:$0xff] %v6854_v37  ;;  %v1553_v61 = vor.u32 %v1552_v27, %v1551_v51  ;;  %v2004_v53 = vshll.u32 %v10453_v48, %v2001_v14  ;;  %v600_v50 = vor.u32 8388608, %v599_v34  ;;  %v604_v46 = vsel %vm603_vm12, %v602_v56, 0 }
  0xa3   : > { %10696 = vst [vmem:[#allocation37_spill] sm:$0xff] %v6857_v38  ;;  %v2455_v43 = vand.u32 2139095040, %v6886_v11  ;;  %v10706_v59 = vmov 2475754826   ;;  %v2010_v58 = vshll.u32 %v10707_v22, %v2001_v14  ;;  %v10708_v35 = vmov 2102212464  }
  0xa4   : > { %10697 = vst [vmem:[#allocation38_spill] sm:$0xff] %v6859_v41  ;;  %v2007_v60 = vshll.u32 %v10706_v59, %v2001_v14  ;;  %v2013_v5 = vshll.u32 %v10708_v35, %v2001_v14  ;;  %v292_v4 = vadd.s32 1, %v6351_v40  ;;  %v2005_v49 = vshrl.u32 %v10706_v59, %v6893_v6 }
  0xa5   : > { %10698 = vst [vmem:[#allocation39_spill] sm:$0xff] %v6862_v45  ;;  %v2008_v30 = vshrl.u32 %v10707_v22, %v6893_v6  ;;  %v2011_v54 = vshrl.u32 %v10708_v35, %v6893_v6  ;;  %v10709_v34 = vmov 920167782   ;;  %v6919_v57 = vsel %vm10536_vm10, %v6890_v0, %v6898_v44 }
  0xa6   : > { %10699 = vst [vmem:[#allocation40_spill] sm:$0xff] %v6880_v28  ;;  %v2014_v56 = vshrl.u32 %v10709_v34, %v6893_v6  ;;  %v6921_v51 = vshrl.u32 %v1999_v39, 5  ;;  %v6924_v40 = vshrl.u32 %v6862_v45, 16  ;;  %v606_v15 = vand.u32 31, %v604_v46 }
  0xa7   : > { %10700 = vst [vmem:[#allocation41_spill] sm:$0xff] %v6886_v11  ;;  %v1563_v19 = vsel %vm10537_vm13, %v1550_v52, 920167782  ;;  %v6932_v27 = vsel %vm10536_vm10, %v6898_v44, %v6900_v7  ;;  %v1567_v48 = vsel %vm10537_vm13, %v1553_v61, 1326507024  ;;  %v2016_v39 = vshll.u32 %v10709_v34, %v2001_v14 }
  0xa8   : > { %10701 = vst [vmem:[#allocation42_spill] sm:$0xff] %v6890_v0  ;;  %v10714_v16 = vmov 1326507024   ;;  %vm293_vm14 = vcmp.gt.s32.totalorder %v292_v4, 0  ;;  %v6941_v13 = vor.u32 %v2005_v49, %v2004_v53  ;;  %v6943_v12 = vor.u32 %v2008_v30, %v2007_v60 }
  0xa9   : > { %10702 = vst [vmem:[#allocation43_spill] sm:$0xff] %v6893_v6  ;;  %v2017_v45 = vshrl.u32 %v10714_v16, %v6893_v6  ;;  %v6945_v47 = vor.u32 %v2011_v54, %v2010_v58  ;;  %v2015_v24 = vor.u32 %v2014_v56, %v2013_v5  ;;  %v6950_v61 = vsel %vm10530_vm11, %v6900_v7, %v1563_v19 }
  0xaa   : > { %10703 = vst [vmem:[#allocation44_spill] sm:$0xff] %v6896_v1  ;;  %v2456_v1 = vshrl.u32 %v2455_v43, 23  ;;  %vm10481_vm15 = vcmp.lt.s32.totalorder %v6921_v51, 1  ;;  %vm10482_vm0 = vcmp.lt.s32.totalorder %v6921_v51, 4  ;;  %v6958_v53 = vsel %vm10530_vm11, %v1550_v52, %v1567_v48 }
  0xab   : > { %10704 = vst [vmem:[#allocation45_spill] sm:$0xff] %v6898_v44  ;;  %v294_v14 = vsel %vm293_vm14, %v292_v4, 0  ;;  %v6961_v58 = vmul.f32 %v6692_v20, %v183_v42  ;;  %v2018_v5 = vor.u32 %v2017_v45, %v2016_v39  ;;  %vm10480_vm1 = vcmp.lt.s32.totalorder %v6921_v51, 3 }
  0xac   : > { %10705 = vst [vmem:[#allocation46_spill] sm:$0xff] %v6900_v7  ;;  %v6393_v43 = vadd.s32 4294967169, %v2456_v1  ;;  %v6974_v48 = vsel %vm10481_vm15, %v6941_v13, %v6943_v12  ;;  %v2028_v1 = vsel %vm10482_vm0, %v2015_v24, 920167782  ;;  %v6982_v42 = vsel %vm10481_vm15, %v6943_v12, %v6945_v47 }
  0xad   : > { %10710 = vst [vmem:[#allocation47_spill] sm:$0xff] %v6919_v57  ;;  %v10723_v4 = vand.u32 2147483647, %v6801_v62  ;;  %v296_v56 = vand.u32 31, %v294_v14  ;;  %v6992_v19 = vshrl.u32 %v604_v46, 5  ;;  %v618_v21 = vshll.u32 %v10708_v35, %v606_v15 }
  0xae   : > { %10711 = vst [vmem:[#allocation48_spill] sm:$0xff] %v6921_v51  ;;  %v10724_v6 = vmov 683565275   ;;  %v615_v55 = vshll.u32 %v10707_v22, %v606_v15  ;;  %v621_v9 = vshll.u32 %v10709_v34, %v606_v15  ;;  %v7013_v38 = vmul.f32 %v6692_v20, %v173_v8 }
  0xaf   : > { %10712 = vst [vmem:[#allocation49_spill] sm:$0xff] %v6924_v40  ;;  %v6939_v40 = vshll.u32 %v600_v50, 8  ;;  %v6954_v50 = vsub.s32 32, %v606_v15  ;;  %v289_v45 = vand.u32 8388607, %v10723_v4  ;;  %v7010_v7 = vsub.s32 32, %v296_v56 }
  0xb0   : > { %10713 = vst [vmem:[#allocation50_spill] sm:$0xff] %v6932_v27  ;;  %v2032_v4 = vsel %vm10482_vm0, %v2018_v5, 1326507024  ;;  %v7018_v27 = vsel %vm10480_vm1, %v6945_v47, %v2028_v1  ;;  %vm624_vm9 = vcmp.lt.s32.totalorder %v6992_v19, 1  ;;  %vm626_vm12 = vcmp.lt.s32.totalorder %v6992_v19, 3 }
  0xb1   : > { %10715 = vst [vmem:[#allocation51_spill] sm:$0xff] %v6941_v13  ;;  %v6965_v60 = vand.u32 65535, %v6939_v40  ;;  %v6968_v49 = vshrl.u32 %v6939_v40, 16  ;;  %v610_v52 = vshrl.u32 %v10706_v59, %v6954_v50  ;;  %v613_v30 = vshrl.u32 %v10707_v22, %v6954_v50 }
  0xb2   : > { %10716 = vst [vmem:[#allocation52_spill] sm:$0xff] %v6943_v12  ;;  %v619_v54 = vshrl.u32 %v10709_v34, %v6954_v50  ;;  %v622_v39 = vshrl.u32 %v10714_v16, %v6954_v50  ;;  %v2462_v12 = vadd.s32 1, %v6393_v43  ;;  %v750_v13 = vand.u32 2139095040, %v6961_v58 }
  0xb3   : > { %10717 = vst [vmem:[#allocation53_spill] sm:$0xff] %v6945_v47  ;;  %v616_v46 = vshrl.u32 %v10708_v35, %v6954_v50  ;;  %v290_v43 = vor.u32 8388608, %v289_v45  ;;  %vm627_vm14 = vcmp.lt.s32.totalorder %v6992_v19, 4  ;;  %v10477_v8 = vand.u32 2147483647, %v6886_v11 }
  0xb4   : > { %10718 = vst [vmem:[#allocation54_spill] sm:$0xff] %v6950_v61  ;;  %v620_v5 = vor.u32 %v619_v54, %v618_v21  ;;  %v623_v33 = vor.u32 %v622_v39, %v621_v9  ;;  %vm2463_vm5 = vcmp.gt.s32.totalorder %v2462_v12, 0  ;;  %v751_v28 = vshrl.u32 %v750_v13, 23 }
  0xb5   : > { %10719 = vst [vmem:[#allocation55_spill] sm:$0xff] %v6958_v53  ;;  %v7026_v21 = vor.u32 %v616_v46, %v615_v55  ;;  %v7029_v13 = vshll.u32 %v290_v43, 8  ;;  %v2464_v55 = vsel %vm2463_vm5, %v2462_v12, 0  ;;  %v300_v54 = vshrl.u32 %v10706_v59, %v7010_v7 }
  0xb6   : > { %10720 = vst [vmem:[#allocation56_spill] sm:$0xff] %v6961_v58  ;;  %v637_v1 = vsel %vm627_vm14, %v623_v33, 1326507024  ;;  %v6360_v45 = vadd.s32 4294967169, %v751_v28  ;;  %v303_v39 = vshrl.u32 %v10707_v22, %v7010_v7  ;;  %v306_v12 = vshrl.u32 %v10708_v35, %v7010_v7 }
  0xb7   : > { %10721 = vst [vmem:[#allocation57_spill] sm:$0xff] %v6974_v48  ;;  %v612_v48 = vshll.u32 %v10706_v59, %v606_v15  ;;  %v311_v33 = vshll.u32 %v10709_v34, %v296_v56  ;;  %v2459_v28 = vand.u32 8388607, %v10477_v8  ;;  %v2466_v46 = vand.u32 31, %v2464_v55 }
  0xb8   : > { %10722 = vst [vmem:[#allocation58_spill] sm:$0xff] %v6982_v42  ;;  %v609_v42 = vshll.u32 %v10724_v6, %v606_v15  ;;  %v7022_v15 = vsel %vm10480_vm1, %v2015_v24, %v2032_v4  ;;  %v633_v24 = vsel %vm627_vm14, %v620_v5, 920167782  ;;  %v308_v4 = vshll.u32 %v10708_v35, %v296_v56 }
  0xb9   : > { %v7008_v0 = vor.u32 %v613_v30, %v612_v48  ;;  %10725 = vst [vmem:[#allocation59_spill] sm:$0xff] %v7013_v38  ;;  %v309_v48 = vshrl.u32 %v10709_v34, %v7010_v7  ;;  %v7047_v30 = vshrl.u32 %v294_v14, 5  ;;  %v299_v14 = vshll.u32 %v10724_v6, %v296_v56 }
  0xba   : > { %v7006_v44 = vor.u32 %v610_v52, %v609_v42  ;;  %10726 = vst [vmem:[#allocation60_spill] sm:$0xff] %v7018_v27  ;;  %v312_v42 = vshrl.u32 %v10714_v16, %v7010_v7  ;;  %v440_v52 = vand.u32 2139095040, %v7013_v38  ;;  %v302_v43 = vshll.u32 %v10706_v59, %v296_v56 }
  0xbb   : > { %10727 = vst [vmem:[#allocation61_spill] sm:$0xff] %v7022_v15  ;;  %v305_v47 = vshll.u32 %v10707_v22, %v296_v56  ;;  %v310_v15 = vor.u32 %v309_v48, %v308_v4  ;;  %v10483_v51 = vand.u32 2147483647, %v6961_v58  ;;  %v757_v53 = vadd.s32 1, %v6360_v45  ;;  %v203_v58 = vpop.permute.xlu1 %202 }
  0xbc   : > { %10728 = vst [vmem:[#allocation62_spill] sm:$0xff] %v7029_v13  ;;  %v7036_v9 = vsel %vm624_vm9, %v7006_v44, %v7008_v0  ;;  %v313_v27 = vor.u32 %v312_v42, %v311_v33  ;;  %v441_v57 = vshrl.u32 %v440_v52, 23  ;;  %v7066_v61 = vsel %vm626_vm12, %v7026_v21, %v633_v24 }
  0xbd   : > { %v7072_v8 = vsel %vm624_vm9, %v7008_v0, %v7026_v21  ;;  %v7074_v11 = vor.u32 %v300_v54, %v299_v14  ;;  %v7076_v56 = vor.u32 %v303_v39, %v302_v43  ;;  %v7078_v48 = vor.u32 %v306_v12, %v305_v47  ;;  %v253_v12 = vpop.permute.xlu2 %252 }
  0xbe   : > { %vm317_vm5 = vcmp.lt.s32.totalorder %v7047_v30, 4  ;;  %v2460_v42 = vor.u32 8388608, %v2459_v28  ;;  %v7081_v45 = vsub.s32 32, %v2466_v46  ;;  %v7085_v24 = vsel %vm626_vm12, %v620_v5, %v637_v1 }
  0xbf   : > { %10729 = vst [vmem:[#allocation63_spill] sm:$0xff] %v7074_v11  ;;  %vm314_vm1 = vcmp.lt.s32.totalorder %v7047_v30, 1  ;;  %v323_v52 = vsel %vm317_vm5, %v310_v15, 920167782  ;;  %v10493_v54 = vand.u32 2147483647, %v7013_v38  ;;  %v7130_v41 = vmul.f32 %v6692_v20, %v253_v12 }
  0xc0   : > { %10730 = vst [vmem:[#allocation64_spill] sm:$0xff] %v7076_v56  ;;  %v327_v47 = vsel %vm317_vm5, %v313_v27, 1326507024  ;;  %v754_v39 = vand.u32 8388607, %v10483_v51  ;;  %vm758_vm15 = vcmp.gt.s32.totalorder %v757_v53, 0  ;;  %v7100_v5 = vsel %vm314_vm1, %v7074_v11, %v7076_v56 }
  0xc1   : > { %10731 = vst [vmem:[#allocation65_spill] sm:$0xff] %v7081_v45  ;;  %v6354_v4 = vadd.s32 4294967169, %v441_v57  ;;  %vm316_vm0 = vcmp.lt.s32.totalorder %v7047_v30, 3  ;;  %v7103_v1 = vand.u32 65535, %v7029_v13  ;;  %v7106_v33 = vshrl.u32 %v7029_v13, 16 }
  0xc2   : > { %v7111_v27 = vsel %vm316_vm0, %v7078_v48, %v323_v52  ;;  %v7117_v57 = vsel %vm314_vm1, %v7076_v56, %v7078_v48  ;;  %v2479_v28 = vshrl.u32 %v10709_v34, %v7081_v45  ;;  %v7121_v14 = vshll.u32 %v2460_v42, 8  ;;  %10733 = vst [vmem:[#allocation67_spill] sm:$0xff] %v7130_v41 }
  0xc3   : > { %v7125_v43 = vsel %vm316_vm0, %v310_v15, %v327_v47  ;;  %v759_v51 = vsel %vm758_vm15, %v757_v53, 0  ;;  %v444_v52 = vand.u32 8388607, %v10493_v54  ;;  %v2478_v26 = vshll.u32 %v10708_v35, %v2466_v46  ;;  %v218_v29 = vpop.permute.xlu1 %217 }
  0xc4   : > { %10732 = vst [vmem:[#allocation66_spill] sm:$0xff] %v7121_v14  ;;  %v2482_v23 = vshrl.u32 %v10714_v16, %v7081_v45  ;;  %v755_v2 = vor.u32 8388608, %v754_v39  ;;  %v447_v42 = vadd.s32 1, %v6354_v4  ;;  %v7135_v63 = vshrl.u32 %v2464_v55, 5 }
  0xc5   : > { %v2470_v15 = vshrl.u32 %v10706_v59, %v7081_v45  ;;  %v2473_v53 = vshrl.u32 %v10707_v22, %v7081_v45  ;;  %v2476_v47 = vshrl.u32 %v10708_v35, %v7081_v45  ;;  %v2480_v12 = vor.u32 %v2479_v28, %v2478_v26 }
  0xc6   : > { %10734 = vst [vmem:[#allocation68_spill] sm:$0xff] %v7135_v63  ;;  %v2481_v54 = vshll.u32 %v10709_v34, %v2466_v46  ;;  %v761_v38 = vand.u32 31, %v759_v51  ;;  %v7145_v3 = vmul.f32 %v6692_v20, %v203_v58  ;;  %v2469_v39 = vshll.u32 %v10724_v6, %v2466_v46 }
  0xc7   : > { %v2472_v55 = vshll.u32 %v10706_v59, %v2466_v46  ;;  %v2475_v4 = vshll.u32 %v10707_v22, %v2466_v46  ;;  %v2920_v62 = vand.u32 2139095040, %v7130_v41  ;;  %v7152_v17 = vand.u32 65535, %v7121_v14 }
  0xc8   : > { %10735 = vst [vmem:[#allocation69_spill] sm:$0xff] %v7145_v3  ;;  %v2483_v10 = vor.u32 %v2482_v23, %v2481_v54  ;;  %v7154_v45 = vshll.u32 %v755_v2, 8  ;;  %vm448_vm15 = vcmp.gt.s32.totalorder %v447_v42, 0  ;;  %v7156_v26 = vor.u32 %v2470_v15, %v2469_v39 }
  0xc9   : > { %10736 = vst [vmem:[#allocation70_spill] sm:$0xff] %v7152_v17  ;;  %v7158_v28 = vor.u32 %v2473_v53, %v2472_v55  ;;  %v7160_v58 = vor.u32 %v2476_v47, %v2475_v4  ;;  %vm10522_vm3 = vcmp.lt.s32.totalorder %v7135_v63, 4  ;;  %v7166_v13 = vshrl.u32 %v7121_v14, 16 }
  0xca   : > { %10737 = vst [vmem:[#allocation71_spill] sm:$0xff] %v7154_v45  ;;  %v2493_v46 = vsel %vm10522_vm3, %v2480_v12, 920167782  ;;  %v7168_v23 = vsub.s32 32, %v761_v38  ;;  %v445_v54 = vor.u32 8388608, %v444_v52  ;;  %v7170_v2 = vshrl.u32 %v759_v51, 5 }
  0xcb   : > { %10738 = vst [vmem:[#allocation72_spill] sm:$0xff] %v7156_v26  ;;  %v449_v17 = vsel %vm448_vm15, %v447_v42, 0  ;;  %v2921_v15 = vshrl.u32 %v2920_v62, 23  ;;  %v1370_v53 = vand.u32 2139095040, %v7145_v3  ;;  %vm10520_vm2 = vcmp.lt.s32.totalorder %v7135_v63, 1 }
  0xcc   : > { %10739 = vst [vmem:[#allocation73_spill] sm:$0xff] %v7158_v28  ;;  %vm10513_vm4 = vcmp.lt.s32.totalorder %v7135_v63, 3  ;;  %v2497_v47 = vsel %vm10522_vm3, %v2483_v10, 1326507024  ;;  %v7182_v52 = vsel %vm10520_vm2, %v7156_v26, %v7158_v28  ;;  %v7188_v62 = vsel %vm10520_vm2, %v7158_v28, %v7160_v58 }
  0xcd   : > { %10740 = vst [vmem:[#allocation74_spill] sm:$0xff] %v7160_v58  ;;  %v7191_v51 = vand.u32 65535, %v7154_v45  ;;  %v7194_v42 = vshrl.u32 %v7154_v45, 16  ;;  %v7199_v10 = vsel %vm10513_vm4, %v7160_v58, %v2493_v46  ;;  %v765_v55 = vshrl.u32 %v10706_v59, %v7168_v23 }
  0xce   : > { %10741 = vst [vmem:[#allocation75_spill] sm:$0xff] %v7166_v13  ;;  %v768_v4 = vshrl.u32 %v10707_v22, %v7168_v23  ;;  %v451_v39 = vand.u32 31, %v449_v17  ;;  %v7207_v14 = vsel %vm10513_vm4, %v2480_v12, %v2497_v47  ;;  %vm10629_vm15 = vcmp.lt.s32.totalorder %v7170_v2, 1 }
  0xcf   : > { %10742 = vst [vmem:[#allocation76_spill] sm:$0xff] %v7168_v23  ;;  %v6402_v28 = vadd.s32 4294967169, %v2921_v15  ;;  %v1371_v26 = vshrl.u32 %v1370_v53, 23  ;;  %v764_v13 = vshll.u32 %v10724_v6, %v761_v38  ;;  %v767_v46 = vshll.u32 %v10706_v59, %v761_v38 }
  0xd0   : > { %10743 = vst [vmem:[#allocation77_spill] sm:$0xff] %v7182_v52  ;;  %v771_v58 = vshrl.u32 %v10708_v35, %v7168_v23  ;;  %v198_v52 = vpop.permute.xlu0 %197  ;;  %v774_v12 = vshrl.u32 %v10709_v34, %v7168_v23  ;;  %v777_v47 = vshrl.u32 %v10714_v16, %v7168_v23  ;;  %vm782_vm4 = vcmp.lt.s32.totalorder %v7170_v2, 4 }
  0xd1   : > { %10744 = vst [vmem:[#allocation78_spill] sm:$0xff] %v7188_v62  ;;  %v7214_v62 = vshll.u32 %v445_v54, 8  ;;  %v7222_v15 = vor.u32 %v765_v55, %v764_v13  ;;  %v7224_v53 = vor.u32 %v768_v4, %v767_v46  ;;  %v7227_v63 = vsub.s32 32, %v451_v39 }
  0xd2   : > { %10745 = vst [vmem:[#allocation79_spill] sm:$0xff] %v7191_v51  ;;  %v776_v54 = vshll.u32 %v10709_v34, %v761_v38  ;;  %v2927_v45 = vadd.s32 1, %v6402_v28  ;;  %v7231_v51 = vmul.f32 %v6692_v20, %v198_v52  ;;  %vm10562_vm2 = vcmp.lt.s32.totalorder %v7170_v2, 3 }
  0xd3   : > { %10746 = vst [vmem:[#allocation80_spill] sm:$0xff] %v7194_v42  ;;  %v6372_v42 = vadd.s32 4294967169, %v1371_v26  ;;  %v7236_v23 = vshrl.u32 %v449_v17, 5  ;;  %v7239_v13 = vand.u32 65535, %v7214_v62  ;;  %v457_v26 = vshll.u32 %v10706_v59, %v451_v39 }
  0xd4   : > { %10747 = vst [vmem:[#allocation81_spill] sm:$0xff] %v7199_v10  ;;  %v770_v10 = vshll.u32 %v10707_v22, %v761_v38  ;;  %v778_v46 = vor.u32 %v777_v47, %v776_v54  ;;  %v7248_v28 = vsel %vm10629_vm15, %v7222_v15, %v7224_v53  ;;  %v455_v17 = vshrl.u32 %v10706_v59, %v7227_v63 }
  0xd5   : > { %10748 = vst [vmem:[#allocation82_spill] sm:$0xff] %v7207_v14  ;;  %v773_v14 = vshll.u32 %v10708_v35, %v761_v38  ;;  %v454_v38 = vshll.u32 %v10724_v6, %v451_v39  ;;  %v10757_v52 = vand.u32 2147483647, %v7130_v41  ;;  %vm2928_vm3 = vcmp.gt.s32.totalorder %v2927_v45, 0 }
  0xd6   : > { %10749 = vst [vmem:[#allocation83_spill] sm:$0xff] %v7214_v62  ;;  %v7233_v18 = vor.u32 %v771_v58, %v770_v10  ;;  %v464_v58 = vshrl.u32 %v10709_v34, %v7227_v63  ;;  %v1215_v47 = vand.u32 2139095040, %v7231_v51  ;;  %v458_v54 = vshrl.u32 %v10707_v22, %v7227_v63 }
  0xd7   : > { %10750 = vst [vmem:[#allocation84_spill] sm:$0xff] %v7222_v15  ;;  %v775_v4 = vor.u32 %v774_v12, %v773_v14  ;;  %v467_v14 = vshrl.u32 %v10714_v16, %v7227_v63  ;;  %v2924_v10 = vand.u32 8388607, %v10757_v52  ;;  %v1377_v12 = vadd.s32 1, %v6372_v42 }
  0xd8   : > { %10751 = vst [vmem:[#allocation85_spill] sm:$0xff] %v7224_v53  ;;  %v463_v55 = vshll.u32 %v10708_v35, %v451_v39  ;;  %v10758_v15 = vand.u32 2147483647, %v7145_v3  ;;  %v7271_v42 = vsel %vm10629_vm15, %v7224_v53, %v7233_v18  ;;  %v792_v52 = vsel %vm782_vm4, %v778_v46, 1326507024 }
  0xd9   : > { %10752 = vst [vmem:[#allocation86_spill] sm:$0xff] %v7227_v63  ;;  %v788_v36 = vsel %vm782_vm4, %v775_v4, 920167782  ;;  %v460_v41 = vshll.u32 %v10707_v22, %v451_v39  ;;  %v461_v25 = vshrl.u32 %v10708_v35, %v7227_v63  ;;  %v2929_v31 = vsel %vm2928_vm3, %v2927_v45, 0 }
  0xda   : > { %10753 = vst [vmem:[#allocation87_spill] sm:$0xff] %v7231_v51  ;;  %v465_v3 = vor.u32 %v464_v58, %v463_v55  ;;  %v2925_v37 = vor.u32 8388608, %v2924_v10  ;;  %vm1378_vm11 = vcmp.gt.s32.totalorder %v1377_v12, 0  ;;  %v1216_v56 = vshrl.u32 %v1215_v47, 23 }
  0xdb   : > { %10754 = vst [vmem:[#allocation88_spill] sm:$0xff] %v7236_v23  ;;  %v7279_v11 = vmul.f32 %v6692_v20, %v218_v29  ;;  %v7281_v32 = vor.u32 %v455_v17, %v454_v38  ;;  %v7283_v53 = vor.u32 %v458_v54, %v457_v26  ;;  %v10538_v46 = vand.u32 2147483647, %v7231_v51  ;;  %v213_v17 = vpop.permute.xlu0 %212 }
  0xdc   : > { %10755 = vst [vmem:[#allocation89_spill] sm:$0xff] %v7239_v13  ;;  %v466_v13 = vshll.u32 %v10709_v34, %v451_v39  ;;  %v7289_v39 = vsel %vm10562_vm2, %v7233_v18, %v788_v36  ;;  %v7293_v45 = vsel %vm10562_vm2, %v775_v4, %v792_v52  ;;  %vm10561_vm3 = vcmp.lt.s32.totalorder %v7236_v23, 4 }
  0xdd   : > { %10756 = vst [vmem:[#allocation90_spill] sm:$0xff] %v7248_v28  ;;  %v1374_v28 = vand.u32 8388607, %v10758_v15  ;;  %v2931_v29 = vand.u32 31, %v2929_v31  ;;  %vm10551_vm10 = vcmp.lt.s32.totalorder %v7236_v23, 1  ;;  %v1379_v38 = vsel %vm1378_vm11, %v1377_v12, 0 }
  0xde   : > { %10759 = vst [vmem:[#allocation91_spill] sm:$0xff] %v7271_v42  ;;  %v468_v15 = vor.u32 %v467_v14, %v466_v13  ;;  %v7296_v13 = vor.u32 %v461_v25, %v460_v41  ;;  %v478_v55 = vsel %vm10561_vm3, %v465_v3, 920167782  ;;  %v7303_v36 = vshll.u32 %v2925_v37, 8 }
  0xdf   : > { %10760 = vst [vmem:[#allocation92_spill] sm:$0xff] %v7279_v11  ;;  %v1375_v42 = vor.u32 8388608, %v1374_v28  ;;  %v6369_v28 = vadd.s32 4294967169, %v1216_v56  ;;  %v1835_v4 = vand.u32 2139095040, %v7279_v11  ;;  %vm10550_vm13 = vcmp.lt.s32.totalorder %v7236_v23, 3  ;;  %v233_v23 = vpop.permute.xlu1 %232 }
  0xe0   : > { %10761 = vst [vmem:[#allocation93_spill] sm:$0xff] %v7281_v32  ;;  %v482_v26 = vsel %vm10561_vm3, %v468_v15, 1326507024  ;;  %v7311_v25 = vsel %vm10551_vm10, %v7281_v32, %v7283_v53  ;;  %v7317_v58 = vand.u32 8388607, %v10538_v46  ;;  %v7320_v37 = vshrl.u32 %v7214_v62, 16 }
  0xe1   : > { %10762 = vst [vmem:[#allocation94_spill] sm:$0xff] %v7283_v53  ;;  %v7313_v41 = vshll.u32 %v1375_v42, 8  ;;  %v7322_v56 = vsub.s32 32, %v2931_v29  ;;  %v1381_v14 = vand.u32 31, %v1379_v38  ;;  %v7328_v12 = vsel %vm10550_vm13, %v7296_v13, %v478_v55 }
  0xe2   : > { %10763 = vst [vmem:[#allocation95_spill] sm:$0xff] %v7289_v39  ;;  %v7334_v47 = vsel %vm10551_vm10, %v7283_v53, %v7296_v13  ;;  %v7338_v54 = vsel %vm10550_vm13, %v465_v3, %v482_v26  ;;  %v7341_v42 = vmul.f32 %v6692_v20, %v213_v17  ;;  %v7344_v52 = vand.u32 65535, %v7303_v36 }
  0xe3   : > { %10764 = vst [vmem:[#allocation96_spill] sm:$0xff] %v7296_v13  ;;  %v7347_v15 = vshrl.u32 %v7303_v36, 16  ;;  %v1222_v55 = vadd.s32 1, %v6369_v28  ;;  %v1836_v46 = vshrl.u32 %v1835_v4, 23  ;;  %v7349_v10 = vshrl.u32 %v2929_v31, 5 }
  0xe4   : > { %10765 = vst [vmem:[#allocation97_spill] sm:$0xff] %v7303_v36  ;;  %v7352_v51 = vand.u32 65535, %v7313_v41  ;;  %v7355_v62 = vshrl.u32 %v7313_v41, 16  ;;  %v2935_v26 = vshrl.u32 %v10706_v59, %v7322_v56  ;;  %v2944_v17 = vshrl.u32 %v10709_v34, %v7322_v56 }
  0xe5   : > { %10766 = vst [vmem:[#allocation98_spill] sm:$0xff] %v7311_v25  ;;  %v7362_v36 = vsub.s32 32, %v1381_v14  ;;  %v10780_v28 = vand.u32 2147483647, %v7279_v11  ;;  %v2934_v4 = vshll.u32 %v10724_v6, %v2931_v29  ;;  %v2947_v3 = vshrl.u32 %v10714_v16, %v7322_v56 }
  0xe6   : > { %10767 = vst [vmem:[#allocation99_spill] sm:$0xff] %v7313_v41  ;;  %v2943_v41 = vshll.u32 %v10708_v35, %v2931_v29  ;;  %vm1223_vm11 = vcmp.gt.s32.totalorder %v1222_v55, 0  ;;  %v2938_v11 = vshrl.u32 %v10707_v22, %v7322_v56  ;;  %vm10564_vm13 = vcmp.lt.s32.totalorder %v7349_v10, 1 }
  0xe7   : > { %10768 = vst [vmem:[#allocation100_spill] sm:$0xff] %v7320_v37  ;;  %v7366_v31 = vand.u32 8388607, %v10780_v28  ;;  %v2941_v28 = vshrl.u32 %v10708_v35, %v7322_v56  ;;  %vm10563_vm10 = vcmp.lt.s32.totalorder %v7349_v10, 4  ;;  %v7381_v53 = vor.u32 %v2935_v26, %v2934_v4 }
  0xe8   : > { %10769 = vst [vmem:[#allocation101_spill] sm:$0xff] %v7322_v56  ;;  %v2945_v32 = vor.u32 %v2944_v17, %v2943_v41  ;;  %v7383_v13 = vshrl.u32 %v1379_v38, 5  ;;  %v1388_v37 = vshrl.u32 %v10707_v22, %v7362_v36  ;;  %v1224_v56 = vsel %vm1223_vm11, %v1222_v55, 0 }
  0xe9   : > { %10770 = vst [vmem:[#allocation102_spill] sm:$0xff] %v7328_v12  ;;  %v1397_v26 = vshrl.u32 %v10714_v16, %v7362_v36  ;;  %v1680_v38 = vand.u32 2139095040, %v7341_v42  ;;  %v1396_v25 = vshll.u32 %v10709_v34, %v1381_v14  ;;  %v1226_v12 = vand.u32 31, %v1224_v56 }
  0xea   : > { %10771 = vst [vmem:[#allocation103_spill] sm:$0xff] %v7334_v47  ;;  %v1393_v47 = vshll.u32 %v10708_v35, %v1381_v14  ;;  %vm10573_vm3 = vcmp.lt.s32.totalorder %v7349_v10, 3  ;;  %vm10587_vm2 = vcmp.lt.s32.totalorder %v7383_v13, 4 }
  0xeb   : > { %10772 = vst [vmem:[#allocation104_spill] sm:$0xff] %v7338_v54  ;;  %v1387_v54 = vshll.u32 %v10706_v59, %v1381_v14  ;;  %v1681_v39 = vshrl.u32 %v1680_v38, 23 }
  0xec   : > { %10773 = vst [vmem:[#allocation105_spill] sm:$0xff] %v7341_v42 }
  0xed   : > { %10774 = vst [vmem:[#allocation106_spill] sm:$0xff] %v7344_v52  ;;  %v2940_v52 = vshll.u32 %v10707_v22, %v2931_v29 }
  0xee   : > { %10775 = vst [vmem:[#allocation107_spill] sm:$0xff] %v7347_v15  ;;  %v2937_v15 = vshll.u32 %v10706_v59, %v2931_v29 }
  0xef   : > { %10776 = vst [vmem:[#allocation108_spill] sm:$0xff] %v7349_v10  ;;  %v7397_v17 = vor.u32 %v2941_v28, %v2940_v52  ;;  %v7411_v28 = vor.u32 %v1388_v37, %v1387_v54 }
  0xf0   : > { %10777 = vst [vmem:[#allocation109_spill] sm:$0xff] %v7352_v51  ;;  %v6381_v51 = vadd.s32 4294967169, %v1836_v46  ;;  %v1385_v46 = vshrl.u32 %v10706_v59, %v7362_v36  ;;  %v7395_v41 = vor.u32 %v2938_v11, %v2937_v15  ;;  %v1390_v15 = vshll.u32 %v10707_v22, %v1381_v14 }
  0xf1   : > { %10778 = vst [vmem:[#allocation110_spill] sm:$0xff] %v7355_v62  ;;  %v2946_v62 = vshll.u32 %v10709_v34, %v2931_v29  ;;  %v1394_v29 = vshrl.u32 %v10709_v34, %v7362_v36 }
  0xf2   : > { %10779 = vst [vmem:[#allocation111_spill] sm:$0xff] %v7362_v36  ;;  %v1842_v4 = vadd.s32 1, %v6381_v51  ;;  %v2958_v51 = vsel %vm10563_vm10, %v2945_v32, 920167782 }
  0xf3   : > { %10781 = vst [vmem:[#allocation112_spill] sm:$0xff] %v7381_v53  ;;  %v2948_v63 = vor.u32 %v2947_v3, %v2946_v62  ;;  %v1384_v62 = vshll.u32 %v10724_v6, %v1381_v14  ;;  %v1391_v3 = vshrl.u32 %v10708_v35, %v7362_v36  ;;  %v1395_v55 = vor.u32 %v1394_v29, %v1393_v47 }
  0xf4   : > { %10782 = vst [vmem:[#allocation113_spill] sm:$0xff] %v7383_v13  ;;  %v1398_v36 = vor.u32 %v1397_v26, %v1396_v25  ;;  %vm1843_vm11 = vcmp.gt.s32.totalorder %v1842_v4, 0  ;;  %v7418_v29 = vmul.f32 %v6692_v20, %v233_v23  ;;  %v7430_v25 = vsel %vm10564_vm13, %v7395_v41, %v7397_v17 }
  0xf5   : > { %10783 = vst [vmem:[#allocation114_spill] sm:$0xff] %v7395_v41  ;;  %v2962_v11 = vsel %vm10563_vm10, %v2948_v63, 1326507024  ;;  %v7408_v52 = vor.u32 %v1385_v46, %v1384_v62  ;;  %v7414_v47 = vor.u32 %v1391_v3, %v1390_v15  ;;  %v7424_v63 = vsel %vm10564_vm13, %v7381_v53, %v7395_v41  ;;  %v228_v15 = vpop.permute.xlu0 %227 }
  0xf6   : > { %10784 = vst [vmem:[#allocation115_spill] sm:$0xff] %v7397_v17  ;;  %v1408_v37 = vsel %vm10587_vm2, %v1395_v55, 920167782  ;;  %v7434_v14 = vsub.s32 32, %v1226_v12  ;;  %v7439_v23 = vsel %vm10573_vm3, %v7397_v17, %v2958_v51  ;;  %v7443_v54 = vsel %vm10573_vm3, %v2945_v32, %v2962_v11 }
  0xf7   : > { %10785 = vst [vmem:[#allocation116_spill] sm:$0xff] %v7408_v52  ;;  %vm10575_vm10 = vcmp.lt.s32.totalorder %v7383_v13, 1  ;;  %v1844_v46 = vsel %vm1843_vm11, %v1842_v4, 0  ;;  %vm10574_vm13 = vcmp.lt.s32.totalorder %v7383_v13, 3  ;;  %v1412_v38 = vsel %vm10587_vm2, %v1398_v36, 1326507024 }
  0xf8   : > { %10786 = vst [vmem:[#allocation117_spill] sm:$0xff] %v7411_v28  ;;  %v7451_v26 = vsel %vm10575_vm10, %v7408_v52, %v7411_v28  ;;  %v6378_v62 = vadd.s32 4294967169, %v1681_v39  ;;  %v7458_v32 = vsel %vm10574_vm13, %v7414_v47, %v1408_v37  ;;  %v7464_v4 = vsel %vm10575_vm10, %v7411_v28, %v7414_v47 }
  0xf9   : > { %10787 = vst [vmem:[#allocation118_spill] sm:$0xff] %v7414_v47  ;;  %v10797_v3 = vor.u32 8388608, %v7317_v58  ;;  %v2300_v11 = vand.u32 2139095040, %v7418_v29  ;;  %v7471_v36 = vshrl.u32 %v1224_v56, 5  ;;  %v1230_v39 = vshrl.u32 %v10706_v59, %v7434_v14 }
  0xfa   : > { %10788 = vst [vmem:[#allocation119_spill] sm:$0xff] %v7418_v29  ;;  %v1233_v37 = vshrl.u32 %v10707_v22, %v7434_v14  ;;  %v1846_v41 = vand.u32 31, %v1844_v46  ;;  %v7479_v53 = vsel %vm10574_vm13, %v1395_v55, %v1412_v38  ;;  %v1229_v58 = vshll.u32 %v10724_v6, %v1226_v12 }
  0xfb   : > { %10789 = vst [vmem:[#allocation120_spill] sm:$0xff] %v7424_v63  ;;  %v7468_v51 = vshll.u32 %v10797_v3, 8  ;;  %v1236_v3 = vshrl.u32 %v10708_v35, %v7434_v14  ;;  %v1239_v56 = vshrl.u32 %v10709_v34, %v7434_v14  ;;  %v1232_v17 = vshll.u32 %v10706_v59, %v1226_v12 }
  0xfc   : > { %10790 = vst [vmem:[#allocation121_spill] sm:$0xff] %v7430_v25  ;;  %v1235_v25 = vshll.u32 %v10707_v22, %v1226_v12  ;;  %v7489_v63 = vmul.f32 %v6692_v20, %v228_v15  ;;  %v1242_v55 = vshrl.u32 %v10714_v16, %v7434_v14  ;;  %v1840_v38 = vor.u32 8388608, %v7366_v31 }
  0xfd   : > { %10791 = vst [vmem:[#allocation122_spill] sm:$0xff] %v7434_v14  ;;  %v2301_v10 = vshrl.u32 %v2300_v11, 23  ;;  %v7495_v28 = vor.u32 %v1230_v39, %v1229_v58  ;;  %v7497_v52 = vor.u32 %v1233_v37, %v1232_v17  ;;  %v7499_v47 = vsub.s32 32, %v1846_v41 }
  0xfe   : > { %10792 = vst [vmem:[#allocation123_spill] sm:$0xff] %v7439_v23  ;;  %v1238_v23 = vshll.u32 %v10708_v35, %v1226_v12  ;;  %v1241_v15 = vshll.u32 %v10709_v34, %v1226_v12  ;;  %vm10588_vm11 = vcmp.lt.s32.totalorder %v7471_v36, 1  ;;  %v7510_v31 = vshrl.u32 %v7468_v51, 16 }
  0xff   : > { %10793 = vst [vmem:[#allocation124_spill] sm:$0xff] %v7443_v54  ;;  %v1687_v54 = vadd.s32 1, %v6378_v62  ;;  %v7502_v62 = vor.u32 %v1236_v3, %v1235_v25  ;;  %v2145_v17 = vand.u32 2139095040, %v7489_v63  ;;  %vm10620_vm13 = vcmp.lt.s32.totalorder %v7471_v36, 3 }
 0x100   : > { %10794 = vst [vmem:[#allocation125_spill] sm:$0xff] %v7451_v26  ;;  %v10576_v26 = vand.u32 2147483647, %v7341_v42  ;;  %v1240_v20 = vor.u32 %v1239_v56, %v1238_v23  ;;  %v1243_v11 = vor.u32 %v1242_v55, %v1241_v15  ;;  %vm10589_vm10 = vcmp.lt.s32.totalorder %v7471_v36, 4 }
 0x101   : > { %10795 = vst [vmem:[#allocation126_spill] sm:$0xff] %v7458_v32  ;;  %v7506_v32 = vand.u32 65535, %v7468_v51  ;;  %vm1688_vm3 = vcmp.gt.s32.totalorder %v1687_v54, 0  ;;  %v6390_v25 = vadd.s32 4294967169, %v2301_v10  ;;  %v7519_v12 = vsel %vm10588_vm11, %v7495_v28, %v7497_v52 }
 0x102   : > { %10796 = vst [vmem:[#allocation127_spill] sm:$0xff] %v7464_v4  ;;  %v1859_v23 = vshrl.u32 %v10709_v34, %v7499_v47  ;;  %v7523_v39 = vshll.u32 %v1840_v38, 8  ;;  %v1684_v37 = vand.u32 8388607, %v10576_v26  ;;  %v1253_v58 = vsel %vm10589_vm10, %v1240_v20, 920167782 }
 0x103   : > { %10798 = vst [vmem:[#allocation128_spill] sm:$0xff] %v7468_v51  ;;  %v7533_v10 = vsel %vm10588_vm11, %v7497_v52, %v7502_v62  ;;  %v1862_v3 = vshrl.u32 %v10714_v16, %v7499_v47  ;;  %v1689_v56 = vsel %vm1688_vm3, %v1687_v54, 0  ;;  %v7537_v55 = vshrl.u32 %v1844_v46, 5 }
 0x104   : > { %10799 = vst [vmem:[#allocation129_spill] sm:$0xff] %v7479_v53  ;;  %v1858_v38 = vshll.u32 %v10708_v35, %v1846_v41  ;;  %v1861_v15 = vshll.u32 %v10709_v34, %v1846_v41  ;;  %v2146_v26 = vshrl.u32 %v2145_v17, 23  ;;  %v1850_v42 = vshrl.u32 %v10706_v59, %v7499_v47 }
 0x105   : > { %10800 = vst [vmem:[#allocation130_spill] sm:$0xff] %v7489_v63  ;;  %v1853_v4 = vshrl.u32 %v10707_v22, %v7499_v47  ;;  %v1856_v53 = vshrl.u32 %v10708_v35, %v7499_v47  ;;  %v2307_v13 = vadd.s32 1, %v6390_v25  ;;  %v1691_v54 = vand.u32 31, %v1689_v56 }
 0x106   : > { %10801 = vst [vmem:[#allocation131_spill] sm:$0xff] %v7495_v28  ;;  %v1860_v51 = vor.u32 %v1859_v23, %v1858_v38  ;;  %v1849_v28 = vshll.u32 %v10724_v6, %v1846_v41  ;;  %v1852_v14 = vshll.u32 %v10706_v59, %v1846_v41  ;;  %v1855_v17 = vshll.u32 %v10707_v22, %v1846_v41 }
 0x107   : > { %10802 = vst [vmem:[#allocation132_spill] sm:$0xff] %v7497_v52  ;;  %v1685_v52 = vor.u32 8388608, %v1684_v37  ;;  %v1257_v25 = vsel %vm10589_vm10, %v1243_v11, 1326507024  ;;  %vm10608_vm3 = vcmp.lt.s32.totalorder %v7537_v55, 4  ;;  %v6387_v23 = vadd.s32 4294967169, %v2146_v26 }
 0x108   : > { %10803 = vst [vmem:[#allocation133_spill] sm:$0xff] %v7499_v47  ;;  %v7559_v37 = vor.u32 %v1850_v42, %v1849_v28  ;;  %v7561_v38 = vor.u32 %v1853_v4, %v1852_v14  ;;  %v7563_v46 = vor.u32 %v1856_v53, %v1855_v17  ;;  %vm2308_vm2 = vcmp.gt.s32.totalorder %v2307_v13, 0  ;;  %v248_v17 = vpop.permute.xlu1 %247 }
 0x109   : > { %10804 = vst [vmem:[#allocation134_spill] sm:$0xff] %v7502_v62  ;;  %v1873_v41 = vsel %vm10608_vm3, %v1860_v51, 920167782  ;;  %v7575_v26 = vsel %vm10620_vm13, %v1240_v20, %v1257_v25  ;;  %v7580_v53 = vand.u32 65535, %v7523_v39  ;;  %vm10607_vm11 = vcmp.lt.s32.totalorder %v7537_v55, 1 }
 0x10a   : > { %10805 = vst [vmem:[#allocation135_spill] sm:$0xff] %v7506_v32  ;;  %v7554_v32 = vsel %vm10620_vm13, %v7502_v62, %v1253_v58  ;;  %v7569_v58 = vshll.u32 %v1685_v52, 8  ;;  %vm10606_vm10 = vcmp.lt.s32.totalorder %v7537_v55, 3  ;;  %v2309_v52 = vsel %vm2308_vm2, %v2307_v13, 0 }
 0x10b   : > { %10806 = vst [vmem:[#allocation136_spill] sm:$0xff] %v7510_v31  ;;  %v1863_v31 = vor.u32 %v1862_v3, %v1861_v15  ;;  %v7567_v3 = vsub.s32 32, %v1691_v54  ;;  %v10815_v15 = vand.u32 2147483647, %v7418_v29  ;;  %v2152_v14 = vadd.s32 1, %v6387_v23 }
 0x10c   : > { %10807 = vst [vmem:[#allocation137_spill] sm:$0xff] %v7523_v39  ;;  %v7589_v4 = vsel %vm10607_vm11, %v7559_v37, %v7561_v38  ;;  %v7594_v20 = vsel %vm10606_vm10, %v7563_v46, %v1873_v41  ;;  %v7603_v13 = vshrl.u32 %v7523_v39, 16  ;;  %v7612_v41 = vand.u32 65535, %v7569_v58 }
 0x10d   : > { %10808 = vst [vmem:[#allocation138_spill] sm:$0xff] %v7533_v10  ;;  %v2304_v11 = vand.u32 8388607, %v10815_v15  ;;  %v1877_v42 = vsel %vm10608_vm3, %v1863_v31, 1326507024  ;;  %v7600_v31 = vsel %vm10607_vm11, %v7561_v38, %v7563_v46  ;;  %v1695_v23 = vshrl.u32 %v10706_v59, %v7567_v3 }
 0x10e   : > { %10809 = vst [vmem:[#allocation139_spill] sm:$0xff] %v7537_v55  ;;  %v7607_v25 = vsel %vm10606_vm10, %v1860_v51, %v1877_v42  ;;  %v1698_v28 = vshrl.u32 %v10707_v22, %v7567_v3  ;;  %v1704_v29 = vshrl.u32 %v10709_v34, %v7567_v3  ;;  %v2311_v39 = vand.u32 31, %v2309_v52 }
 0x10f   : > { %10810 = vst [vmem:[#allocation140_spill] sm:$0xff] %v7559_v37  ;;  %v2305_v15 = vor.u32 8388608, %v2304_v11  ;;  %v1694_v51 = vshll.u32 %v10724_v6, %v1691_v54  ;;  %v1701_v42 = vshrl.u32 %v10708_v35, %v7567_v3  ;;  %vm2153_vm2 = vcmp.gt.s32.totalorder %v2152_v14, 0  ;;  %v7626_v11 = vld [vmem:[%s10425_s1] ss:$0 sm:$0xff] }
 0x110   : > { %10811 = vst [vmem:[#allocation141_spill] sm:$0xff] %v7561_v38  ;;  %v10823_v38 = vand.u32 2147483647, %v7489_v63  ;;  %v7631_v47 = vshrl.u32 %v1689_v56, 5  ;;  %v1707_v63 = vshrl.u32 %v10714_v16, %v7567_v3  ;;  %v7645_v55 = vsub.s32 32, %v2311_v39 }
 0x111   : > { %10812 = vst [vmem:[#allocation142_spill] sm:$0xff] %v7563_v46  ;;  %v7629_v46 = vmul.f32 %v7626_v11, %v248_v17  ;;  %v7650_v10 = vshrl.u32 %v7569_v58, 16  ;;  %vm625_vm13 = vcmp.lt.s32.totalorder %v6992_v19, 2 }
 0x112   : > { %10813 = vst [vmem:[#allocation143_spill] sm:$0xff] %v7567_v3  ;;  %v2149_v37 = vand.u32 8388607, %v10823_v38  ;;  %v1703_v38 = vshll.u32 %v10708_v35, %v1691_v54  ;;  %vm10618_vm10 = vcmp.lt.s32.totalorder %v7631_v47, 1  ;;  %vm10627_vm11 = vcmp.lt.s32.totalorder %v7631_v47, 3 }
 0x113   : > { %10814 = vst [vmem:[#allocation144_spill] sm:$0xff] %v7569_v58  ;;  %vm10619_vm3 = vcmp.lt.s32.totalorder %v7631_v47, 4  ;;  %v2323_v58 = vshll.u32 %v10708_v35, %v2311_v39 }
 0x114   : > { %10816 = vst [vmem:[#allocation145_spill] sm:$0xff] %v7580_v53  ;;  %v243_v53 = vpop.permute.xlu0 %242  ;;  %v1705_v56 = vor.u32 %v1704_v29, %v1703_v38  ;;  %v2150_v3 = vor.u32 8388608, %v2149_v37 }
 0x115   : > { %10817 = vst [vmem:[#allocation146_spill] sm:$0xff] %v7589_v4  ;;  %v7637_v4 = vor.u32 %v1695_v23, %v1694_v51  ;;  %v7653_v23 = vmul.f32 %v7626_v11, %v243_v53  ;;  %v2315_v53 = vshrl.u32 %v10706_v59, %v7645_v55 }
 0x116   : > { %10818 = vst [vmem:[#allocation147_spill] sm:$0xff] %v7594_v20  ;;  %v1700_v20 = vshll.u32 %v10707_v22, %v1691_v54  ;;  %v1718_v37 = vsel %vm10619_vm3, %v1705_v56, 920167782 }
 0x117   : > { %10819 = vst [vmem:[#allocation148_spill] sm:$0xff] %v7600_v31  ;;  %v1706_v31 = vshll.u32 %v10709_v34, %v1691_v54 }
 0x118   : > { %10820 = vst [vmem:[#allocation149_spill] sm:$0xff] %v7603_v13  ;;  %v1697_v13 = vshll.u32 %v10706_v59, %v1691_v54  ;;  %v7647_v62 = vor.u32 %v1701_v42, %v1700_v20  ;;  %v2318_v20 = vshrl.u32 %v10707_v22, %v7645_v55  ;;  %v2324_v42 = vshrl.u32 %v10709_v34, %v7645_v55 }
 0x119   : > { %10821 = vst [vmem:[#allocation150_spill] sm:$0xff] %v7607_v25  ;;  %v7641_v25 = vshll.u32 %v2305_v15, 8  ;;  %v1708_v51 = vor.u32 %v1707_v63, %v1706_v31  ;;  %v2321_v15 = vshrl.u32 %v10708_v35, %v7645_v55  ;;  %v2314_v54 = vshll.u32 %v10724_v6, %v2311_v39 }
 0x11a   : > { %10822 = vst [vmem:[#allocation151_spill] sm:$0xff] %v7612_v41  ;;  %v7643_v17 = vor.u32 %v1698_v28, %v1697_v13  ;;  %v2154_v41 = vsel %vm2153_vm2, %v2152_v14, 0  ;;  %v7683_v13 = vshrl.u32 %v2309_v52, 5  ;;  %v7698_v52 = vsel %vm10627_vm11, %v7647_v62, %v1718_v37 }
 0x11b   : > { %10824 = vst [vmem:[#allocation152_spill] sm:$0xff] %v7629_v46  ;;  %v7660_v29 = vand.u32 65535, %v7641_v25  ;;  %v7663_v28 = vshrl.u32 %v7641_v25, 16  ;;  %v2156_v14 = vand.u32 31, %v2154_v41  ;;  %v1722_v38 = vsel %vm10619_vm3, %v1708_v51, 1326507024 }
 0x11c   : > { %10825 = vst [vmem:[#allocation153_spill] sm:$0xff] %v7637_v4  ;;  %v7669_v63 = vsel %vm10618_vm10, %v7637_v4, %v7643_v17  ;;  %v7681_v31 = vsel %vm10618_vm10, %v7643_v17, %v7647_v62  ;;  %v7704_v4 = vor.u32 %v2315_v53, %v2314_v54  ;;  %vm10624_vm2 = vcmp.lt.s32.totalorder %v7683_v13, 1 }
 0x11d   : > { %10826 = vst [vmem:[#allocation154_spill] sm:$0xff] %v7641_v25  ;;  %v2317_v25 = vshll.u32 %v10706_v59, %v2311_v39  ;;  %vm10626_vm10 = vcmp.lt.s32.totalorder %v7683_v13, 3  ;;  %vm10625_vm3 = vcmp.lt.s32.totalorder %v7683_v13, 4 }
 0x11e   : > { %10827 = vst [vmem:[#allocation155_spill] sm:$0xff] %v7643_v17  ;;  %v7702_v17 = vsub.s32 32, %v2156_v14 }
 0x11f   : > { %10828 = vst [vmem:[#allocation156_spill] sm:$0xff] %v7645_v55  ;;  %v7706_v51 = vor.u32 %v2318_v20, %v2317_v25  ;;  %v7721_v25 = vshrl.u32 %v2154_v41, 5  ;;  %v2159_v41 = vshll.u32 %v10724_v6, %v2156_v14 }
 0x120   : > { %10829 = vst [vmem:[#allocation157_spill] sm:$0xff] %v7647_v62  ;;  %v2325_v62 = vor.u32 %v2324_v42, %v2323_v58  ;;  %v639_v58 = vsel %vm625_vm13, %v7072_v8, %v7085_v24  ;;  %v2166_v24 = vshrl.u32 %v10708_v35, %v7702_v17  ;;  %v7758_v20 = vshrl.u32 %v10714_v16, %v7702_v17 }
 0x121   : > { %10830 = vst [vmem:[#allocation158_spill] sm:$0xff] %v7650_v10  ;;  %v2326_v10 = vshll.u32 %v10709_v34, %v2311_v39  ;;  %v644_v42 = vshrl.u32 %v639_v58, 16 }
 0x122   : > { %10831 = vst [vmem:[#allocation159_spill] sm:$0xff] %v7653_v23 }
 0x123   : > { %10832 = vst [vmem:[#allocation160_spill] sm:$0xff] %v7660_v29  ;;  %v2320_v29 = vshll.u32 %v10707_v22, %v2311_v39  ;;  %v2160_v39 = vshrl.u32 %v10706_v59, %v7702_v17 }
 0x124   : > { %10833 = vst [vmem:[#allocation161_spill] sm:$0xff] %v7663_v28  ;;  %v2327_v28 = vshrl.u32 %v10714_v16, %v7645_v55  ;;  %v7713_v55 = vsel %vm10627_vm11, %v1705_v56, %v1722_v38  ;;  %v2162_v56 = vshll.u32 %v10706_v59, %v2156_v14 }
 0x125   : > { %10834 = vst [vmem:[#allocation162_spill] sm:$0xff] %v7669_v63  ;;  %v7715_v37 = vor.u32 %v2321_v15, %v2320_v29  ;;  %v2338_v29 = vsel %vm10625_vm3, %v2325_v62, 920167782  ;;  %v643_v15 = vand.u32 65535, %v639_v58  ;;  %v7760_v38 = vor.u32 %v2160_v39, %v2159_v41 }
 0x126   : > { %10835 = vst [vmem:[#allocation163_spill] sm:$0xff] %v7681_v31  ;;  %v7709_v31 = vshll.u32 %v2150_v3, 8  ;;  %v2328_v63 = vor.u32 %v2327_v28, %v2326_v10  ;;  %v2163_v3 = vshrl.u32 %v10707_v22, %v7702_v17  ;;  %v7735_v10 = vsel %vm10624_vm2, %v7704_v4, %v7706_v51 }
 0x127   : > { %10836 = vst [vmem:[#allocation164_spill] sm:$0xff] %v7683_v13  ;;  %v7748_v8 = vsel %vm10624_vm2, %v7706_v51, %v7715_v37  ;;  %v2169_v28 = vshrl.u32 %v10709_v34, %v7702_v17  ;;  %v647_v58 = vmul.u32 %v643_v15, %v6968_v49  ;;  %v7778_v39 = vsel %vm10626_vm10, %v7715_v37, %v2338_v29 }
 0x128   : > { %10837 = vst [vmem:[#allocation165_spill] sm:$0xff] %v7702_v17  ;;  %v7740_v54 = vand.u32 65535, %v7709_v31  ;;  %v2342_v53 = vsel %vm10625_vm3, %v2328_v63, 1326507024  ;;  %v635_v63 = vsel %vm625_vm13, %v7036_v9, %v7066_v61  ;;  %v646_v17 = vmul.u32 %v644_v42, %v6965_v60 }
 0x129   : > { %10838 = vst [vmem:[#allocation166_spill] sm:$0xff] %v7704_v4  ;;  %v7762_v4 = vor.u32 %v2163_v3, %v2162_v56  ;;  %v7782_v3 = vsel %vm10626_vm10, %v2325_v62, %v2342_v53  ;;  %vm2174_vm2 = vcmp.lt.s32.totalorder %v7721_v25, 1  ;;  %v645_v9 = vmul.u32 %v643_v15, %v6965_v60 }
 0x12a   : > { %10839 = vst [vmem:[#allocation167_spill] sm:$0xff] %v7706_v51  ;;  %v2165_v51 = vshll.u32 %v10707_v22, %v2156_v14  ;;  %v649_v56 = vshll.u32 %v646_v17, 16  ;;  %vm2177_vm3 = vcmp.lt.s32.totalorder %v7721_v25, 4  ;;  %vm2176_vm10 = vcmp.lt.s32.totalorder %v7721_v25, 3 }
 0x12b   : > { %10840 = vst [vmem:[#allocation168_spill] sm:$0xff] %v7709_v31  ;;  %v7797_v62 = vsel %vm2174_vm2, %v7760_v38, %v7762_v4  ;;  %v651_v29 = vshll.u32 %v647_v58, 16  ;;  %v7805_v15 = vshrl.u32 %v7709_v31, 16  ;;  %v10851_v61 = vmov 0  }
 0x12c   : > { %10841 = vst [vmem:[#allocation169_spill] sm:$0xff] %v7715_v37  ;;  %vm653_vm11 = vc.u32 %v645_v9, %v649_v56  ;;  %v608_v13 = vshrl.u32 %v10724_v6, %v6954_v50 }
 0x12d   : > { %10842 = vst [vmem:[#allocation170_spill] sm:$0xff] %v7735_v10  ;;  %v2168_v10 = vshll.u32 %v10708_v35, %v2156_v14  ;;  %v654_v37 = vsel %vm653_vm11, 1, %v10851_v61 }
 0x12e   : > { %10843 = vst [vmem:[#allocation171_spill] sm:$0xff] %v7740_v54 }
 0x12f   : > { %10844 = vst [vmem:[#allocation172_spill] sm:$0xff] %v7748_v8  ;;  %v7767_v8 = vshll.u32 %v10709_v34, %v2156_v14  ;;  %v7784_v14 = vor.u32 %v2166_v24, %v2165_v51  ;;  %v7786_v41 = vor.u32 %v2169_v28, %v2168_v10  ;;  %v648_v51 = vmul.u32 %v644_v42, %v6968_v49 }
 0x130   : > { %10845 = vst [vmem:[#allocation173_spill] sm:$0xff] %v7760_v38  ;;  %v665_v10 = vand.u32 65535, %v635_v63  ;;  %v655_v24 = vadd.s32 %v649_v56, %v645_v9  ;;  %v666_v28 = vshrl.u32 %v635_v63, 16  ;;  %v629_v42 = vsel %vm627_vm14, %v7026_v21, 2102212464 }
 0x131   : > { %10846 = vst [vmem:[#allocation174_spill] sm:$0xff] %v7762_v4  ;;  %v2183_v53 = vsel %vm2177_vm3, %v7786_v41, 920167782  ;;  %v7817_v63 = vsel %vm2174_vm2, %v7762_v4, %v7784_v14  ;;  %v650_v38 = vshrl.u32 %v646_v17, 16  ;;  %v10853_v17 = vand.u32 2147483647, %v7629_v46 }
 0x132   : > { %10847 = vst [vmem:[#allocation175_spill] sm:$0xff] %v7778_v39  ;;  %v669_v39 = vmul.u32 %v665_v10, %v6968_v49  ;;  %vm657_vm15 = vc.u32 %v655_v24, %v651_v29  ;;  %v668_v9 = vmul.u32 %v666_v28, %v6965_v60  ;;  %v667_v21 = vmul.u32 %v665_v10, %v6965_v60 }
 0x133   : > { %10848 = vst [vmem:[#allocation176_spill] sm:$0xff] %v7782_v3  ;;  %v656_v3 = vadd.s32 %v654_v37, %v648_v51  ;;  %v658_v31 = vsel %vm657_vm15, 1, %v10851_v61  ;;  %v628_v51 = vsel %vm624_vm9, %v608_v13, %v7006_v44  ;;  %v630_v29 = vsel %vm626_vm12, %v7008_v0, %v629_v42 }
 0x134   : > { %10849 = vst [vmem:[#allocation177_spill] sm:$0xff] %v7784_v14  ;;  %v671_v37 = vshll.u32 %v668_v9, 16  ;;  %v670_v24 = vmul.u32 %v666_v28, %v6968_v49  ;;  %v673_v56 = vshll.u32 %v669_v39, 16  ;;  %vm315_vm15 = vcmp.lt.s32.totalorder %v7047_v30, 2 }
 0x135   : > { %10850 = vst [vmem:[#allocation178_spill] sm:$0xff] %v7805_v15  ;;  %v660_v15 = vadd.s32 %v658_v31, %v656_v3  ;;  %v7834_v60 = vand.u32 8388607, %v10853_v17  ;;  %v325_v44 = vsel %vm315_vm15, %v7100_v5, %v7111_v27  ;;  %v329_v0 = vsel %vm315_vm15, %v7117_v57, %v7125_v43 }
 0x136   : > { %10852 = vst [vmem:[#allocation179_spill] sm:$0xff] %v7817_v63  ;;  %vm675_vm14 = vc.u32 %v667_v21, %v671_v37  ;;  %v677_v50 = vadd.s32 %v671_v37, %v667_v21  ;;  %v631_v49 = vsel %vm625_vm13, %v628_v51, %v630_v29  ;;  %v652_v13 = vshrl.u32 %v647_v58, 16 }
 0x137   : > { %v661_v4 = vadd.s32 %v660_v15, %v650_v38  ;;  %v676_v31 = vsel %vm675_vm14, 1, %v10851_v61  ;;  %v7850_v3 = vsel %vm2176_vm10, %v7784_v14, %v2183_v53  ;;  %v333_v28 = vand.u32 65535, %v329_v0  ;;  %v10875_v14 = vld [vmem:[#allocation26_spill] sm:$0xff] }
 0x138   : > { %v678_v38 = vadd.s32 %v676_v31, %v670_v24  ;;  %vm679_vm9 = vc.u32 %v677_v50, %v673_v56  ;;  %v334_v5 = vshrl.u32 %v329_v0, 16  ;;  %v672_v15 = vshrl.u32 %v668_v9, 16 }
 0x139   : > { %v680_v10 = vsel %vm679_vm9, 1, %v10851_v61  ;;  %v7853_v27 = vadd.s32 %v661_v4, %v652_v13  ;;  %v355_v57 = vand.u32 65535, %v325_v44  ;;  %v674_v43 = vshrl.u32 %v669_v39, 16 }
 0x13a   : > { %v682_v42 = vadd.s32 %v680_v10, %v678_v38  ;;  %v685_v19 = vmul.u32 %v6939_v40, %v631_v49  ;;  %v336_v58 = vmul.u32 %v334_v5, %v7103_v1  ;;  %v337_v21 = vmul.u32 %v333_v28, %v7106_v33 }
 0x13b   : > { %v7858_v37 = vadd.s32 %v677_v50, %v673_v56  ;;  %v298_v51 = vshrl.u32 %v10724_v6, %v7010_v7  ;;  %v356_v29 = vshrl.u32 %v325_v44, 16  ;;  %v319_v4 = vsel %vm317_vm5, %v7078_v48, 2102212464 }
 0x13c   : > { %v683_v53 = vadd.s32 %v682_v42, %v672_v15  ;;  %v335_v9 = vmul.u32 %v333_v28, %v7103_v1  ;;  %v339_v39 = vshll.u32 %v336_v58, 16  ;;  %v359_v40 = vmul.u32 %v355_v57, %v7106_v33 }
 0x13d   : > { %vm687_vm13 = vc.u32 %v7853_v27, %v7858_v37  ;;  %v338_v56 = vmul.u32 %v334_v5, %v7106_v33  ;;  %v358_v50 = vmul.u32 %v356_v29, %v7103_v1  ;;  %v341_v17 = vshll.u32 %v337_v21, 16 }
 0x13e   : > { %v684_v24 = vadd.s32 %v683_v53, %v674_v43  ;;  %vm343_vm12 = vc.u32 %v335_v9, %v339_v39  ;;  %v345_v7 = vadd.s32 %v339_v39, %v335_v9  ;;  %v357_v31 = vmul.u32 %v355_v57, %v7103_v1  ;;  %v10854_v1 = vld [vmem:[#allocation21_spill] sm:$0xff]  ;;  %v10856_v9 = vld [vmem:[#allocation63_spill] sm:$0xff] }
 0x13f   : > { %v340_v48 = vshrl.u32 %v336_v58, 16  ;;  %v344_v0 = vsel %vm343_vm12, 1, %v10851_v61  ;;  %v361_v49 = vshll.u32 %v358_v50, 16  ;;  %v360_v38 = vmul.u32 %v356_v29, %v7106_v33 }
 0x140   : > { %v688_v44 = vadd.s32 1, %v684_v24  ;;  %v346_v13 = vadd.s32 %v344_v0, %v338_v56  ;;  %vm347_vm5 = vc.u32 %v345_v7, %v341_v17  ;;  %v363_v10 = vshll.u32 %v359_v40, 16  ;;  %v10857_v17 = vld [vmem:[#allocation64_spill] sm:$0xff] }
 0x141   : > { %v348_v5 = vsel %vm347_vm5, 1, %v10851_v61  ;;  %vm365_vm11 = vc.u32 %v357_v31, %v361_v49  ;;  %v367_v15 = vadd.s32 %v361_v49, %v357_v31  ;;  %vm1090_vm14 = vcmp.lt.s32.totalorder %v10854_v1, 2  ;;  %v10880_v1 = vld [vmem:[#allocation91_spill] sm:$0xff] }
 0x142   : > { %v689_v28 = vsel %vm687_vm13, %v688_v44, %v684_v24  ;;  %v350_v43 = vadd.s32 %v348_v5, %v346_v13  ;;  %v366_v53 = vsel %vm365_vm11, 1, %v10851_v61  ;;  %v10855_v57 = vor.u32 %v7758_v20, %v7767_v8  ;;  %v10858_v20 = vld [vmem:[#allocation36_spill] sm:$0xff] }
 0x143   : > { %v690_v42 = vadd.s32 %v689_v28, %v685_v19  ;;  %v318_v33 = vsel %vm314_vm1, %v298_v51, %v10856_v9  ;;  %v368_v29 = vadd.s32 %v366_v53, %v360_v38  ;;  %vm369_vm9 = vc.u32 %v367_v15, %v363_v10  ;;  %v10859_v44 = vld [vmem:[#allocation32_spill] sm:$0xff]  ;;  %v258_v9 = vpop.permute.xlu0 %257 }
 0x144   : > { %v2187_v58 = vsel %vm2177_vm3, %v10855_v57, 1326507024  ;;  %v342_v24 = vshrl.u32 %v337_v21, 16  ;;  %v351_v19 = vadd.s32 %v350_v43, %v340_v48  ;;  %v370_v56 = vsel %vm369_vm9, 1, %v10851_v61 }
 0x145   : > { %v691_v39 = vadd.s32 536870912, %v690_v42  ;;  %v320_v7 = vsel %vm316_vm0, %v10857_v17, %v319_v4  ;;  %v362_v31 = vshrl.u32 %v358_v50, 16  ;;  %v372_v8 = vadd.s32 %v370_v56, %v368_v29 }
 0x146   : > { %v1104_v0 = vsel %vm1090_vm14, %v10859_v44, %v10858_v20  ;;  %v7895_v51 = vadd.s32 %v351_v19, %v342_v24  ;;  %v7900_v48 = vsel %vm2176_vm10, %v7786_v41, %v2187_v58  ;;  %v10636_v4 = vand.u32 2147483647, %v7653_v23  ;;  %v10862_v41 = vld [vmem:[#allocation30_spill] sm:$0xff]  ;;  %v10864_v19 = vld [vmem:[#allocation31_spill] sm:$0xff] }
 0x147   : > { %v7893_v49 = vshrl.u32 %v691_v39, 30  ;;  %v1108_v13 = vand.u32 65535, %v1104_v0  ;;  %v1109_v21 = vshrl.u32 %v1104_v0, 16  ;;  %10860 = vst [vmem:[#allocation21_spill] sm:$0xff] %v7900_v48  ;;  %v364_v50 = vshrl.u32 %v359_v40, 16  ;;  %v10867_v20 = vld [vmem:[#allocation62_spill] sm:$0xff] }
 0x148   : > { %v373_v38 = vadd.s32 %v372_v8, %v362_v31  ;;  %v10861_v28 = vand.u32 2139095040, %v7629_v46  ;;  %v2770_v43 = vor.u32 8388608, %v7834_v60  ;;  %v7907_v57 = vadd.s32 %v367_v15, %v363_v10  ;;  %v10863_v60 = vld [vmem:[#allocation35_spill] sm:$0xff]  ;;  %v10865_v15 = vld [vmem:[#allocation33_spill] sm:$0xff] }
 0x149   : > { %v693_v53 = vshll.u32 %v7893_v49, 30  ;;  %v321_v29 = vsel %vm315_vm15, %v318_v33, %v320_v7  ;;  %v1110_v58 = vmul.u32 %v1108_v13, %v10862_v41  ;;  %v7913_v24 = vmul.u32 %v1109_v21, %v10862_v41 }
 0x14a   : > { %v2766_v5 = vshrl.u32 %v10861_v28, 23  ;;  %v374_v39 = vadd.s32 %v373_v38, %v364_v50  ;;  %vm377_vm0 = vc.u32 %v7895_v51, %v7907_v57  ;;  %v1100_v10 = vsel %vm1090_vm14, %v10864_v19, %v10863_v60 }
 0x14b   : > { %v7915_v40 = vsub.s32 %v690_v42, %v693_v53  ;;  %v7924_v56 = vmul.u32 %v1108_v13, %v10865_v15  ;;  %v2610_v30 = vand.u32 2139095040, %v7653_v23  ;;  %v7929_v33 = vand.u32 8388607, %v10636_v4 }
 0x14c   : > { %v378_v17 = vadd.s32 1, %v374_v39  ;;  %v1114_v42 = vshll.u32 %v7913_v24, 16  ;;  %v6399_v7 = vadd.s32 4294967169, %v2766_v5  ;;  %v7933_v31 = vmul.f32 %v7626_v11, %v258_v9 }
 0x14d   : > { %vm695_vm1 = vcmp.lt.s32.totalorder %v7915_v40, 0  ;;  %v696_v8 = vsub.s32 0, %v7915_v40  ;;  %v375_v44 = vmul.u32 %v10867_v20, %v321_v29  ;;  %v1131_v13 = vshrl.u32 %v1100_v10, 16  ;;  %v10869_v20 = vld [vmem:[#allocation18_spill] sm:$0xff] }
 0x14e   : > { %10866 = vst [vmem:[#allocation63_spill] sm:$0xff] %v7933_v31  ;;  %v379_v0 = vsel %vm377_vm0, %v378_v17, %v374_v39  ;;  %vm1118_vm15 = vc.u32 %v1110_v58, %v1114_v42  ;;  %v1113_v38 = vmul.u32 %v1109_v21, %v10865_v15  ;;  %v1116_v28 = vshll.u32 %v7924_v56, 16 }
 0x14f   : > { %v697_v50 = vsel %vm695_vm1, %v696_v8, %v7915_v40  ;;  %v1130_v53 = vand.u32 65535, %v1100_v10  ;;  %v7941_v5 = vshll.u32 %v2770_v43, 8  ;;  %v380_v9 = vadd.s32 %v379_v0, %v375_v44 }
 0x150   : > { %v698_v11 = vclz %v697_v50  ;;  %v1119_v60 = vsel %vm1118_vm15, 1, %v10851_v61  ;;  %v7944_v19 = vshrl.u32 %v2610_v30, 23  ;;  %v1120_v17 = vadd.s32 %v1114_v42, %v1110_v58 }
 0x151   : > { %10868 = vst [vmem:[#allocation64_spill] sm:$0xff] %v7941_v5  ;;  %vm594_vm13 = vcmp.lt.s32.totalorder %v10869_v20, 0  ;;  %v686_v21 = vadd.s32 %v7858_v37, %v7853_v27  ;;  %v381_v10 = vadd.s32 536870912, %v380_v9  ;;  %v7952_v43 = vmul.u32 %v1131_v13, %v10862_v41  ;;  %v10870_v37 = vld [vmem:[#allocation14_spill] sm:$0xff] }
 0x152   : > { %v6358_v8 = vadd.s32 4294967294, %v698_v11  ;;  %v1121_v44 = vadd.s32 %v1119_v60, %v1113_v38  ;;  %vm1122_vm12 = vc.u32 %v1120_v17, %v1116_v28  ;;  %v1132_v30 = vmul.u32 %v1130_v53, %v10862_v41 }
 0x153   : > { %v7956_v0 = vmul.u32 %v1130_v53, %v10865_v15  ;;  %v382_v50 = vshrl.u32 %v381_v10, 30  ;;  %v1123_v58 = vsel %vm1122_vm12, 1, %v10851_v61  ;;  %v1136_v42 = vshll.u32 %v7952_v43, 16 }
 0x154   : > { %vm6359_vm5 = vcmp.lt.s32.totalorder %v6358_v8, 0  ;;  %v716_v27 = vsub.s32 4, %v7893_v49  ;;  %v1073_v11 = vshrl.u32 %v10724_v6, %v10870_v37  ;;  %v1135_v38 = vmul.u32 %v1131_v13, %v10865_v15 }
 0x155   : > { %v701_v4 = vsel %vm6359_vm5, 0, %v6358_v8  ;;  %v10871_v28 = vand.u32 2147483647, %v10869_v20  ;;  %v383_v17 = vshll.u32 %v382_v50, 30  ;;  %v1115_v10 = vshrl.u32 %v7913_v24, 16 }
 0x156   : > { %v702_v53 = vsub.s32 32, %v701_v4  ;;  %v706_v60 = vsub.s32 4294967266, %v701_v4  ;;  %v703_v8 = vshll.u32 %v7915_v40, %v701_v4  ;;  %v1125_v39 = vadd.s32 %v1123_v58, %v1121_v44 }
 0x157   : > { %vm7966_vm11 = vcmp.le.f32.partialorder %v10871_v28, 0.7853982  ;;  %v1138_v29 = vshll.u32 %v7956_v0, 16  ;;  %vm1140_vm9 = vc.u32 %v1132_v30, %v1136_v42  ;;  %v384_v15 = vsub.s32 %v380_v9, %v383_v17  ;;  %v10874_v28 = vld [vmem:[#allocation23_spill] sm:$0xff] }
 0x158   : > { %v704_v37 = vshrl.u32 %v686_v21, %v702_v53  ;;  %v707_v46 = vadd.s32 127, %v706_v60  ;;  %v1141_v13 = vsel %vm1140_vm9, 1, %v10851_v61  ;;  %vm284_vm0 = vcmp.lt.s32.totalorder %v10874_v28, 0  ;;  %v10876_v21 = vld [vmem:[#allocation24_spill] sm:$0xff] }
 0x159   : > { %v3075_v23 = vand.u32 2139095040, %v7933_v31  ;;  %v1094_v54 = vsel %vm1092_vm6, %v10875_v14, 2102212464  ;;  %v1142_v24 = vadd.s32 %v1136_v42, %v1132_v30  ;;  %v1143_v63 = vadd.s32 %v1141_v13, %v1135_v38 }
 0x15a   : > { %v705_v4 = vor.u32 %v704_v37, %v703_v8  ;;  %v708_v40 = vshll.u32 %v707_v46, 23  ;;  %vm385_vm1 = vcmp.lt.s32.totalorder %v384_v15, 0  ;;  %v386_v44 = vsub.s32 0, %v384_v15  ;;  %v10877_v46 = vld [vmem:[#allocation25_spill] sm:$0xff] }
 0x15b   : > { %v7979_v58 = vadd.s32 1, %v6399_v7  ;;  %v717_v9 = vsel %vm594_vm13, %v716_v27, %v7893_v49  ;;  %v1093_v53 = vsel %vm1089_vm7, %v1073_v11, %v10876_v21  ;;  %vm1144_vm15 = vc.u32 %v1142_v24, %v1138_v29 }
 0x15c   : > { %v709_v60 = vor.u32 4788187, %v708_v40  ;;  %v387_v17 = vsel %vm385_vm1, %v386_v44, %v384_v15  ;;  %v1117_v14 = vshrl.u32 %v7924_v56, 16  ;;  %v1126_v30 = vadd.s32 %v1125_v39, %v1115_v10 }
 0x15d   : > { %v388_v42 = vclz %v387_v17  ;;  %v1095_v7 = vsel %vm1091_vm8, %v10877_v46, %v1094_v54  ;;  %v1137_v38 = vshrl.u32 %v7952_v43, 16  ;;  %v1145_v8 = vsel %vm1144_vm15, 1, %v10851_v61 }
 0x15e   : > { %v710_v49 = vand.u32 2147483647, %v709_v60  ;;  %v712_v27 = vcvt.s32.f32 %v705_v4  ;;  %v406_v37 = vsub.s32 4, %v382_v50  ;;  %v1147_v13 = vadd.s32 %v1145_v8, %v1143_v63 }
 0x15f   : > { %v7994_v11 = vand.u32 65535, %v7941_v5  ;;  %v719_v56 = vsel %vm7966_vm11, 0, %v717_v9  ;;  %v6352_v39 = vadd.s32 4294967294, %v388_v42  ;;  %v1139_v10 = vshrl.u32 %v7956_v0, 16 }
 0x160   : > { %v8000_v40 = vshrl.u32 %v7941_v5, 16  ;;  %v713_v54 = vmul.f32 %v712_v27, %v710_v49  ;;  %v1127_v43 = vadd.s32 %v1126_v30, %v1117_v14  ;;  %v1146_v44 = vadd.s32 %v1142_v24, %v1138_v29 }
 0x161   : > { %10878 = vst [vmem:[#allocation36_spill] sm:$0xff] %v7994_v11  ;;  %v376_v4 = vadd.s32 %v7907_v57, %v7895_v51  ;;  %vm6353_vm6 = vcmp.lt.s32.totalorder %v6352_v39, 0  ;;  %v1096_v63 = vsel %vm1090_vm14, %v1093_v53, %v1095_v7  ;;  %v1148_v21 = vadd.s32 %v1147_v13, %v1137_v38 }
 0x162   : > { %10879 = vst [vmem:[#allocation32_spill] sm:$0xff] %v8000_v40  ;;  %v714_v60 = vxor.u32 2147483648, %v713_v54  ;;  %v736_v17 = vadd.s32 3, %v719_v56  ;;  %v391_v9 = vsel %vm6353_vm6, 0, %v6352_v39  ;;  %v407_v0 = vsel %vm284_vm0, %v406_v37, %v382_v50 }
 0x163   : > { %v392_v42 = vsub.s32 32, %v391_v9  ;;  %v396_v46 = vsub.s32 4294967266, %v391_v9  ;;  %v1149_v8 = vadd.s32 %v1148_v21, %v1139_v10  ;;  %vm780_vm7 = vcmp.lt.s32.totalorder %v7170_v2, 2 }
 0x164   : > { %v715_v29 = vsel %vm594_vm13, %v714_v60, %v713_v54  ;;  %v393_v51 = vshll.u32 %v384_v15, %v391_v9  ;;  %vm1152_vm8 = vc.u32 %v1127_v43, %v1146_v44  ;;  %v8015_v57 = vsel %vm780_vm7, %v10880_v1, %v7293_v45  ;;  %v10884_v45 = vld [vmem:[#allocation20_spill] sm:$0xff] }
 0x165   : > { %v8020_v50 = vsel %vm7966_vm11, %v10869_v20, %v715_v29  ;;  %v394_v24 = vshrl.u32 %v376_v4, %v392_v42  ;;  %v397_v53 = vadd.s32 127, %v396_v46  ;;  %v1153_v14 = vadd.s32 1, %v1149_v8 }
 0x166   : > { %v8023_v30 = vadd.s32 4294967169, %v7944_v19  ;;  %v720_v15 = vmul.f32 %v8020_v50, %v8020_v50  ;;  %v10881_v7 = vand.u32 2147483647, %v10874_v28  ;;  %v1150_v49 = vmul.u32 %v10884_v45, %v1096_v63 }
 0x167   : > { %v395_v41 = vor.u32 %v394_v24, %v393_v51  ;;  %v398_v27 = vshll.u32 %v397_v53, 23  ;;  %v1154_v37 = vsel %vm1152_vm8, %v1153_v14, %v1149_v8  ;;  %v799_v13 = vshrl.u32 %v8015_v57, 16  ;;  %v10887_v24 = vld [vmem:[#allocation79_spill] sm:$0xff] }
 0x168   : > { %vm8029_vm14 = vcmp.le.f32.partialorder %v10881_v7, 0.7853982  ;;  %v721_v39 = vmul.f32 -0.001358992, %v720_v15  ;;  %v728_v10 = vmul.f32 -0.00019511016, %v720_v15  ;;  %v1155_v54 = vadd.s32 %v1154_v37, %v1150_v49 }
 0x169   : > { %v409_v19 = vsel %vm8029_vm14, 0, %v407_v0  ;;  %v10885_v4 = vor.u32 8388608, %v7929_v33  ;;  %v8043_v60 = vshrl.u32 %v3075_v23, 23  ;;  %v8045_v63 = vand.u32 3, %v736_v17 }
 0x16a   : > { %v399_v9 = vor.u32 4788187, %v398_v27  ;;  %v722_v42 = vadd.f32 0.041655596, %v721_v39  ;;  %v729_v46 = vadd.f32 0.008332121, %v728_v10  ;;  %v402_v1 = vcvt.s32.f32 %v395_v41 }
 0x16b   : > { %v8039_v21 = vshll.u32 %v10885_v4, 8  ;;  %v8047_v8 = vand.u32 3, %v719_v56  ;;  %v1156_v29 = vadd.s32 536870912, %v1155_v54  ;;  %v426_v0 = vadd.s32 3, %v409_v19  ;;  %v10888_v39 = vld [vmem:[#allocation76_spill] sm:$0xff] }
 0x16c   : > { %v400_v51 = vand.u32 2147483647, %v399_v9  ;;  %v8050_v53 = vmul.u32 %v799_v13, %v10887_v24  ;;  %v723_v33 = vmul.f32 %v722_v42, %v720_v15  ;;  %v730_v14 = vmul.f32 %v729_v46, %v720_v15 }
 0x16d   : > { %10886 = vst [vmem:[#allocation30_spill] sm:$0xff] %v8039_v21  ;;  %v8052_v7 = vand.u32 3, %v409_v19  ;;  %v8054_v23 = vshrl.u32 %v1156_v29, 30  ;;  %vm742_vm13 = vcmp.eq.s32.totalorder %v8045_v63, 2  ;;  %v8057_v45 = vadd.s32 %v1146_v44, %v1127_v43  ;;  %v10889_v19 = vld [vmem:[#allocation95_spill] sm:$0xff]  ;;  %v10891_v29 = vld [vmem:[#allocation84_spill] sm:$0xff] }
 0x16e   : > { %v403_v17 = vmul.f32 %v402_v1, %v400_v51  ;;  %v784_v56 = vsel %vm782_vm4, %v7233_v18, 2102212464  ;;  %v798_v49 = vand.u32 65535, %v8015_v57  ;;  %v724_v41 = vadd.f32 -0.4999988, %v723_v33  ;;  %v10890_v18 = vld [vmem:[#allocation90_spill] sm:$0xff] }
 0x16f   : > { %v731_v27 = vadd.f32 -0.16666654, %v730_v14  ;;  %v1158_v37 = vshll.u32 %v8054_v23, 30  ;;  %v763_v10 = vshrl.u32 %v10724_v6, %v10888_v39  ;;  %vm739_vm12 = vcmp.eq.s32.totalorder %v8045_v63, 0  ;;  %v10895_v14 = vld [vmem:[#allocation80_spill] sm:$0xff] }
 0x170   : > { %vm3681_vm5 = vcmp.eq.s32.totalorder %v8047_v8, 0  ;;  %vm3684_vm11 = vcmp.eq.s32.totalorder %v8047_v8, 2  ;;  %v404_v43 = vxor.u32 2147483648, %v403_v17  ;;  %v8069_v44 = vand.u32 3, %v426_v0  ;;  %v10893_v0 = vld [vmem:[#allocation85_spill] sm:$0xff] }
 0x171   : > { %v8075_v57 = vsel %vm780_vm7, %v10890_v18, %v10889_v19  ;;  %v804_v4 = vshll.u32 %v8050_v53, 16  ;;  %v725_v9 = vmul.f32 %v724_v41, %v720_v15  ;;  %v732_v42 = vmul.f32 %v731_v27, %v720_v15 }
 0x172   : > { %vm738_vm4 = vcmp.lt.s32.totalorder %v8045_v63, 2  ;;  %vm3680_vm9 = vcmp.lt.s32.totalorder %v8047_v8, 2  ;;  %v8080_v46 = vsub.s32 %v1155_v54, %v1158_v37  ;;  %vm10892_vm1 = vcmp.lt.s32.totalorder %v7170_v2, 1 }
 0x173   : > { %v8085_v51 = vsel %vm10892_vm1, %v763_v10, %v10891_v29  ;;  %vm735_vm15 = vweird.f32 %v10869_v20  ;;  %v405_v1 = vsel %vm284_vm0, %v404_v43, %v403_v17  ;;  %vm10894_vm6 = vcmp.lt.s32.totalorder %v7170_v2, 3 }
 0x174   : > { %v8093_v15 = vsel %vm10894_vm6, %v10893_v0, %v784_v56  ;;  %v800_v33 = vmul.u32 %v798_v49, %v10887_v24  ;;  %v8097_v54 = vmul.u32 %v798_v49, %v10895_v14  ;;  %v726_v41 = vadd.f32 1.0, %v725_v9 }
 0x175   : > { %v733_v27 = vadd.f32 1.0, %v732_v42  ;;  %v8102_v37 = vsel %vm8029_vm14, %v10874_v28, %v405_v1  ;;  %vm1160_vm8 = vcmp.lt.s32.totalorder %v8080_v46, 0  ;;  %v1161_v56 = vsub.s32 0, %v8080_v46 }
 0x176   : > { %v410_v17 = vmul.f32 %v8102_v37, %v8102_v37  ;;  %v810_v39 = vadd.s32 %v804_v4, %v800_v33  ;;  %v820_v10 = vand.u32 65535, %v8075_v57  ;;  %v743_v43 = vxor.u32 2147483648, %v726_v41 }
 0x177   : > { %v734_v49 = vmul.f32 %v733_v27, %v8020_v50  ;;  %v803_v19 = vmul.u32 %v799_v13, %v10895_v14  ;;  %vm808_vm0 = vc.u32 %v800_v33, %v804_v4  ;;  %v1162_v9 = vsel %vm1160_vm8, %v1161_v56, %v8080_v46 }
 0x178   : > { %v411_v18 = vmul.f32 -0.001358992, %v410_v17  ;;  %v418_v38 = vmul.f32 -0.00019511016, %v410_v17  ;;  %v806_v42 = vshll.u32 %v8097_v54, 16  ;;  %v1163_v0 = vclz %v1162_v9  ;;  %v10898_v9 = vld [vmem:[#allocation6_spill] sm:$0xff] }
 0x179   : > { %v740_v29 = vxor.u32 2147483648, %v734_v49  ;;  %v744_v1 = vsel %vm742_vm13, %v743_v43, %v734_v49  ;;  %v821_v5 = vshrl.u32 %v8075_v57, 16  ;;  %v809_v50 = vsel %vm808_vm0, 1, %v10851_v61 }
 0x17a   : > { %v412_v40 = vadd.f32 0.041655596, %v411_v18  ;;  %v419_v11 = vadd.f32 0.008332121, %v418_v38  ;;  %vm8117_vm14 = vc.u32 %v810_v39, %v806_v42  ;;  %v3686_v27 = vsel %vm3684_vm11, %v743_v43, %v734_v49 }
 0x17b   : > { %v741_v4 = vsel %vm739_vm12, %v726_v41, %v740_v29  ;;  %v3683_v33 = vsel %vm3681_vm5, %v726_v41, %v740_v29  ;;  %v6367_v56 = vadd.s32 4294967294, %v1163_v0  ;;  %vm1059_vm13 = vcmp.lt.s32.totalorder %v10898_v9, 0 }
 0x17c   : > { %v745_v57 = vsel %vm738_vm4, %v741_v4, %v744_v1  ;;  %v3687_v39 = vsel %vm3680_vm9, %v3683_v33, %v3686_v27  ;;  %v413_v18 = vmul.f32 %v412_v40, %v410_v17  ;;  %v420_v38 = vmul.f32 %v419_v11, %v410_v17 }
 0x17d   : > { %v8134_v42 = vsel %vm735_vm15, nan, %v745_v57  ;;  %v3688_v41 = vsel %vm735_vm15, nan, %v3687_v39  ;;  %vm432_vm12 = vcmp.eq.s32.totalorder %v8069_v44, 2  ;;  %vm6368_vm5 = vcmp.lt.s32.totalorder %v6367_v56, 0 }
 0x17e   : > { %10899 = vst [vmem:[#allocation35_spill] sm:$0xff] %v8134_v42  ;;  %v8140_v49 = vmul.u32 %v821_v5, %v10887_v24  ;;  %6176 = vrot.lane.b32.xlu0 %v3688_v41, %s6595_s30  ;;  %v414_v63 = vadd.f32 -0.4999988, %v413_v18  ;;  %v421_v8 = vadd.f32 -0.16666654, %v420_v38  ;;  %v1166_v40 = vsel %vm6368_vm5, 0, %v6367_v56 }
 0x17f   : > { %v811_v11 = vadd.s32 %v809_v50, %v803_v19  ;;  %vm429_vm11 = vcmp.eq.s32.totalorder %v8069_v44, 0  ;;  %vm3373_vm4 = vcmp.eq.s32.totalorder %v8052_v7, 0  ;;  %vm3376_vm9 = vcmp.eq.s32.totalorder %v8052_v7, 2 }
 0x180   : > { %v1167_v20 = vsub.s32 32, %v1166_v40  ;;  %v1171_v43 = vsub.s32 4294967266, %v1166_v40  ;;  %v805_v29 = vshrl.u32 %v8050_v53, 16  ;;  %v813_v1 = vsel %vm8117_vm14, 1, %v10851_v61  ;;  %v10911_v53 = vld [vmem:[#allocation71_spill] sm:$0xff] }
 0x181   : > { %v415_v0 = vmul.f32 %v414_v63, %v410_v17  ;;  %v422_v4 = vmul.f32 %v421_v8, %v410_v17  ;;  %vm428_vm1 = vcmp.lt.s32.totalorder %v8069_v44, 2  ;;  %vm3372_vm15 = vcmp.lt.s32.totalorder %v8052_v7, 2 }
 0x182   : > { %v1168_v19 = vshll.u32 %v8080_v46, %v1166_v40  ;;  %v1181_v50 = vsub.s32 4, %v8054_v23  ;;  %vm425_vm6 = vweird.f32 %v10874_v28  ;;  %v10900_v33 = vand.u32 2147483647, %v10898_v9  ;;  %v10906_v28 = vld [vmem:[#allocation98_spill] sm:$0xff] }
 0x183   : > { %v1169_v13 = vshrl.u32 %v8057_v45, %v1167_v20  ;;  %v1172_v27 = vadd.s32 127, %v1171_v43  ;;  %v824_v17 = vmul.u32 %v820_v10, %v10895_v14  ;;  %v826_v56 = vshll.u32 %v8140_v49, 16 }
 0x184   : > { %vm8157_vm8 = vcmp.le.f32.partialorder %v10900_v33, 0.7853982  ;;  %v416_v57 = vadd.f32 1.0, %v415_v0  ;;  %v423_v39 = vadd.f32 1.0, %v422_v4  ;;  %v815_v46 = vadd.s32 %v813_v1, %v811_v11 }
 0x185   : > { %v822_v18 = vmul.u32 %v820_v10, %v10887_v24  ;;  %v1170_v38 = vor.u32 %v1169_v13, %v1168_v19  ;;  %v1173_v41 = vshll.u32 %v1172_v27, 23  ;;  %v807_v63 = vshrl.u32 %v8097_v54, 16 }
 0x186   : > { %v825_v8 = vmul.u32 %v821_v5, %v10895_v14  ;;  %v424_v40 = vmul.f32 %v423_v39, %v8102_v37  ;;  %v433_v33 = vxor.u32 2147483648, %v416_v57  ;;  %v1182_v43 = vsel %vm1059_vm13, %v1181_v50, %v8054_v23 }
 0x187   : > { %vm830_vm0 = vc.u32 %v822_v18, %v826_v56  ;;  %v832_v45 = vadd.s32 %v826_v56, %v822_v18  ;;  %v1174_v20 = vor.u32 4788187, %v1173_v41  ;;  %v828_v0 = vshll.u32 %v824_v17, 16 }
 0x188   : > { %v831_v11 = vsel %vm830_vm0, 1, %v10851_v61  ;;  %v430_v24 = vxor.u32 2147483648, %v424_v40  ;;  %v434_v10 = vsel %vm432_vm12, %v433_v33, %v424_v40  ;;  %v816_v54 = vadd.s32 %v815_v46, %v805_v29 }
 0x189   : > { %v833_v1 = vadd.s32 %v831_v11, %v825_v8  ;;  %v1175_v5 = vand.u32 2147483647, %v1174_v20  ;;  %v1177_v14 = vcvt.s32.f32 %v1170_v38  ;;  %v827_v37 = vshrl.u32 %v8140_v49, 16  ;;  %v10904_v38 = vld [vmem:[#allocation88_spill] sm:$0xff]  ;;  %v10905_v8 = vld [vmem:[#allocation102_spill] sm:$0xff] }
 0x18a   : > { %vm834_vm14 = vc.u32 %v832_v45, %v828_v0  ;;  %v3375_v4 = vsel %vm3373_vm4, %v416_v57, %v430_v24  ;;  %v3378_v23 = vsel %vm3376_vm9, %v433_v33, %v424_v40  ;;  %v431_v19 = vsel %vm429_vm11, %v416_v57, %v430_v24  ;;  %v10907_v33 = vld [vmem:[#allocation104_spill] sm:$0xff] }
 0x18b   : > { %v835_v50 = vsel %vm834_vm14, 1, %v10851_v61  ;;  %v3379_v29 = vsel %vm3372_vm15, %v3375_v4, %v3378_v23  ;;  %v435_v13 = vsel %vm428_vm1, %v431_v19, %v434_v10  ;;  %v1178_v27 = vmul.f32 %v1177_v14, %v1175_v5  ;;  %v10913_v23 = vld [vmem:[#allocation100_spill] sm:$0xff] }
 0x18c   : > { %v837_v49 = vadd.s32 %v835_v50, %v833_v1  ;;  %v3380_v56 = vsel %vm425_vm6, nan, %v3379_v29  ;;  %v8190_v39 = vsel %vm425_vm6, nan, %v435_v13  ;;  %v1184_v57 = vsel %vm8157_vm8, 0, %v1182_v43 }
 0x18d   : > { %10903 = vst [vmem:[#allocation31_spill] sm:$0xff] %v8190_v39  ;;  %v8194_v46 = vadd.s32 %v816_v54, %v807_v63  ;;  %6172 = vrot.lane.b32.xlu1 %v3380_v56, %s6595_s30  ;;  %v1179_v7 = vxor.u32 2147483648, %v1178_v27  ;;  %v829_v18 = vshrl.u32 %v824_v17, 16  ;;  %vm470_vm12 = vcmp.lt.s32.totalorder %v10904_v38, 2  ;;  %v10908_v63 = vld [vmem:[#allocation103_spill] sm:$0xff] }
 0x18e   : > { %v838_v44 = vadd.s32 %v837_v49, %v827_v37  ;;  %vm2773_vm5 = vcmp.gt.s32.totalorder %v7979_v58, 0  ;;  %v8199_v41 = vadd.s32 %v832_v45, %v828_v0  ;;  %v8205_v40 = vsel %vm470_vm12, %v10906_v28, %v10905_v8  ;;  %v10912_v37 = vld [vmem:[#allocation89_spill] sm:$0xff] }
 0x18f   : > { %v484_v20 = vsel %vm470_vm12, %v10908_v63, %v10907_v33  ;;  %v1180_v17 = vsel %vm1059_vm13, %v1179_v7, %v1178_v27  ;;  %v1201_v43 = vadd.s32 3, %v1184_v57  ;;  %v786_v45 = vsel %vm780_vm7, %v8085_v51, %v8093_v15 }
 0x190   : > { %v839_v0 = vadd.s32 %v838_v44, %v829_v18  ;;  %v8220_v11 = vsel %vm8157_vm8, %v10898_v9, %v1180_v17  ;;  %vm842_vm11 = vc.u32 %v8194_v46, %v8199_v41  ;;  %v488_v24 = vand.u32 65535, %v484_v20 }
 0x191   : > { %v489_v10 = vshrl.u32 %v484_v20, 16  ;;  %v10909_v54 = vand.u32 2147483647, %v7933_v31  ;;  %v1185_v5 = vmul.f32 %v8220_v11, %v8220_v11  ;;  %v511_v51 = vshrl.u32 %v8205_v40, 16 }
 0x192   : > { %v843_v2 = vadd.s32 1, %v839_v0  ;;  %v8232_v15 = vadd.s32 1, %v8023_v30  ;;  %v840_v14 = vmul.u32 %v10911_v53, %v786_v45  ;;  %v8239_v19 = vmul.u32 %v488_v24, %v10913_v23 }
 0x193   : > { %v8226_v1 = vand.u32 8388607, %v10909_v54  ;;  %v8236_v4 = vmul.u32 %v489_v10, %v10912_v37  ;;  %v8244_v50 = vsel %vm2773_vm5, %v7979_v58, 0  ;;  %v1186_v29 = vmul.f32 -0.001358992, %v1185_v5 }
 0x194   : > { %v1193_v13 = vmul.f32 -0.00019511016, %v1185_v5  ;;  %v844_v27 = vsel %vm842_vm11, %v843_v2, %v839_v0  ;;  %v8246_v49 = vand.u32 3, %v1201_v43  ;;  %v490_v56 = vmul.u32 %v488_v24, %v10912_v37 }
 0x195   : > { %10910 = vst [vmem:[#allocation33_spill] sm:$0xff] %v8226_v1  ;;  %v845_v30 = vadd.s32 %v844_v27, %v840_v14  ;;  %v494_v7 = vshll.u32 %v8236_v4, 16  ;;  %v1187_v18 = vadd.f32 0.041655596, %v1186_v29  ;;  %v510_v8 = vand.u32 65535, %v8205_v40 }
 0x196   : > { %v1194_v44 = vadd.f32 0.008332121, %v1193_v13  ;;  %v8252_v28 = vmul.u32 %v511_v51, %v10912_v37  ;;  %v496_v58 = vshll.u32 %v8239_v19, 16  ;;  %v4141_v43 = vand.u32 3, %v1184_v57 }
 0x197   : > { %v846_v33 = vadd.s32 536870912, %v845_v30  ;;  %vm498_vm7 = vc.u32 %v490_v56, %v494_v7  ;;  %v500_v63 = vadd.s32 %v494_v7, %v490_v56  ;;  %v1188_v20 = vmul.f32 %v1187_v18, %v1185_v5 }
 0x198   : > { %v1195_v17 = vmul.f32 %v1194_v44, %v1185_v5  ;;  %v499_v45 = vsel %vm498_vm7, 1, %v10851_v61  ;;  %v493_v24 = vmul.u32 %v489_v10, %v10913_v23  ;;  %v516_v40 = vshll.u32 %v8252_v28, 16  ;;  %v10915_v44 = vld [vmem:[#allocation86_spill] sm:$0xff] }
 0x199   : > { %v8256_v0 = vshrl.u32 %v846_v33, 30  ;;  %vm502_vm13 = vc.u32 %v500_v63, %v496_v58  ;;  %v8261_v54 = vand.u32 65535, %v8039_v21  ;;  %v1189_v2 = vadd.f32 -0.4999988, %v1188_v20  ;;  %v10916_v58 = vld [vmem:[#allocation96_spill] sm:$0xff] }
 0x19a   : > { %v1196_v53 = vadd.f32 -0.16666654, %v1195_v17  ;;  %v512_v14 = vmul.u32 %v510_v8, %v10912_v37  ;;  %vm1204_vm4 = vcmp.eq.s32.totalorder %v8246_v49, 0  ;;  %vm1207_vm9 = vcmp.eq.s32.totalorder %v8246_v49, 2 }
 0x19b   : > { %10914 = vst [vmem:[#allocation62_spill] sm:$0xff] %v8261_v54  ;;  %v848_v57 = vshll.u32 %v8256_v0, 30  ;;  %v501_v29 = vadd.s32 %v499_v45, %v493_v24  ;;  %v1190_v13 = vmul.f32 %v1189_v2, %v1185_v5  ;;  %vm1203_vm1 = vcmp.lt.s32.totalorder %v8246_v49, 2 }
 0x19c   : > { %v1197_v27 = vmul.f32 %v1196_v53, %v1185_v5  ;;  %vm4142_vm15 = vcmp.lt.s32.totalorder %v4141_v43, 2  ;;  %v503_v10 = vsel %vm502_vm13, 1, %v10851_v61  ;;  %vm520_vm6 = vc.u32 %v512_v14, %v516_v40  ;;  %v10918_v53 = vld [vmem:[#allocation93_spill] sm:$0xff] }
 0x19d   : > { %vm1200_vm8 = vweird.f32 %v10898_v9  ;;  %vm4143_vm0 = vcmp.eq.s32.totalorder %v4141_v43, 0  ;;  %vm4146_vm14 = vcmp.eq.s32.totalorder %v4141_v43, 2  ;;  %v849_v37 = vsub.s32 %v845_v30, %v848_v57 }
 0x19e   : > { %v514_v56 = vmul.u32 %v510_v8, %v10913_v23  ;;  %v1191_v7 = vadd.f32 1.0, %v1190_v13  ;;  %v1198_v18 = vadd.f32 1.0, %v1197_v27  ;;  %v453_v33 = vshrl.u32 %v10724_v6, %v10915_v44 }
 0x19f   : > { %vm10917_vm5 = vcmp.lt.s32.totalorder %v10904_v38, 4  ;;  %vm850_vm11 = vcmp.lt.s32.totalorder %v849_v37, 0  ;;  %v851_v63 = vsub.s32 0, %v849_v37  ;;  %v505_v20 = vadd.s32 %v503_v10, %v501_v29 }
 0x1a0   : > { %v474_v5 = vsel %vm10917_vm5, %v10916_v58, 2102212464  ;;  %v521_v17 = vsel %vm520_vm6, 1, %v10851_v61  ;;  %v1199_v45 = vmul.f32 %v1198_v18, %v8220_v11  ;;  %v1208_v24 = vxor.u32 2147483648, %v1191_v7  ;;  %v10920_v18 = vld [vmem:[#allocation94_spill] sm:$0xff] }
 0x1a1   : > { %v515_v30 = vmul.u32 %v511_v51, %v10913_v23  ;;  %v522_v8 = vadd.s32 %v516_v40, %v512_v14  ;;  %v852_v2 = vsel %vm850_vm11, %v851_v63, %v849_v37  ;;  %vm10919_vm7 = vcmp.lt.s32.totalorder %v10904_v38, 1 }
 0x1a2   : > { %v473_v57 = vsel %vm10919_vm7, %v453_v33, %v10918_v53  ;;  %v495_v13 = vshrl.u32 %v8236_v4, 16  ;;  %v518_v27 = vshll.u32 %v514_v56, 16  ;;  %v1205_v44 = vxor.u32 2147483648, %v1199_v45 }
 0x1a3   : > { %v1209_v29 = vsel %vm1207_vm9, %v1208_v24, %v1199_v45  ;;  %v853_v10 = vclz %v852_v2  ;;  %v523_v58 = vadd.s32 %v521_v17, %v515_v30  ;;  %v4148_v11 = vsel %vm4146_vm14, %v1208_v24, %v1199_v45 }
 0x1a4   : > { %vm10921_vm13 = vcmp.lt.s32.totalorder %v10904_v38, 3  ;;  %v497_v23 = vshrl.u32 %v8239_v19, 16  ;;  %v506_v40 = vadd.s32 %v505_v20, %v495_v13  ;;  %v1206_v14 = vsel %vm1204_vm4, %v1191_v7, %v1205_v44  ;;  %v10923_v20 = vld [vmem:[#allocation56_spill] sm:$0xff] }
 0x1a5   : > { %v475_v51 = vsel %vm10921_vm13, %v10920_v18, %v474_v5  ;;  %v4145_v4 = vsel %vm4143_vm0, %v1191_v7, %v1205_v44  ;;  %v6361_v33 = vadd.s32 4294967294, %v853_v10  ;;  %vm524_vm6 = vc.u32 %v522_v8, %v518_v27 }
 0x1a6   : > { %v1210_v63 = vsel %vm1203_vm1, %v1206_v14, %v1209_v29  ;;  %v4149_v17 = vsel %vm4142_vm15, %v4145_v4, %v4148_v11  ;;  %v517_v45 = vshrl.u32 %v8252_v28, 16  ;;  %v525_v24 = vsel %vm524_vm6, 1, %v10851_v61  ;;  %v10930_v4 = vld [vmem:[#allocation83_spill] sm:$0xff] }
 0x1a7   : > { %v8300_v19 = vsel %vm1200_vm8, nan, %v1210_v63  ;;  %v4150_v5 = vsel %vm1200_vm8, nan, %v4149_v17  ;;  %vm6362_vm4 = vcmp.lt.s32.totalorder %v6361_v33, 0  ;;  %v527_v7 = vadd.s32 %v525_v24, %v523_v58  ;;  %v10925_v58 = vld [vmem:[#allocation38_spill] sm:$0xff] }
 0x1a8   : > { %10922 = vst [vmem:[#allocation18_spill] sm:$0xff] %v8300_v19  ;;  %vm749_vm9 = vcmp.lt.s32.totalorder %v10923_v20, 0  ;;  %v8306_v49 = vshrl.u32 %v8039_v21, 16  ;;  %6182 = vrot.lane.b32.xlu0 %v4150_v5, %s6595_s30  ;;  %v841_v28 = vadd.s32 %v8199_v41, %v8194_v46  ;;  %v856_v43 = vsel %vm6362_vm4, 0, %v6361_v33 }
 0x1a9   : > { %v8311_v30 = vadd.s32 %v506_v40, %v497_v23  ;;  %v857_v2 = vsub.s32 32, %v856_v43  ;;  %v861_v53 = vsub.s32 4294967266, %v856_v43  ;;  %v519_v13 = vshrl.u32 %v514_v56, 16  ;;  %v10926_v56 = vld [vmem:[#allocation54_spill] sm:$0xff] }
 0x1aa   : > { %10924 = vst [vmem:[#allocation14_spill] sm:$0xff] %v8306_v49  ;;  %v528_v9 = vadd.s32 %v527_v7, %v517_v45  ;;  %v8314_v44 = vadd.s32 4294967169, %v8043_v60  ;;  %v476_v29 = vsel %vm470_vm12, %v473_v57, %v475_v51  ;;  %v8318_v10 = vadd.s32 %v522_v8, %v518_v27  ;;  %v10927_v60 = vld [vmem:[#allocation47_spill] sm:$0xff]  ;;  %v10929_v8 = vld [vmem:[#allocation50_spill] sm:$0xff] }
 0x1ab   : > { %vm1555_vm1 = vcmp.lt.s32.totalorder %v10925_v58, 2  ;;  %v858_v11 = vshll.u32 %v849_v37, %v856_v43  ;;  %v859_v18 = vshrl.u32 %v841_v28, %v857_v2  ;;  %v862_v46 = vadd.s32 127, %v861_v53  ;;  %v10928_v57 = vld [vmem:[#allocation55_spill] sm:$0xff]  ;;  %v10931_v2 = vld [vmem:[#allocation37_spill] sm:$0xff] }
 0x1ac   : > { %v529_v41 = vadd.s32 %v528_v9, %v519_v13  ;;  %v8322_v23 = vshrl.u32 %v8244_v50, 5  ;;  %vm532_vm15 = vc.u32 %v8311_v30, %v8318_v10  ;;  %v1565_v38 = vsel %vm1555_vm1, %v10927_v60, %v10926_v56  ;;  %v10932_v9 = vld [vmem:[#allocation40_spill] sm:$0xff] }
 0x1ad   : > { %v1569_v27 = vsel %vm1555_vm1, %v10929_v8, %v10928_v57  ;;  %v860_v37 = vor.u32 %v859_v18, %v858_v11  ;;  %v863_v51 = vshll.u32 %v862_v46, 23  ;;  %v871_v40 = vsub.s32 4, %v8256_v0 }
 0x1ae   : > { %v533_v14 = vadd.s32 1, %v529_v41  ;;  %v530_v33 = vmul.u32 %v10930_v4, %v476_v29  ;;  %v1573_v63 = vand.u32 65535, %v1569_v27  ;;  %v1574_v17 = vshrl.u32 %v1569_v27, 16 }
 0x1af   : > { %v1596_v45 = vshrl.u32 %v1565_v38, 16  ;;  %v8337_v24 = vand.u32 31, %v8244_v50  ;;  %v864_v5 = vor.u32 4788187, %v863_v51  ;;  %v1595_v28 = vand.u32 65535, %v1565_v38 }
 0x1b0   : > { %v534_v7 = vsel %vm532_vm15, %v533_v14, %v529_v41  ;;  %v1575_v53 = vmul.u32 %v1573_v63, %v10931_v2  ;;  %v1576_v13 = vmul.u32 %v1574_v17, %v10931_v2  ;;  %v8342_v11 = vmul.u32 %v1573_v63, %v10932_v9  ;;  %v10936_v63 = vld [vmem:[#allocation34_spill] sm:$0xff] }
 0x1b1   : > { %v535_v43 = vadd.s32 %v534_v7, %v530_v33  ;;  %v865_v18 = vand.u32 2147483647, %v864_v5  ;;  %v867_v46 = vcvt.s32.f32 %v860_v37  ;;  %v872_v29 = vsel %vm749_vm9, %v871_v40, %v8256_v0 }
 0x1b2   : > { %v8348_v50 = vmul.u32 %v1596_v45, %v10931_v2  ;;  %v1578_v41 = vmul.u32 %v1574_v17, %v10932_v9  ;;  %v1579_v60 = vshll.u32 %v1576_v13, 16  ;;  %v1581_v38 = vshll.u32 %v8342_v11, 16 }
 0x1b3   : > { %v536_v56 = vadd.s32 536870912, %v535_v43  ;;  %vm2618_vm12 = vcmp.gt.s32.totalorder %v8232_v15, 0  ;;  %v10933_v8 = vand.u32 2147483647, %v10923_v20  ;;  %v868_v0 = vmul.f32 %v867_v46, %v865_v18  ;;  %v10937_v18 = vld [vmem:[#allocation46_spill] sm:$0xff] }
 0x1b4   : > { %v1597_v37 = vmul.u32 %v1595_v28, %v10931_v2  ;;  %vm1583_vm0 = vc.u32 %v1575_v53, %v1579_v60  ;;  %v1585_v40 = vadd.s32 %v1579_v60, %v1575_v53  ;;  %v1601_v14 = vshll.u32 %v8348_v50, 16 }
 0x1b5   : > { %vm8356_vm8 = vcmp.le.f32.partialorder %v10933_v8, 0.7853982  ;;  %v8361_v51 = vshrl.u32 %v536_v56, 30  ;;  %v869_v4 = vxor.u32 2147483648, %v868_v0  ;;  %v1538_v17 = vshrl.u32 %v10724_v6, %v10936_v63 }
 0x1b6   : > { %v874_v33 = vsel %vm8356_vm8, 0, %v872_v29  ;;  %v1584_v5 = vsel %vm1583_vm0, 1, %v10851_v61  ;;  %vm10938_vm14 = vcmp.lt.s32.totalorder %v10925_v58, 4  ;;  %vm1587_vm5 = vc.u32 %v1585_v40, %v1581_v38  ;;  %v10939_v38 = vld [vmem:[#allocation42_spill] sm:$0xff] }
 0x1b7   : > { %v538_v7 = vshll.u32 %v8361_v51, 30  ;;  %v1559_v2 = vsel %vm10938_vm14, %v10937_v18, 2102212464  ;;  %v1586_v46 = vadd.s32 %v1584_v5, %v1578_v41  ;;  %v870_v53 = vsel %vm749_vm9, %v869_v4, %v868_v0 }
 0x1b8   : > { %v1588_v56 = vsel %vm1587_vm5, 1, %v10851_v61  ;;  %v8377_v29 = vmul.u32 %v1595_v28, %v10932_v9  ;;  %vm1605_vm11 = vc.u32 %v1597_v37, %v1601_v14  ;;  %v8382_v60 = vsel %vm8356_vm8, %v10923_v20, %v870_v53  ;;  %v10941_v28 = vld [vmem:[#allocation45_spill] sm:$0xff] }
 0x1b9   : > { %v891_v8 = vadd.s32 3, %v874_v33  ;;  %v8384_v63 = vand.u32 3, %v874_v33  ;;  %v8386_v18 = vsub.s32 %v535_v43, %v538_v7  ;;  %v875_v41 = vmul.f32 %v8382_v60, %v8382_v60 }
 0x1ba   : > { %vm10940_vm7 = vcmp.lt.s32.totalorder %v10925_v58, 1  ;;  %vm10942_vm13 = vcmp.lt.s32.totalorder %v10925_v58, 3  ;;  %v1600_v27 = vmul.u32 %v1596_v45, %v10932_v9  ;;  %v1590_v33 = vadd.s32 %v1588_v56, %v1586_v46 }
 0x1bb   : > { %v1558_v0 = vsel %vm10940_vm7, %v1538_v17, %v10939_v38  ;;  %v1560_v40 = vsel %vm10942_vm13, %v10941_v28, %v1559_v2  ;;  %vm540_vm6 = vcmp.lt.s32.totalorder %v8386_v18, 0  ;;  %v541_v4 = vsub.s32 0, %v8386_v18 }
 0x1bc   : > { %v1606_v43 = vsel %vm1605_vm11, 1, %v10851_v61  ;;  %v876_v5 = vmul.f32 -0.001358992, %v875_v41  ;;  %v883_v7 = vmul.f32 -0.00019511016, %v875_v41  ;;  %v1603_v53 = vshll.u32 %v8377_v29, 16 }
 0x1bd   : > { %v1607_v57 = vadd.s32 %v1601_v14, %v1597_v37  ;;  %v8401_v19 = vand.u32 3, %v891_v8  ;;  %v542_v17 = vsel %vm540_vm6, %v541_v4, %v8386_v18  ;;  %v8406_v2 = vsel %vm1555_vm1, %v1558_v0, %v1560_v40  ;;  %v10944_v4 = vld [vmem:[#allocation28_spill] sm:$0xff] }
 0x1be   : > { %v1580_v45 = vshrl.u32 %v1576_v13, 16  ;;  %v877_v9 = vadd.f32 0.041655596, %v876_v5  ;;  %v884_v38 = vadd.f32 0.008332121, %v883_v7  ;;  %v543_v28 = vclz %v542_v17 }
 0x1bf   : > { %v1608_v46 = vadd.s32 %v1606_v43, %v1600_v27  ;;  %v8409_v56 = vsub.s32 32, %v8337_v24  ;;  %v8414_v37 = vsel %vm2618_vm12, %v8232_v15, 0  ;;  %v8417_v14 = vadd.s32 1, %v8314_v44 }
 0x1c0   : > { %v1591_v8 = vadd.s32 %v1590_v33, %v1580_v45  ;;  %v878_v58 = vmul.f32 %v877_v9, %v875_v41  ;;  %v885_v0 = vmul.f32 %v884_v38, %v875_v41  ;;  %v6355_v40 = vadd.s32 4294967294, %v543_v28  ;;  %v10945_v9 = vld [vmem:[#allocation10_spill] sm:$0xff] }
 0x1c1   : > { %10943 = vst [vmem:[#allocation23_spill] sm:$0xff] %v8409_v56  ;;  %vm1609_vm4 = vc.u32 %v1607_v57, %v1603_v53  ;;  %vm897_vm9 = vcmp.eq.s32.totalorder %v8401_v19, 2  ;;  %vm3838_vm1 = vcmp.eq.s32.totalorder %v8384_v63, 2  ;;  %v531_v13 = vadd.s32 %v8318_v10, %v8311_v30 }
 0x1c2   : > { %v1582_v27 = vshrl.u32 %v8342_v11, 16  ;;  %v1610_v15 = vsel %vm1609_vm4, 1, %v10851_v61  ;;  %v1615_v44 = vmul.u32 %v10944_v4, %v8406_v2  ;;  %v879_v43 = vadd.f32 -0.4999988, %v878_v58  ;;  %v10946_v58 = vld [vmem:[#allocation59_spill] sm:$0xff] }
 0x1c3   : > { %v886_v33 = vadd.f32 -0.16666654, %v885_v0  ;;  %vm6356_vm15 = vcmp.lt.s32.totalorder %v6355_v40, 0  ;;  %v1612_v5 = vadd.s32 %v1610_v15, %v1608_v46  ;;  %vm894_vm12 = vcmp.eq.s32.totalorder %v8401_v19, 0  ;;  %v10947_v4 = vld [vmem:[#allocation27_spill] sm:$0xff] }
 0x1c4   : > { %vm3835_vm8 = vcmp.eq.s32.totalorder %v8384_v63, 0  ;;  %v546_v7 = vsel %vm6356_vm15, 0, %v6355_v40  ;;  %v561_v17 = vsub.s32 4, %v8361_v51  ;;  %v8430_v45 = vadd.s32 %v1591_v8, %v1582_v27 }
 0x1c5   : > { %v1602_v30 = vshrl.u32 %v8348_v50, 16  ;;  %v880_v10 = vmul.f32 %v879_v43, %v875_v41  ;;  %v887_v11 = vmul.f32 %v886_v33, %v875_v41  ;;  %vm893_vm0 = vcmp.lt.s32.totalorder %v8401_v19, 2  ;;  %v10948_v43 = vld [vmem:[#allocation19_spill] sm:$0xff] }
 0x1c6   : > { %vm3834_vm14 = vcmp.lt.s32.totalorder %v8384_v63, 2  ;;  %v547_v2 = vsub.s32 32, %v546_v7  ;;  %vm935_vm5 = vcmp.lt.s32.totalorder %v10945_v9, 2  ;;  %vm890_vm11 = vweird.f32 %v10923_v20 }
 0x1c7   : > { %v551_v38 = vsub.s32 4294967266, %v546_v7  ;;  %v1604_v28 = vshrl.u32 %v8377_v29, 16  ;;  %v8438_v46 = vadd.s32 %v1607_v57, %v1603_v53  ;;  %v1613_v8 = vadd.s32 %v1612_v5, %v1602_v30  ;;  %v10949_v5 = vld [vmem:[#allocation29_spill] sm:$0xff]  ;;  %v10950_v30 = vld [vmem:[#allocation22_spill] sm:$0xff] }
 0x1c8   : > { %vm439_vm7 = vcmp.lt.s32.totalorder %v10946_v58, 0  ;;  %v881_v50 = vadd.f32 1.0, %v880_v10  ;;  %v888_v0 = vadd.f32 1.0, %v887_v11  ;;  %v548_v41 = vshll.u32 %v8386_v18, %v546_v7 }
 0x1c9   : > { %v549_v40 = vshrl.u32 %v531_v13, %v547_v2  ;;  %v552_v27 = vadd.s32 127, %v551_v38  ;;  %v1614_v15 = vadd.s32 %v1613_v8, %v1604_v28  ;;  %vm1617_vm13 = vc.u32 %v8430_v45, %v8438_v46 }
 0x1ca   : > { %v8448_v29 = vsel %vm935_vm5, %v10948_v43, %v10947_v4  ;;  %v889_v57 = vmul.f32 %v888_v0, %v8382_v60  ;;  %v898_v53 = vxor.u32 2147483648, %v881_v50  ;;  %v949_v18 = vsel %vm935_vm5, %v10950_v30, %v10949_v5  ;;  %v10952_v30 = vld [vmem:[#allocation16_spill] sm:$0xff] }
 0x1cb   : > { %v550_v33 = vor.u32 %v549_v40, %v548_v41  ;;  %v553_v13 = vshll.u32 %v552_v27, 23  ;;  %v1618_v7 = vadd.s32 1, %v1614_v15  ;;  %v953_v10 = vand.u32 65535, %v949_v18  ;;  %v10951_v41 = vld [vmem:[#allocation15_spill] sm:$0xff] }
 0x1cc   : > { %v954_v11 = vshrl.u32 %v949_v18, 16  ;;  %v895_v2 = vxor.u32 2147483648, %v889_v57  ;;  %v899_v38 = vsel %vm897_vm9, %v898_v53, %v889_v57  ;;  %v3840_v28 = vsel %vm3838_vm1, %v898_v53, %v889_v57 }
 0x1cd   : > { %v557_v8 = vcvt.s32.f32 %v550_v33  ;;  %v554_v60 = vor.u32 4788187, %v553_v13  ;;  %v1619_v0 = vsel %vm1617_vm13, %v1618_v7, %v1614_v15  ;;  %v955_v40 = vmul.u32 %v953_v10, %v10951_v41 }
 0x1ce   : > { %v956_v4 = vmul.u32 %v954_v11, %v10951_v41  ;;  %v896_v27 = vsel %vm894_vm12, %v881_v50, %v895_v2  ;;  %v3837_v43 = vsel %vm3835_vm8, %v881_v50, %v895_v2  ;;  %v1620_v5 = vadd.s32 %v1619_v0, %v1615_v44 }
 0x1cf   : > { %v8466_v18 = vmul.u32 %v953_v10, %v10952_v30  ;;  %v900_v57 = vsel %vm893_vm0, %v896_v27, %v899_v38  ;;  %v3841_v15 = vsel %vm3834_vm14, %v3837_v43, %v3840_v28  ;;  %v555_v53 = vand.u32 2147483647, %v554_v60 }
 0x1d0   : > { %v958_v33 = vmul.u32 %v954_v11, %v10952_v30  ;;  %v8475_v13 = vsel %vm890_vm11, nan, %v900_v57  ;;  %v3842_v50 = vsel %vm890_vm11, nan, %v3841_v15  ;;  %v1621_v44 = vadd.s32 536870912, %v1620_v5  ;;  %v10955_v57 = vld [vmem:[#allocation8_spill] sm:$0xff] }
 0x1d1   : > { %10953 = vst [vmem:[#allocation26_spill] sm:$0xff] %v8475_v13  ;;  %v959_v7 = vshll.u32 %v956_v4, 16  ;;  %v8481_v10 = vshll.u32 %v10724_v6, %v8337_v24  ;;  %6178 = vrot.lane.b32.xlu1 %v3842_v50, %s6595_s30  ;;  %v558_v19 = vmul.f32 %v557_v8, %v555_v53  ;;  %v562_v63 = vsel %vm439_vm7, %v561_v17, %v8361_v51 }
 0x1d2   : > { %v961_v11 = vshll.u32 %v8466_v18, 16  ;;  %v8490_v2 = vshll.u32 %v10706_v59, %v8337_v24  ;;  %v8492_v20 = vshrl.u32 %v1621_v44, 30  ;;  %v10954_v28 = vand.u32 2147483647, %v10946_v58 }
 0x1d3   : > { %vm963_vm6 = vc.u32 %v955_v40, %v959_v7  ;;  %v965_v38 = vadd.s32 %v959_v7, %v955_v40  ;;  %v559_v60 = vxor.u32 2147483648, %v558_v19  ;;  %v976_v0 = vshrl.u32 %v8448_v29, 16  ;;  %v10956_v40 = vld [vmem:[#allocation17_spill] sm:$0xff] }
 0x1d4   : > { %vm438_vm4 = vcmp.le.f32.partialorder %v10954_v28, 0.7853982  ;;  %v964_v8 = vsel %vm963_vm6, 1, %v10851_v61  ;;  %v1623_v51 = vshll.u32 %v8492_v20, 30  ;;  %v918_v15 = vshrl.u32 %v10724_v6, %v10955_v57 }
 0x1d5   : > { %v564_v27 = vsel %vm438_vm4, 0, %v562_v63  ;;  %v966_v17 = vadd.s32 %v964_v8, %v958_v33  ;;  %vm967_vm9 = vc.u32 %v965_v38, %v961_v11  ;;  %v560_v43 = vsel %vm439_vm7, %v559_v60, %v558_v19 }
 0x1d6   : > { %vm10957_vm1 = vcmp.lt.s32.totalorder %v10945_v9, 4  ;;  %v968_v50 = vsel %vm967_vm9, 1, %v10851_v61  ;;  %v8508_v44 = vsel %vm438_vm4, %v10946_v58, %v560_v43  ;;  %v8510_v7 = vsub.s32 %v1620_v5, %v1623_v51  ;;  %v10958_v43 = vld [vmem:[#allocation12_spill] sm:$0xff] }
 0x1d7   : > { %v939_v53 = vsel %vm10957_vm1, %v10956_v40, 2102212464  ;;  %v975_v33 = vand.u32 65535, %v8448_v29  ;;  %v8514_v63 = vmul.u32 %v976_v0, %v10951_v41  ;;  %v8518_v19 = vshll.u32 %v10707_v22, %v8337_v24  ;;  %v10960_v40 = vld [vmem:[#allocation13_spill] sm:$0xff] }
 0x1d8   : > { %v565_v11 = vmul.f32 %v8508_v44, %v8508_v44  ;;  %v581_v38 = vadd.s32 3, %v564_v27  ;;  %v8522_v28 = vand.u32 3, %v564_v27  ;;  %vm1625_vm15 = vcmp.lt.s32.totalorder %v8510_v7, 0 }
 0x1d9   : > { %v1626_v5 = vsub.s32 0, %v8510_v7  ;;  %v960_v60 = vshrl.u32 %v956_v4, 16  ;;  %v970_v8 = vadd.s32 %v968_v50, %v966_v17  ;;  %vm10959_vm12 = vcmp.lt.s32.totalorder %v10945_v9, 1 }
 0x1da   : > { %v566_v29 = vmul.f32 -0.001358992, %v565_v11  ;;  %v573_v51 = vmul.f32 -0.00019511016, %v565_v11  ;;  %v938_v57 = vsel %vm10959_vm12, %v918_v15, %v10958_v43  ;;  %vm10961_vm8 = vcmp.lt.s32.totalorder %v10945_v9, 3 }
 0x1db   : > { %v940_v13 = vsel %vm10961_vm8, %v10960_v40, %v939_v53  ;;  %v1627_v31 = vsel %vm1625_vm15, %v1626_v5, %v8510_v7  ;;  %v977_v27 = vmul.u32 %v975_v33, %v10951_v41  ;;  %v8535_v42 = vmul.u32 %v975_v33, %v10952_v30  ;;  %v10962_v40 = vld [vmem:[#allocation7_spill] sm:$0xff] }
 0x1dc   : > { %v981_v4 = vshll.u32 %v8514_v63, 16  ;;  %v567_v17 = vadd.f32 0.041655596, %v566_v29  ;;  %v574_v50 = vadd.f32 0.008332121, %v573_v51  ;;  %v8538_v39 = vand.u32 3, %v581_v38 }
 0x1dd   : > { %v1628_v21 = vclz %v1627_v31  ;;  %v1616_v15 = vadd.s32 %v8438_v46, %v8430_v45  ;;  %v962_v43 = vshrl.u32 %v8466_v18, 16  ;;  %v971_v53 = vadd.s32 %v970_v8, %v960_v60 }
 0x1de   : > { %v980_v5 = vmul.u32 %v976_v0, %v10952_v30  ;;  %vm1524_vm0 = vcmp.lt.s32.totalorder %v10962_v40, 0  ;;  %v568_v41 = vmul.f32 %v567_v17, %v565_v11  ;;  %v575_v33 = vmul.f32 %v574_v50, %v565_v11 }
 0x1df   : > { %v6376_v49 = vadd.s32 4294967294, %v1628_v21  ;;  %v8547_v29 = vsel %vm935_vm5, %v938_v57, %v940_v13  ;;  %v1646_v38 = vsub.s32 4, %v8492_v20  ;;  %v983_v31 = vshll.u32 %v8535_v42, 16 }
 0x1e0   : > { %vm985_vm14 = vc.u32 %v977_v27, %v981_v4  ;;  %v987_v45 = vadd.s32 %v981_v4, %v977_v27  ;;  %v569_v46 = vadd.f32 -0.4999988, %v568_v41  ;;  %v576_v18 = vadd.f32 -0.16666654, %v575_v33 }
 0x1e1   : > { %vm3530_vm11 = vcmp.eq.s32.totalorder %v8522_v28, 2  ;;  %vm6377_vm7 = vcmp.lt.s32.totalorder %v6376_v49, 0  ;;  %v986_v30 = vsel %vm985_vm14, 1, %v10851_v61  ;;  %vm3527_vm13 = vcmp.eq.s32.totalorder %v8522_v28, 0 }
 0x1e2   : > { %v1631_v21 = vsel %vm6377_vm7, 0, %v6376_v49  ;;  %v8554_v0 = vadd.s32 %v971_v53, %v962_v43  ;;  %v988_v9 = vadd.s32 %v986_v30, %v980_v5  ;;  %vm989_vm5 = vc.u32 %v987_v45, %v983_v31 }
 0x1e3   : > { %v570_v13 = vmul.f32 %v569_v46, %v565_v11  ;;  %v577_v60 = vmul.f32 %v576_v18, %v565_v11  ;;  %vm3526_vm6 = vcmp.lt.s32.totalorder %v8522_v28, 2  ;;  %v1632_v8 = vsub.s32 32, %v1631_v21 }
 0x1e4   : > { %v982_v51 = vshrl.u32 %v8514_v63, 16  ;;  %vm580_vm4 = vweird.f32 %v10946_v58  ;;  %v1633_v57 = vshll.u32 %v8510_v7, %v1631_v21  ;;  %v1636_v27 = vsub.s32 4294967266, %v1631_v21 }
 0x1e5   : > { %v990_v4 = vsel %vm989_vm5, 1, %v10851_v61  ;;  %v8561_v17 = vadd.s32 %v987_v45, %v983_v31  ;;  %v571_v49 = vadd.f32 1.0, %v570_v13  ;;  %v578_v50 = vadd.f32 1.0, %v577_v60  ;;  %v10963_v45 = vld [vmem:[#allocation11_spill] sm:$0xff] }
 0x1e6   : > { %v1634_v43 = vshrl.u32 %v1616_v15, %v1632_v8  ;;  %v992_v53 = vadd.s32 %v990_v4, %v988_v9  ;;  %vm583_vm9 = vcmp.lt.s32.totalorder %v8538_v39, 2  ;;  %vm584_vm1 = vcmp.eq.s32.totalorder %v8538_v39, 0 }
 0x1e7   : > { %v1637_v11 = vadd.s32 127, %v1636_v27  ;;  %v984_v63 = vshrl.u32 %v8535_v42, 16  ;;  %v579_v5 = vmul.f32 %v578_v50, %v8508_v44  ;;  %v588_v41 = vxor.u32 2147483648, %v571_v49 }
 0x1e8   : > { %v1635_v7 = vor.u32 %v1634_v43, %v1633_v57  ;;  %v993_v33 = vadd.s32 %v992_v53, %v982_v51  ;;  %vm587_vm15 = vcmp.eq.s32.totalorder %v8538_v39, 2  ;;  %v1647_v15 = vsel %vm1524_vm0, %v1646_v38, %v8492_v20  ;;  %v10964_v38 = vld [vmem:[#allocation138_spill] sm:$0xff] }
 0x1e9   : > { %v1638_v31 = vshll.u32 %v1637_v11, 23  ;;  %v995_v46 = vmul.u32 %v10963_v45, %v8547_v29  ;;  %v585_v18 = vxor.u32 2147483648, %v579_v5  ;;  %v589_v30 = vsel %vm587_vm15, %v588_v41, %v579_v5  ;;  %v10969_v11 = vld [vmem:[#allocation135_spill] sm:$0xff] }
 0x1ea   : > { %vm997_vm12 = vc.u32 %v8554_v0, %v8561_v17  ;;  %vm1245_vm8 = vcmp.lt.s32.totalorder %v7471_v36, 2  ;;  %v3532_v42 = vsel %vm3530_vm11, %v588_v41, %v579_v5  ;;  %v1642_v21 = vcvt.s32.f32 %v1635_v7  ;;  %v10970_v5 = vld [vmem:[#allocation136_spill] sm:$0xff] }
 0x1eb   : > { %v1639_v44 = vor.u32 4788187, %v1638_v31  ;;  %v994_v9 = vadd.s32 %v993_v33, %v984_v63  ;;  %v3529_v13 = vsel %vm3527_vm13, %v571_v49, %v585_v18  ;;  %v586_v20 = vsel %vm584_vm1, %v571_v49, %v585_v18 }
 0x1ec   : > { %v8586_v29 = vsel %vm1245_vm8, %v7519_v12, %v7554_v32  ;;  %v1259_v60 = vsel %vm1245_vm8, %v10964_v38, %v7575_v26  ;;  %v3533_v8 = vsel %vm3526_vm6, %v3529_v13, %v3532_v42  ;;  %v590_v51 = vsel %vm583_vm9, %v586_v20, %v589_v30 }
 0x1ed   : > { %v1640_v57 = vand.u32 2147483647, %v1639_v44  ;;  %v998_v27 = vadd.s32 1, %v994_v9  ;;  %v3534_v4 = vsel %vm580_vm4, nan, %v3533_v8  ;;  %v8600_v32 = vsel %vm580_vm4, nan, %v590_v51 }
 0x1ee   : > { %10965 = vst [vmem:[#allocation24_spill] sm:$0xff] %v8600_v32  ;;  %v1263_v12 = vand.u32 65535, %v1259_v60  ;;  %v1264_v49 = vshrl.u32 %v1259_v60, 16  ;;  %6174 = vrot.lane.b32.xlu2 %v3534_v4, %s6595_s30  ;;  %v10966_v26 = vand.u32 2147483647, %v10962_v40  ;;  %v1286_v43 = vshrl.u32 %v8586_v29, 16 }
 0x1ef   : > { %v1643_v39 = vmul.f32 %v1642_v21, %v1640_v57  ;;  %v999_v50 = vsel %vm997_vm12, %v998_v27, %v994_v9  ;;  %v8623_v7 = vshrl.u32 %v10706_v59, %v8409_v56  ;;  %v8627_v33 = vshll.u32 %v10708_v35, %v8337_v24 }
 0x1f0   : > { %vm8605_vm14 = vcmp.le.f32.partialorder %v10966_v26, 0.7853982  ;;  %v1000_v53 = vadd.s32 %v999_v50, %v995_v46  ;;  %v8616_v63 = vmul.u32 %v1264_v49, %v10969_v11  ;;  %v8619_v41 = vmul.u32 %v1263_v12, %v10970_v5  ;;  %v10971_v50 = vld [vmem:[#allocation134_spill] sm:$0xff] }
 0x1f1   : > { %v1649_v58 = vsel %vm8605_vm14, 0, %v1647_v15  ;;  %v8631_v31 = vshll.u32 %v10709_v34, %v8337_v24  ;;  %v1644_v15 = vxor.u32 2147483648, %v1643_v39  ;;  %v1265_v46 = vmul.u32 %v1263_v12, %v10969_v11 }
 0x1f2   : > { %v1001_v45 = vadd.s32 536870912, %v1000_v53  ;;  %v1269_v18 = vshll.u32 %v8616_v63, 16  ;;  %v8636_v30 = vmul.u32 %v1286_v43, %v10969_v11  ;;  %v1666_v44 = vadd.s32 3, %v1649_v58 }
 0x1f3   : > { %v1645_v42 = vsel %vm1524_vm0, %v1644_v15, %v1643_v39  ;;  %v1271_v21 = vshll.u32 %v8619_v41, 16  ;;  %v1285_v9 = vand.u32 65535, %v8586_v29  ;;  %v8651_v38 = vshrl.u32 %v10707_v22, %v8409_v56 }
 0x1f4   : > { %v8645_v24 = vsel %vm8605_vm14, %v10962_v40, %v1645_v42  ;;  %v8647_v13 = vshrl.u32 %v1001_v45, 30  ;;  %vm1273_vm11 = vc.u32 %v1265_v46, %v1269_v18  ;;  %v1275_v20 = vadd.s32 %v1269_v18, %v1265_v46  ;;  %v10973_v42 = vld [vmem:[#allocation122_spill] sm:$0xff] }
 0x1f5   : > { %v8655_v60 = vshrl.u32 %v10708_v35, %v8409_v56  ;;  %v1650_v29 = vmul.f32 %v8645_v24, %v8645_v24  ;;  %v1274_v8 = vsel %vm1273_vm11, 1, %v10851_v61  ;;  %v1268_v57 = vmul.u32 %v1264_v49, %v10970_v5 }
 0x1f6   : > { %v1003_v51 = vshll.u32 %v8647_v13, 30  ;;  %vm1277_vm0 = vc.u32 %v1275_v20, %v1271_v21  ;;  %v1291_v27 = vshll.u32 %v8636_v30, 16  ;;  %v8663_v26 = vand.u32 3, %v1666_v44 }
 0x1f7   : > { %v1651_v4 = vmul.f32 -0.001358992, %v1650_v29  ;;  %v1658_v12 = vmul.f32 -0.00019511016, %v1650_v29  ;;  %v8665_v28 = vand.u32 3, %v1649_v58  ;;  %vm10972_vm7 = vcmp.lt.s32.totalorder %v7471_v36, 4 }
 0x1f8   : > { %v8667_v39 = vsub.s32 %v1000_v53, %v1003_v51  ;;  %v1249_v15 = vsel %vm10972_vm7, %v10971_v50, 2102212464  ;;  %v1276_v45 = vadd.s32 %v1274_v8, %v1268_v57  ;;  %v1287_v46 = vmul.u32 %v1285_v9, %v10969_v11  ;;  %v10976_v50 = vld [vmem:[#allocation132_spill] sm:$0xff] }
 0x1f9   : > { %v1652_v18 = vadd.f32 0.041655596, %v1651_v4  ;;  %v1659_v49 = vadd.f32 0.008332121, %v1658_v12  ;;  %v1228_v21 = vshrl.u32 %v10724_v6, %v10973_v42  ;;  %v1278_v20 = vsel %vm1277_vm0, 1, %v10851_v61  ;;  %v10974_v4 = vld [vmem:[#allocation131_spill] sm:$0xff] }
 0x1fa   : > { %vm1005_vm13 = vcmp.lt.s32.totalorder %v8667_v39, 0  ;;  %v1006_v58 = vsub.s32 0, %v8667_v39  ;;  %v8679_v53 = vmul.u32 %v1285_v9, %v10970_v5  ;;  %vm1295_vm5 = vc.u32 %v1287_v46, %v1291_v27 }
 0x1fb   : > { %v8683_v44 = vshrl.u32 %v10709_v34, %v8409_v56  ;;  %v8687_v11 = vshrl.u32 %v10714_v16, %v8409_v56  ;;  %v1653_v8 = vmul.f32 %v1652_v18, %v1650_v29  ;;  %v1660_v51 = vmul.f32 %v1659_v49, %v1650_v29 }
 0x1fc   : > { %v1007_v57 = vsel %vm1005_vm13, %v1006_v58, %v8667_v39  ;;  %vm10975_vm6 = vcmp.lt.s32.totalorder %v7471_v36, 1  ;;  %vm10977_vm4 = vcmp.lt.s32.totalorder %v7471_v36, 3  ;;  %v1280_v42 = vadd.s32 %v1278_v20, %v1276_v45 }
 0x1fd   : > { %v1248_v12 = vsel %vm10975_vm6, %v1228_v21, %v10974_v4  ;;  %v1250_v9 = vsel %vm10977_vm4, %v10976_v50, %v1249_v15  ;;  %v1654_v32 = vadd.f32 -0.4999988, %v1653_v8  ;;  %v1661_v54 = vadd.f32 -0.16666654, %v1660_v51 }
 0x1fe   : > { %vm4608_vm9 = vcmp.eq.s32.totalorder %v8665_v28, 2  ;;  %v1008_v1 = vclz %v1007_v57  ;;  %v1296_v56 = vsel %vm1295_vm5, 1, %v10851_v61  ;;  %vm1669_vm1 = vcmp.eq.s32.totalorder %v8663_v26, 0 }
 0x1ff   : > { %vm1672_vm15 = vcmp.eq.s32.totalorder %v8663_v26, 2  ;;  %vm4605_vm12 = vcmp.eq.s32.totalorder %v8665_v28, 0  ;;  %v1270_v18 = vshrl.u32 %v8616_v63, 16  ;;  %v1290_v49 = vmul.u32 %v1286_v43, %v10970_v5  ;;  %v10978_v5 = vld [vmem:[#allocation5_spill] sm:$0xff] }
 0x200   : > { %v1293_v15 = vshll.u32 %v8679_v53, 16  ;;  %v1655_v45 = vmul.f32 %v1654_v32, %v1650_v29  ;;  %v1662_v21 = vmul.f32 %v1661_v54, %v1650_v29  ;;  %vm1668_vm14 = vcmp.lt.s32.totalorder %v8663_v26, 2 }
 0x201   : > { %vm4604_vm11 = vcmp.lt.s32.totalorder %v8665_v28, 2  ;;  %v6364_v20 = vadd.s32 4294967294, %v1008_v1  ;;  %v1297_v58 = vadd.s32 %v1291_v27, %v1287_v46  ;;  %vm1665_vm0 = vweird.f32 %v10962_v40  ;;  %v10983_v40 = vld [vmem:[#allocation128_spill] sm:$0xff] }
 0x202   : > { %v996_v8 = vadd.s32 %v8561_v17, %v8554_v0  ;;  %v1251_v63 = vsel %vm1245_vm8, %v1248_v12, %v1250_v9  ;;  %v1281_v51 = vadd.s32 %v1280_v42, %v1270_v18  ;;  %v1298_v43 = vadd.s32 %v1296_v56, %v1290_v49 }
 0x203   : > { %vm904_vm7 = vcmp.lt.s32.totalorder %v10978_v5, 0  ;;  %v1656_v32 = vadd.f32 1.0, %v1655_v45  ;;  %v1663_v54 = vadd.f32 1.0, %v1662_v21  ;;  %vm6365_vm13 = vcmp.lt.s32.totalorder %v6364_v20, 0 }
 0x204   : > { %vm1299_vm5 = vc.u32 %v1297_v58, %v1293_v15  ;;  %v1011_v29 = vsel %vm6365_vm13, 0, %v6364_v20  ;;  %v1272_v1 = vshrl.u32 %v8619_v41, 16  ;;  %v1292_v27 = vshrl.u32 %v8636_v30, 16 }
 0x205   : > { %v1300_v46 = vsel %vm1299_vm5, 1, %v10851_v61  ;;  %v1664_v0 = vmul.f32 %v1663_v54, %v8645_v24  ;;  %v1673_v17 = vxor.u32 2147483648, %v1656_v32  ;;  %v1012_v36 = vsub.s32 32, %v1011_v29 }
 0x206   : > { %v1026_v57 = vsub.s32 4, %v8647_v13  ;;  %v1016_v56 = vsub.s32 4294967266, %v1011_v29  ;;  %v8717_v4 = vadd.s32 %v1281_v51, %v1272_v1  ;;  %v1294_v12 = vshrl.u32 %v8679_v53, 16  ;;  %v10979_v51 = vld [vmem:[#allocation48_spill] sm:$0xff] }
 0x207   : > { %v1302_v50 = vadd.s32 %v1300_v46, %v1298_v43  ;;  %v1670_v9 = vxor.u32 2147483648, %v1664_v0  ;;  %v1674_v41 = vsel %vm1672_vm15, %v1673_v17, %v1664_v0  ;;  %v1013_v30 = vshll.u32 %v8667_v39, %v1011_v29  ;;  %v10981_v1 = vld [vmem:[#allocation60_spill] sm:$0xff] }
 0x208   : > { %v1014_v42 = vshrl.u32 %v996_v8, %v1012_v36  ;;  %v4610_v24 = vsel %vm4608_vm9, %v1673_v17, %v1664_v0  ;;  %v1017_v18 = vadd.s32 127, %v1016_v56  ;;  %v8725_v49 = vadd.s32 %v1297_v58, %v1293_v15  ;;  %v10984_v36 = vld [vmem:[#allocation61_spill] sm:$0xff]  ;;  %v10985_v56 = vld [vmem:[#allocation58_spill] sm:$0xff] }
 0x209   : > { %v1303_v45 = vadd.s32 %v1302_v50, %v1292_v27  ;;  %v1671_v21 = vsel %vm1669_vm1, %v1656_v32, %v1670_v9  ;;  %v4607_v53 = vsel %vm4605_vm12, %v1656_v32, %v1670_v9  ;;  %vm2020_vm8 = vcmp.lt.s32.totalorder %v10979_v51, 2  ;;  %v10982_v27 = vld [vmem:[#allocation57_spill] sm:$0xff] }
 0x20a   : > { %v1015_v20 = vor.u32 %v1014_v42, %v1013_v30  ;;  %v1675_v39 = vsel %vm1668_vm14, %v1671_v21, %v1674_v41  ;;  %v4611_v8 = vsel %vm4604_vm11, %v4607_v53, %v4610_v24  ;;  %v1018_v43 = vshll.u32 %v1017_v18, 23  ;;  %v10989_v18 = vld [vmem:[#allocation44_spill] sm:$0xff] }
 0x20b   : > { %v1304_v54 = vadd.s32 %v1303_v45, %v1294_v12  ;;  %v8737_v15 = vshrl.u32 %v8414_v37, 5  ;;  %v8741_v58 = vsel %vm1665_vm0, nan, %v1675_v39  ;;  %v4612_v32 = vsel %vm1665_vm0, nan, %v4611_v8  ;;  %v10990_v39 = vld [vmem:[#allocation49_spill] sm:$0xff] }
 0x20c   : > { %10980 = vst [vmem:[#allocation25_spill] sm:$0xff] %v8741_v58  ;;  %vm1307_vm6 = vc.u32 %v8717_v4, %v8725_v49  ;;  %6188 = vrot.lane.b32.xlu0 %v4612_v32, %s6595_s30  ;;  %v1019_v26 = vor.u32 4788187, %v1018_v43  ;;  %v1027_v28 = vsel %vm904_vm7, %v1026_v57, %v8647_v13  ;;  %v8755_v46 = vsel %vm2020_vm8, %v10982_v27, %v10981_v1 }
 0x20d   : > { %v1308_v29 = vadd.s32 1, %v1304_v54  ;;  %v1022_v0 = vcvt.s32.f32 %v1015_v20  ;;  %v1305_v17 = vmul.u32 %v10983_v40, %v1251_v63  ;;  %v2034_v12 = vsel %vm2020_vm8, %v10985_v56, %v10984_v36 }
 0x20e   : > { %v2061_v50 = vshrl.u32 %v8755_v46, 16  ;;  %v1020_v9 = vand.u32 2147483647, %v1019_v26  ;;  %v2038_v13 = vand.u32 65535, %v2034_v12  ;;  %v2039_v57 = vshrl.u32 %v2034_v12, 16 }
 0x20f   : > { %v1309_v41 = vsel %vm1307_vm6, %v1308_v29, %v1304_v54  ;;  %v8764_v30 = vand.u32 31, %v8414_v37  ;;  %v10986_v42 = vand.u32 2147483647, %v10978_v5  ;;  %v8783_v37 = vor.u32 %v8623_v7, %v8481_v10 }
 0x210   : > { %v1310_v63 = vadd.s32 %v1309_v41, %v1305_v17  ;;  %v8773_v45 = vmul.u32 %v2061_v50, %v10989_v18  ;;  %v1023_v21 = vmul.f32 %v1022_v0, %v1020_v9  ;;  %v2041_v20 = vmul.u32 %v2039_v57, %v10989_v18 }
 0x211   : > { %vm8768_vm4 = vcmp.le.f32.partialorder %v10986_v42, 0.7853982  ;;  %v8779_v8 = vmul.u32 %v2038_v13, %v10990_v39  ;;  %10991 = vst [vmem:[#allocation91_spill] sm:$0xff] %v8783_v37  ;;  %v8787_v43 = vor.u32 %v8651_v38, %v8490_v2  ;;  %v8791_v54 = vor.u32 %v8655_v60, %v8518_v19  ;;  %v10994_v42 = vld [vmem:[#allocation43_spill] sm:$0xff] }
 0x212   : > { %v1029_v53 = vsel %vm8768_vm4, 0, %v1027_v28  ;;  %v1311_v32 = vadd.s32 536870912, %v1310_v63  ;;  %v1024_v26 = vxor.u32 2147483648, %v1023_v21  ;;  %v2040_v28 = vmul.u32 %v2038_v13, %v10989_v18 }
 0x213   : > { %10992 = vst [vmem:[#allocation20_spill] sm:$0xff] %v8787_v43  ;;  %v2044_v29 = vshll.u32 %v2041_v20, 16  ;;  %v2060_v1 = vand.u32 65535, %v8755_v46  ;;  %v1046_v27 = vadd.s32 3, %v1029_v53  ;;  %v2043_v10 = vmul.u32 %v2039_v57, %v10990_v39 }
 0x214   : > { %10993 = vst [vmem:[#allocation79_spill] sm:$0xff] %v8791_v54  ;;  %v8795_v0 = vshrl.u32 %v1311_v32, 30  ;;  %v2066_v7 = vshll.u32 %v8773_v45, 16  ;;  %v1025_v2 = vsel %vm904_vm7, %v1024_v26, %v1023_v21  ;;  %v2046_v19 = vshll.u32 %v8779_v8, 16  ;;  %v10995_v26 = vld [vmem:[#allocation87_spill] sm:$0xff] }
 0x215   : > { %vm2048_vm9 = vc.u32 %v2040_v28, %v2044_v29  ;;  %v2050_v38 = vadd.s32 %v2044_v29, %v2040_v28  ;;  %v8804_v60 = vor.u32 %v8683_v44, %v8627_v33  ;;  %v8809_v46 = vsel %vm8768_vm4, %v10978_v5, %v1025_v2  ;;  %v10996_v29 = vld [vmem:[#allocation53_spill] sm:$0xff] }
 0x216   : > { %v1313_v40 = vshll.u32 %v8795_v0, 30  ;;  %v2049_v17 = vsel %vm2048_vm9, 1, %v10851_v61  ;;  %v1030_v36 = vmul.f32 %v8809_v46, %v8809_v46  ;;  %v2062_v12 = vmul.u32 %v2060_v1, %v10989_v18 }
 0x217   : > { %v2051_v56 = vadd.s32 %v2049_v17, %v2043_v10  ;;  %vm2052_vm1 = vc.u32 %v2050_v38, %v2046_v19  ;;  %v8816_v9 = vand.u32 3, %v1046_v27  ;;  %v8818_v33 = vand.u32 3, %v1029_v53 }
 0x218   : > { %v8820_v44 = vsub.s32 %v1310_v63, %v1313_v40  ;;  %v2053_v41 = vsel %vm2052_vm1, 1, %v10851_v61  ;;  %v1031_v13 = vmul.f32 -0.001358992, %v1030_v36  ;;  %v1038_v57 = vmul.f32 -0.00019511016, %v1030_v36 }
 0x219   : > { %v2003_v24 = vshrl.u32 %v10724_v6, %v10994_v42  ;;  %vm2070_vm15 = vc.u32 %v2062_v12, %v2066_v7  ;;  %v2055_v32 = vadd.s32 %v2053_v41, %v2051_v56  ;;  %v2064_v18 = vmul.u32 %v2060_v1, %v10990_v39  ;;  %v11003_v42 = vld [vmem:[#allocation52_spill] sm:$0xff] }
 0x21a   : > { %vm1315_vm12 = vcmp.lt.s32.totalorder %v8820_v44, 0  ;;  %v1316_v21 = vsub.s32 0, %v8820_v44  ;;  %vm1214_vm14 = vcmp.lt.s32.totalorder %v10995_v26, 0  ;;  %v1032_v53 = vadd.f32 0.041655596, %v1031_v13 }
 0x21b   : > { %v1039_v28 = vadd.f32 0.008332121, %v1038_v57  ;;  %vm10997_vm11 = vcmp.lt.s32.totalorder %v10979_v51, 4  ;;  %v2045_v2 = vshrl.u32 %v2041_v20, 16  ;;  %v2071_v19 = vsel %vm2070_vm15, 1, %v10851_v61  ;;  %v11001_v57 = vld [vmem:[#allocation51_spill] sm:$0xff] }
 0x21c   : > { %v2024_v27 = vsel %vm10997_vm11, %v10996_v29, 2102212464  ;;  %v1317_v10 = vsel %vm1315_vm12, %v1316_v21, %v8820_v44  ;;  %v2072_v38 = vadd.s32 %v2066_v7, %v2062_v12  ;;  %v1033_v40 = vmul.f32 %v1032_v53, %v1030_v36 }
 0x21d   : > { %v1040_v17 = vmul.f32 %v1039_v28, %v1030_v36  ;;  %v1318_v1 = vclz %v1317_v10  ;;  %v2065_v56 = vmul.u32 %v2061_v50, %v10990_v39  ;;  %vm1052_vm0 = vcmp.eq.s32.totalorder %v8816_v9, 2 }
 0x21e   : > { %v10998_v41 = vand.u32 2147483647, %v10995_v26  ;;  %vm11002_vm13 = vcmp.lt.s32.totalorder %v10979_v51, 1  ;;  %vm11004_vm5 = vcmp.lt.s32.totalorder %v10979_v51, 3  ;;  %v2056_v12 = vadd.s32 %v2055_v32, %v2045_v2 }
 0x21f   : > { %v2023_v20 = vsel %vm11002_vm13, %v2003_v24, %v11001_v57  ;;  %v2025_v7 = vsel %vm11004_vm5, %v11003_v42, %v2024_v27  ;;  %v2068_v21 = vshll.u32 %v2064_v18, 16  ;;  %v1034_v53 = vadd.f32 -0.4999988, %v1033_v40 }
 0x220   : > { %vm8840_vm7 = vcmp.le.f32.partialorder %v10998_v41, 0.7853982  ;;  %v1041_v50 = vadd.f32 -0.16666654, %v1040_v17  ;;  %v6370_v39 = vadd.s32 4294967294, %v1318_v1  ;;  %v2073_v28 = vadd.s32 %v2071_v19, %v2065_v56 }
 0x221   : > { %vm1049_vm6 = vcmp.eq.s32.totalorder %v8816_v9, 0  ;;  %vm3989_vm4 = vcmp.eq.s32.totalorder %v8818_v33, 0  ;;  %vm3992_vm9 = vcmp.eq.s32.totalorder %v8818_v33, 2  ;;  %v1306_v29 = vadd.s32 %v8725_v49, %v8717_v4 }
 0x222   : > { %v1336_v24 = vsub.s32 4, %v8795_v0  ;;  %v2047_v10 = vshrl.u32 %v8779_v8, 16  ;;  %vm2074_vm1 = vc.u32 %v2072_v38, %v2068_v21  ;;  %v1035_v32 = vmul.f32 %v1034_v53, %v1030_v36 }
 0x223   : > { %v1042_v27 = vmul.f32 %v1041_v50, %v1030_v36  ;;  %vm1048_vm15 = vcmp.lt.s32.totalorder %v8816_v9, 2  ;;  %vm3988_vm12 = vcmp.lt.s32.totalorder %v8818_v33, 2  ;;  %vm6371_vm11 = vcmp.lt.s32.totalorder %v6370_v39, 0  ;;  %v11010_v9 = vld [vmem:[#allocation126_spill] sm:$0xff] }
 0x224   : > { %v2075_v2 = vsel %vm2074_vm1, 1, %v10851_v61  ;;  %vm1045_vm13 = vweird.f32 %v10978_v5  ;;  %v1321_v19 = vsel %vm6371_vm11, 0, %v6370_v39  ;;  %v2026_v4 = vsel %vm2020_vm8, %v2023_v20, %v2025_v7  ;;  %v11005_v39 = vld [vmem:[#allocation39_spill] sm:$0xff] }
 0x225   : > { %v2067_v49 = vshrl.u32 %v8773_v45, 16  ;;  %v2077_v40 = vadd.s32 %v2075_v2, %v2073_v28  ;;  %v1036_v8 = vadd.f32 1.0, %v1035_v32  ;;  %v1043_v17 = vadd.f32 1.0, %v1042_v27  ;;  %v11007_v27 = vld [vmem:[#allocation129_spill] sm:$0xff]  ;;  %v11008_v2 = vld [vmem:[#allocation127_spill] sm:$0xff] }
 0x226   : > { %v1322_v1 = vsub.s32 32, %v1321_v19  ;;  %v8864_v36 = vadd.s32 %v2056_v12, %v2047_v10  ;;  %v1326_v56 = vsub.s32 4294967266, %v1321_v19  ;;  %v1337_v41 = vsel %vm1214_vm14, %v1336_v24, %v8795_v0 }
 0x227   : > { %v2069_v57 = vshrl.u32 %v2064_v18, 16  ;;  %v2078_v42 = vadd.s32 %v2077_v40, %v2067_v49  ;;  %vm10655_vm5 = vcmp.lt.s32.totalorder %v8322_v23, 1  ;;  %v1044_v51 = vmul.f32 %v1043_v17, %v8809_v46 }
 0x228   : > { %v1053_v20 = vxor.u32 2147483648, %v1036_v8  ;;  %v1324_v7 = vshrl.u32 %v1306_v29, %v1322_v1  ;;  %v8871_v45 = vadd.s32 %v2072_v38, %v2068_v21  ;;  %vm10656_vm8 = vcmp.lt.s32.totalorder %v8322_v23, 4  ;;  %v11006_v29 = vld [vmem:[#allocation113_spill] sm:$0xff] }
 0x229   : > { %v1323_v12 = vshll.u32 %v8820_v44, %v1321_v19  ;;  %v1327_v53 = vadd.s32 127, %v1326_v56  ;;  %v2079_v50 = vadd.s32 %v2078_v42, %v2069_v57  ;;  %v2080_v28 = vmul.u32 %v11005_v39, %v2026_v4 }
 0x22a   : > { %v1050_v10 = vxor.u32 2147483648, %v1044_v51  ;;  %v1054_v0 = vsel %vm1052_vm0, %v1053_v20, %v1044_v51  ;;  %v1339_v18 = vsel %vm8840_vm7, 0, %v1337_v41  ;;  %vm2082_vm1 = vc.u32 %v8864_v36, %v8871_v45 }
 0x22b   : > { %v1325_v46 = vor.u32 %v1324_v7, %v1323_v12  ;;  %v1328_v38 = vshll.u32 %v1327_v53, 23  ;;  %v2083_v21 = vadd.s32 1, %v2079_v50  ;;  %vm1400_vm11 = vcmp.lt.s32.totalorder %v11006_v29, 2 }
 0x22c   : > { %v1051_v44 = vsel %vm1049_vm6, %v1036_v8, %v1050_v10  ;;  %v3991_v24 = vsel %vm3989_vm4, %v1036_v8, %v1050_v10  ;;  %v3994_v32 = vsel %vm3992_vm9, %v1053_v20, %v1044_v51  ;;  %v1414_v19 = vsel %vm1400_vm11, %v11008_v2, %v11007_v27  ;;  %v11011_v51 = vld [vmem:[#allocation125_spill] sm:$0xff]  ;;  %v11015_v27 = vld [vmem:[#allocation111_spill] sm:$0xff] }
 0x22d   : > { %v1055_v4 = vsel %vm1048_vm15, %v1051_v44, %v1054_v0  ;;  %v3995_v49 = vsel %vm3988_vm12, %v3991_v24, %v3994_v32  ;;  %v1329_v40 = vor.u32 4788187, %v1328_v38  ;;  %v2084_v17 = vsel %vm2082_vm1, %v2083_v21, %v2079_v50  ;;  %v11014_v0 = vld [vmem:[#allocation110_spill] sm:$0xff] }
 0x22e   : > { %v8899_v1 = vsel %vm1045_vm13, nan, %v1055_v4  ;;  %v3996_v8 = vsel %vm1045_vm13, nan, %v3995_v49  ;;  %v2085_v56 = vadd.s32 %v2084_v17, %v2080_v28  ;;  %v1418_v41 = vand.u32 65535, %v1414_v19  ;;  %v11013_v28 = vld [vmem:[#allocation109_spill] sm:$0xff] }
 0x22f   : > { %11009 = vst [vmem:[#allocation76_spill] sm:$0xff] %v8899_v1  ;;  %6180 = vrot.lane.b32.xlu2 %v3996_v8, %s6595_s30  ;;  %v1330_v57 = vand.u32 2147483647, %v1329_v40  ;;  %v1332_v42 = vcvt.s32.f32 %v1325_v46  ;;  %v1410_v33 = vsel %vm1400_vm11, %v11011_v51, %v11010_v9  ;;  %v1419_v20 = vshrl.u32 %v1414_v19, 16  ;;  %v11016_v40 = vld [vmem:[#allocation118_spill] sm:$0xff] }
 0x230   : > { %v8909_v7 = vsub.s32 32, %v8764_v30  ;;  %v8913_v12 = vshll.u32 %v10724_v6, %v8764_v30  ;;  %v8917_v5 = vshll.u32 %v10706_v59, %v8764_v30  ;;  %v2086_v53 = vadd.s32 536870912, %v2085_v56 }
 0x231   : > { %v8923_v50 = vsel %vm10655_vm5, %v8783_v37, %v8787_v43  ;;  %v1333_v39 = vmul.f32 %v1332_v42, %v1330_v57  ;;  %v1421_v10 = vmul.u32 %v1419_v20, %v11013_v28  ;;  %v8927_v46 = vmul.u32 %v1418_v41, %v11014_v0 }
 0x232   : > { %11012 = vst [vmem:[#allocation95_spill] sm:$0xff] %v8923_v50  ;;  %v8932_v38 = vsel %vm10656_vm8, %v8804_v60, 920167782  ;;  %v1356_v21 = vadd.s32 3, %v1339_v18  ;;  %v8934_v44 = vshrl.u32 %v2086_v53, 30  ;;  %v1441_v24 = vshrl.u32 %v1410_v33, 16 }
 0x233   : > { %v1334_v32 = vxor.u32 2147483648, %v1333_v39  ;;  %v1383_v2 = vshrl.u32 %v10724_v6, %v11015_v27  ;;  %v1420_v19 = vmul.u32 %v1418_v41, %v11013_v28  ;;  %v1424_v4 = vshll.u32 %v1421_v10, 16 }
 0x234   : > { %v2088_v49 = vshll.u32 %v8934_v44, 30  ;;  %vm11017_vm0 = vcmp.lt.s32.totalorder %v11006_v29, 4  ;;  %v1423_v8 = vmul.u32 %v1419_v20, %v11014_v0  ;;  %v1440_v57 = vand.u32 65535, %v1410_v33 }
 0x235   : > { %v1404_v17 = vsel %vm11017_vm0, %v11016_v40, 2102212464  ;;  %v1335_v42 = vsel %vm1214_vm14, %v1334_v32, %v1333_v39  ;;  %v1426_v9 = vshll.u32 %v8927_v46, 16  ;;  %vm1428_vm6 = vc.u32 %v1420_v19, %v1424_v4  ;;  %v11018_v39 = vld [vmem:[#allocation116_spill] sm:$0xff] }
 0x236   : > { %v1430_v51 = vadd.s32 %v1424_v4, %v1420_v19  ;;  %v8950_v41 = vsel %vm8840_vm7, %v10995_v26, %v1335_v42  ;;  %v8952_v53 = vsub.s32 %v2085_v56, %v2088_v49  ;;  %v1429_v27 = vsel %vm1428_vm6, 1, %v10851_v61  ;;  %v11020_v56 = vld [vmem:[#allocation117_spill] sm:$0xff] }
 0x237   : > { %v8956_v40 = vmul.u32 %v1441_v24, %v11013_v28  ;;  %v1340_v33 = vmul.f32 %v8950_v41, %v8950_v41  ;;  %v8960_v20 = vand.u32 3, %v1339_v18  ;;  %vm11019_vm14 = vcmp.lt.s32.totalorder %v11006_v29, 1 }
 0x238   : > { %v1403_v32 = vsel %vm11019_vm14, %v1383_v2, %v11018_v39  ;;  %vm1432_vm4 = vc.u32 %v1430_v51, %v1426_v9  ;;  %vm2090_vm7 = vcmp.lt.s32.totalorder %v8952_v53, 0  ;;  %v2091_v13 = vsub.s32 0, %v8952_v53 }
 0x239   : > { %vm11021_vm9 = vcmp.lt.s32.totalorder %v11006_v29, 3  ;;  %v1431_v4 = vadd.s32 %v1429_v27, %v1423_v8  ;;  %v1341_v49 = vmul.f32 -0.001358992, %v1340_v33  ;;  %v1348_v42 = vmul.f32 -0.00019511016, %v1340_v33 }
 0x23a   : > { %v1405_v19 = vsel %vm11021_vm9, %v11020_v56, %v1404_v17  ;;  %v8970_v63 = vand.u32 3, %v1356_v21  ;;  %v1433_v18 = vsel %vm1432_vm4, 1, %v10851_v61  ;;  %v2081_v58 = vadd.s32 %v8871_v45, %v8864_v36  ;;  %v11022_v45 = vld [vmem:[#allocation9_spill] sm:$0xff] }
 0x23b   : > { %v2092_v2 = vsel %vm2090_vm7, %v2091_v13, %v8952_v53  ;;  %v8977_v9 = vmul.u32 %v1440_v57, %v11014_v0  ;;  %v1446_v51 = vshll.u32 %v8956_v40, 16  ;;  %v1342_v39 = vadd.f32 0.041655596, %v1341_v49 }
 0x23c   : > { %v1349_v1 = vadd.f32 0.008332121, %v1348_v42  ;;  %v2093_v17 = vclz %v2092_v2  ;;  %v8982_v8 = vsel %vm1400_vm11, %v1403_v32, %v1405_v19  ;;  %v1425_v21 = vshrl.u32 %v1421_v10, 16 }
 0x23d   : > { %v1427_v27 = vshrl.u32 %v8927_v46, 16  ;;  %v1435_v56 = vadd.s32 %v1433_v18, %v1431_v4  ;;  %v1442_v36 = vmul.u32 %v1440_v57, %v11013_v28  ;;  %vm1989_vm15 = vcmp.lt.s32.totalorder %v11022_v45, 0 }
 0x23e   : > { %v1343_v13 = vmul.f32 %v1342_v39, %v1340_v33  ;;  %v1350_v37 = vmul.f32 %v1349_v1, %v1340_v33  ;;  %v6385_v50 = vadd.s32 4294967294, %v2093_v17  ;;  %v1445_v48 = vmul.u32 %v1441_v24, %v11014_v0 }
 0x23f   : > { %v1436_v49 = vadd.s32 %v1435_v56, %v1425_v21  ;;  %v1448_v42 = vshll.u32 %v8977_v9, 16  ;;  %vm1450_vm12 = vc.u32 %v1442_v36, %v1446_v51  ;;  %v1452_v29 = vadd.s32 %v1446_v51, %v1442_v36 }
 0x240   : > { %v1344_v32 = vadd.f32 -0.4999988, %v1343_v13  ;;  %v1351_v19 = vadd.f32 -0.16666654, %v1350_v37  ;;  %vm4300_vm13 = vcmp.eq.s32.totalorder %v8960_v20, 2  ;;  %vm6386_vm1 = vcmp.lt.s32.totalorder %v6385_v50, 0 }
 0x241   : > { %v1451_v10 = vsel %vm1450_vm12, 1, %v10851_v61  ;;  %vm4297_vm11 = vcmp.eq.s32.totalorder %v8960_v20, 0  ;;  %v2096_v28 = vsel %vm6386_vm1, 0, %v6385_v50  ;;  %v2111_v1 = vsub.s32 4, %v8934_v44 }
 0x242   : > { %v1453_v46 = vadd.s32 %v1451_v10, %v1445_v48  ;;  %vm1454_vm0 = vc.u32 %v1452_v29, %v1448_v42  ;;  %v1345_v0 = vmul.f32 %v1344_v32, %v1340_v33  ;;  %v1352_v24 = vmul.f32 %v1351_v19, %v1340_v33 }
 0x243   : > { %vm1358_vm6 = vcmp.lt.s32.totalorder %v8970_v63, 2  ;;  %vm4296_vm14 = vcmp.lt.s32.totalorder %v8960_v20, 2  ;;  %v2097_v57 = vsub.s32 32, %v2096_v28  ;;  %v1447_v37 = vshrl.u32 %v8956_v40, 16 }
 0x244   : > { %vm1355_vm4 = vweird.f32 %v10995_v26  ;;  %v2098_v4 = vshll.u32 %v8952_v53, %v2096_v28  ;;  %v2101_v18 = vsub.s32 4294967266, %v2096_v28  ;;  %v8998_v2 = vadd.s32 %v1436_v49, %v1427_v27  ;;  %v11023_v49 = vld [vmem:[#allocation99_spill] sm:$0xff] }
 0x245   : > { %v1455_v50 = vsel %vm1454_vm0, 1, %v10851_v61  ;;  %v1346_v48 = vadd.f32 1.0, %v1345_v0  ;;  %v1353_v51 = vadd.f32 1.0, %v1352_v24  ;;  %v2099_v39 = vshrl.u32 %v2081_v58, %v2097_v57 }
 0x246   : > { %v1457_v33 = vadd.s32 %v1455_v50, %v1453_v46  ;;  %vm1359_vm7 = vcmp.eq.s32.totalorder %v8970_v63, 0  ;;  %vm1362_vm9 = vcmp.eq.s32.totalorder %v8970_v63, 2  ;;  %v2102_v17 = vadd.s32 127, %v2101_v18  ;;  %v11025_v46 = vld [vmem:[#allocation163_spill] sm:$0xff] }
 0x247   : > { %v9003_v21 = vadd.s32 %v1452_v29, %v1448_v42  ;;  %vm10654_vm12 = vcmp.lt.s32.totalorder %v8322_v23, 3  ;;  %v1354_v53 = vmul.f32 %v1353_v51, %v8950_v41  ;;  %v1363_v40 = vxor.u32 2147483648, %v1346_v48 }
 0x248   : > { %v2100_v27 = vor.u32 %v2099_v39, %v2098_v4  ;;  %v1458_v56 = vadd.s32 %v1457_v33, %v1447_v37  ;;  %v2103_v36 = vshll.u32 %v2102_v17, 23  ;;  %v2112_v58 = vsel %vm1989_vm15, %v2111_v1, %v8934_v44  ;;  %v11030_v17 = vld [vmem:[#allocation151_spill] sm:$0xff] }
 0x249   : > { %v1449_v13 = vshrl.u32 %v8977_v9, 16  ;;  %v1460_v32 = vmul.u32 %v11023_v49, %v8982_v8  ;;  %v1360_v19 = vxor.u32 2147483648, %v1354_v53  ;;  %v1364_v42 = vsel %vm1362_vm9, %v1363_v40, %v1354_v53  ;;  %v11024_v8 = vld [vmem:[#allocation162_spill] sm:$0xff] }
 0x24a   : > { %vm1462_vm1 = vc.u32 %v8998_v2, %v9003_v21  ;;  %vm1710_vm0 = vcmp.lt.s32.totalorder %v7631_v47, 2  ;;  %v4302_v41 = vsel %vm4300_vm13, %v1363_v40, %v1354_v53  ;;  %v2104_v29 = vor.u32 4788187, %v2103_v36  ;;  %v11031_v40 = vld [vmem:[#allocation158_spill] sm:$0xff] }
 0x24b   : > { %v2107_v10 = vcvt.s32.f32 %v2100_v27  ;;  %v1459_v28 = vadd.s32 %v1458_v56, %v1449_v13  ;;  %v4299_v44 = vsel %vm4297_vm11, %v1346_v48, %v1360_v19  ;;  %v1361_v9 = vsel %vm1359_vm7, %v1346_v48, %v1360_v19 }
 0x24c   : > { %v9026_v1 = vsel %vm1710_vm0, %v11024_v8, %v7698_v52  ;;  %v1724_v0 = vsel %vm1710_vm0, %v11025_v46, %v7713_v55  ;;  %v4303_v24 = vsel %vm4296_vm14, %v4299_v44, %v4302_v41  ;;  %v1365_v57 = vsel %vm1358_vm6, %v1361_v9, %v1364_v42 }
 0x24d   : > { %v2105_v37 = vand.u32 2147483647, %v2104_v29  ;;  %v1463_v4 = vadd.s32 1, %v1459_v28  ;;  %v4304_v18 = vsel %vm1355_vm4, nan, %v4303_v24  ;;  %v9040_v52 = vsel %vm1355_vm4, nan, %v1365_v57 }
 0x24e   : > { %11026 = vst [vmem:[#allocation90_spill] sm:$0xff] %v9040_v52  ;;  %v1728_v50 = vand.u32 65535, %v1724_v0  ;;  %v1729_v48 = vshrl.u32 %v1724_v0, 16  ;;  %6184 = vrot.lane.b32.xlu1 %v4304_v18, %s6595_s30  ;;  %v11027_v55 = vand.u32 2147483647, %v11022_v45  ;;  %v1751_v39 = vshrl.u32 %v9026_v1, 16 }
 0x24f   : > { %v2108_v63 = vmul.f32 %v2107_v10, %v2105_v37  ;;  %v1464_v51 = vsel %vm1462_vm1, %v1463_v4, %v1459_v28  ;;  %v9065_v56 = vsel %vm10654_vm12, %v8791_v54, %v8932_v38  ;;  %v9071_v36 = vsel %vm10655_vm5, %v8787_v43, %v8791_v54 }
 0x250   : > { %vm9045_vm13 = vcmp.le.f32.partialorder %v11027_v55, 0.7853982  ;;  %v1465_v33 = vadd.s32 %v1464_v51, %v1460_v32  ;;  %v9056_v53 = vmul.u32 %v1729_v48, %v11030_v17  ;;  %v9059_v27 = vmul.u32 %v1728_v50, %v11031_v40  ;;  %11032 = vst [vmem:[#allocation84_spill] sm:$0xff] %v9071_v36 }
 0x251   : > { %v2114_v26 = vsel %vm9045_vm13, 0, %v2112_v58  ;;  %v9075_v58 = vshll.u32 %v10707_v22, %v8764_v30  ;;  %v2109_v13 = vxor.u32 2147483648, %v2108_v63  ;;  %v1730_v32 = vmul.u32 %v1728_v50, %v11030_v17 }
 0x252   : > { %v1466_v49 = vadd.s32 536870912, %v1465_v33  ;;  %v1734_v19 = vshll.u32 %v9056_v53, 16  ;;  %v9080_v42 = vmul.u32 %v1751_v39, %v11030_v17  ;;  %v2131_v41 = vadd.s32 3, %v2114_v26 }
 0x253   : > { %v2110_v38 = vsel %vm1989_vm15, %v2109_v13, %v2108_v63  ;;  %v1736_v29 = vshll.u32 %v9059_v27, 16  ;;  %v1750_v10 = vand.u32 65535, %v9026_v1  ;;  %v11033_v8 = vor.u32 %v8687_v11, %v8631_v31 }
 0x254   : > { %v9089_v28 = vsel %vm9045_vm13, %v11022_v45, %v2110_v38  ;;  %v9091_v44 = vshrl.u32 %v1466_v49, 30  ;;  %vm1738_vm11 = vc.u32 %v1730_v32, %v1734_v19  ;;  %v1740_v9 = vadd.s32 %v1734_v19, %v1730_v32  ;;  %v11034_v49 = vld [vmem:[#allocation143_spill] sm:$0xff] }
 0x255   : > { %v2807_v46 = vsel %vm10656_vm8, %v11033_v8, 1326507024  ;;  %v9100_v0 = vshrl.u32 %v10706_v59, %v8909_v7  ;;  %v2115_v1 = vmul.f32 %v9089_v28, %v9089_v28  ;;  %v1739_v24 = vsel %vm1738_vm11, 1, %v10851_v61 }
 0x256   : > { %v1468_v57 = vshll.u32 %v9091_v44, 30  ;;  %v1733_v37 = vmul.u32 %v1729_v48, %v11031_v40  ;;  %vm1742_vm15 = vc.u32 %v1740_v9, %v1736_v29  ;;  %v1756_v4 = vshll.u32 %v9080_v42, 16  ;;  %v11035_v29 = vld [vmem:[#allocation157_spill] sm:$0xff] }
 0x257   : > { %v9110_v31 = vshrl.u32 %v10707_v22, %v8909_v7  ;;  %v2116_v11 = vmul.f32 -0.001358992, %v2115_v1  ;;  %v2123_v18 = vmul.f32 -0.00019511016, %v2115_v1  ;;  %v9112_v50 = vand.u32 3, %v2114_v26 }
 0x258   : > { %v9114_v55 = vand.u32 3, %v2131_v41  ;;  %v9116_v20 = vsub.s32 %v1465_v33, %v1468_v57  ;;  %v1741_v63 = vadd.s32 %v1739_v24, %v1733_v37  ;;  %v1752_v51 = vmul.u32 %v1750_v10, %v11030_v17 }
 0x259   : > { %v2117_v13 = vadd.f32 0.041655596, %v2116_v11  ;;  %v2124_v48 = vadd.f32 0.008332121, %v2123_v18  ;;  %v1693_v32 = vshrl.u32 %v10724_v6, %v11034_v49  ;;  %v1743_v19 = vsel %vm1742_vm15, 1, %v10851_v61 }
 0x25a   : > { %vm1470_vm6 = vcmp.lt.s32.totalorder %v9116_v20, 0  ;;  %v1471_v38 = vsub.s32 0, %v9116_v20  ;;  %v9125_v26 = vmul.u32 %v1750_v10, %v11031_v40  ;;  %vm1760_vm14 = vc.u32 %v1752_v51, %v1756_v4  ;;  %v11037_v10 = vld [vmem:[#allocation153_spill] sm:$0xff] }
 0x25b   : > { %v9130_v33 = vsel %vm10654_vm12, %v8804_v60, %v2807_v46  ;;  %v2118_v17 = vmul.f32 %v2117_v13, %v2115_v1  ;;  %v2125_v41 = vmul.f32 %v2124_v48, %v2115_v1  ;;  %vm11036_vm4 = vcmp.lt.s32.totalorder %v7631_v47, 4  ;;  %v11039_v13 = vld [vmem:[#allocation155_spill] sm:$0xff] }
 0x25c   : > { %v1714_v9 = vsel %vm11036_vm4, %v11035_v29, 2102212464  ;;  %v9137_v8 = vshrl.u32 %v10708_v35, %v8909_v7  ;;  %v1472_v24 = vsel %vm1470_vm6, %v1471_v38, %v9116_v20  ;;  %vm11038_vm7 = vcmp.lt.s32.totalorder %v7631_v47, 1 }
 0x25d   : > { %v1713_v57 = vsel %vm11038_vm7, %v1693_v32, %v11037_v10  ;;  %v1745_v37 = vadd.s32 %v1743_v19, %v1741_v63  ;;  %v2119_v11 = vadd.f32 -0.4999988, %v2118_v17  ;;  %v2126_v60 = vadd.f32 -0.16666654, %v2125_v41 }
 0x25e   : > { %v1473_v46 = vclz %v1472_v24  ;;  %v1761_v18 = vsel %vm1760_vm14, 1, %v10851_v61  ;;  %vm2134_vm9 = vcmp.eq.s32.totalorder %v9114_v55, 0  ;;  %vm5067_vm1 = vcmp.eq.s32.totalorder %v9112_v50, 0 }
 0x25f   : > { %vm5070_vm13 = vcmp.eq.s32.totalorder %v9112_v50, 2  ;;  %vm11040_vm11 = vcmp.lt.s32.totalorder %v7631_v47, 3  ;;  %v1735_v49 = vshrl.u32 %v9056_v53, 16  ;;  %v1755_v32 = vmul.u32 %v1751_v39, %v11031_v40  ;;  %v11041_v39 = vld [vmem:[#allocation69_spill] sm:$0xff] }
 0x260   : > { %v1715_v48 = vsel %vm11040_vm11, %v11039_v13, %v1714_v9  ;;  %v1758_v63 = vshll.u32 %v9125_v26, 16  ;;  %v2120_v19 = vmul.f32 %v2119_v11, %v2115_v1  ;;  %v2127_v38 = vmul.f32 %v2126_v60, %v2115_v1 }
 0x261   : > { %vm2133_vm15 = vcmp.lt.s32.totalorder %v9114_v55, 2  ;;  %vm5066_vm6 = vcmp.lt.s32.totalorder %v9112_v50, 2  ;;  %v6373_v17 = vadd.s32 4294967294, %v1473_v46  ;;  %v1762_v41 = vadd.s32 %v1756_v4, %v1752_v51 }
 0x262   : > { %vm2130_vm14 = vweird.f32 %v11022_v45  ;;  %vm2137_vm4 = vcmp.eq.s32.totalorder %v9114_v55, 2  ;;  %v1461_v29 = vadd.s32 %v9003_v21, %v8998_v2  ;;  %v1746_v53 = vadd.s32 %v1745_v37, %v1735_v49 }
 0x263   : > { %v1763_v9 = vadd.s32 %v1761_v18, %v1755_v32  ;;  %vm1369_vm7 = vcmp.lt.s32.totalorder %v11041_v39, 0  ;;  %v2121_v40 = vadd.f32 1.0, %v2120_v19  ;;  %v2128_v24 = vadd.f32 1.0, %v2127_v38 }
 0x264   : > { %vm6374_vm11 = vcmp.lt.s32.totalorder %v6373_v17, 0  ;;  %vm1764_vm12 = vc.u32 %v1762_v41, %v1758_v63  ;;  %v1716_v10 = vsel %vm1710_vm0, %v1713_v57, %v1715_v48  ;;  %v1737_v4 = vshrl.u32 %v9059_v27, 16 }
 0x265   : > { %v1476_v1 = vsel %vm6374_vm11, 0, %v6373_v17  ;;  %v1765_v51 = vsel %vm1764_vm12, 1, %v10851_v61  ;;  %v2129_v11 = vmul.f32 %v2128_v24, %v9089_v28  ;;  %v2138_v60 = vxor.u32 2147483648, %v2121_v40 }
 0x266   : > { %v1477_v2 = vsub.s32 32, %v1476_v1  ;;  %v1757_v21 = vshrl.u32 %v9080_v42, 16  ;;  %v1481_v37 = vsub.s32 4294967266, %v1476_v1  ;;  %v1491_v46 = vsub.s32 4, %v9091_v44 }
 0x267   : > { %v9167_v18 = vadd.s32 %v1746_v53, %v1737_v4  ;;  %v1767_v13 = vadd.s32 %v1765_v51, %v1763_v9  ;;  %v2135_v49 = vxor.u32 2147483648, %v2129_v11  ;;  %v2139_v47 = vsel %vm2137_vm4, %v2138_v60, %v2129_v11  ;;  %v11045_v4 = vld [vmem:[#allocation77_spill] sm:$0xff] }
 0x268   : > { %v1478_v27 = vshll.u32 %v9116_v20, %v1476_v1  ;;  %v1479_v57 = vshrl.u32 %v1461_v29, %v1477_v2  ;;  %v1482_v48 = vadd.s32 127, %v1481_v37  ;;  %v1759_v28 = vshrl.u32 %v9125_v26, 16  ;;  %v11044_v1 = vld [vmem:[#allocation81_spill] sm:$0xff]  ;;  %v11047_v2 = vld [vmem:[#allocation82_spill] sm:$0xff] }
 0x269   : > { %v9173_v32 = vadd.s32 %v1762_v41, %v1758_v63  ;;  %v1768_v19 = vadd.s32 %v1767_v13, %v1757_v21  ;;  %v2136_v42 = vsel %vm2134_vm9, %v2121_v40, %v2135_v49  ;;  %v5069_v38 = vsel %vm5067_vm1, %v2121_v40, %v2135_v49  ;;  %v11043_v40 = vld [vmem:[#allocation68_spill] sm:$0xff]  ;;  %v11048_v21 = vld [vmem:[#allocation78_spill] sm:$0xff] }
 0x26a   : > { %v5072_v17 = vsel %vm5070_vm13, %v2138_v60, %v2129_v11  ;;  %v1480_v53 = vor.u32 %v1479_v57, %v1478_v27  ;;  %v2140_v20 = vsel %vm2133_vm15, %v2136_v42, %v2139_v47  ;;  %v1483_v26 = vshll.u32 %v1482_v48, 23  ;;  %v11046_v11 = vld [vmem:[#allocation144_spill] sm:$0xff] }
 0x26b   : > { %v5073_v29 = vsel %vm5066_vm6, %v5069_v38, %v5072_v17  ;;  %v1769_v63 = vadd.s32 %v1768_v19, %v1759_v28  ;;  %v9187_v41 = vsel %vm2130_vm14, nan, %v2140_v20  ;;  %vm1772_vm12 = vc.u32 %v9167_v18, %v9173_v32  ;;  %v11052_v28 = vld [vmem:[#allocation70_spill] sm:$0xff] }
 0x26c   : > { %11042 = vst [vmem:[#allocation85_spill] sm:$0xff] %v9187_v41  ;;  %v5074_v9 = vsel %vm2130_vm14, nan, %v5073_v29  ;;  %vm2485_vm0 = vcmp.lt.s32.totalorder %v11043_v40, 2  ;;  %v1484_v55 = vor.u32 4788187, %v1483_v26  ;;  %v1492_v50 = vsel %vm1369_vm7, %v1491_v46, %v9091_v44 }
 0x26d   : > { %6194 = vrot.lane.b32.xlu0 %v5074_v9, %s6595_s30  ;;  %v1773_v24 = vadd.s32 1, %v1769_v63  ;;  %v9202_v51 = vsel %vm2485_vm0, %v11045_v4, %v11044_v1  ;;  %v1487_v45 = vcvt.s32.f32 %v1480_v53  ;;  %v1770_v60 = vmul.u32 %v11046_v11, %v1716_v10  ;;  %v11053_v53 = vld [vmem:[#allocation75_spill] sm:$0xff] }
 0x26e   : > { %v2499_v37 = vsel %vm2485_vm0, %v11048_v21, %v11047_v2  ;;  %v2526_v13 = vshrl.u32 %v9202_v51, 16  ;;  %v1485_v49 = vand.u32 2147483647, %v1484_v55  ;;  %v9212_v27 = vshll.u32 %v10708_v35, %v8764_v30 }
 0x26f   : > { %v1774_v47 = vsel %vm1772_vm12, %v1773_v24, %v1769_v63  ;;  %v2503_v44 = vand.u32 65535, %v2499_v37  ;;  %v2504_v46 = vshrl.u32 %v2499_v37, 16  ;;  %v11049_v57 = vand.u32 2147483647, %v11041_v39 }
 0x270   : > { %v1775_v10 = vadd.s32 %v1774_v47, %v1770_v60  ;;  %v9221_v19 = vmul.u32 %v2526_v13, %v11052_v28  ;;  %v1488_v42 = vmul.f32 %v1487_v45, %v1485_v49  ;;  %v9231_v29 = vor.u32 %v9100_v0, %v8913_v12 }
 0x271   : > { %vm9216_vm9 = vcmp.le.f32.partialorder %v11049_v57, 0.7853982  ;;  %v2506_v17 = vmul.u32 %v2504_v46, %v11052_v28  ;;  %v9227_v20 = vmul.u32 %v2503_v44, %v11053_v53  ;;  %v9235_v26 = vor.u32 %v9110_v31, %v8917_v5 }
 0x272   : > { %v1494_v38 = vsel %vm9216_vm9, 0, %v1492_v50  ;;  %v9239_v63 = vshrl.u32 %v10709_v34, %v8909_v7  ;;  %v1776_v9 = vadd.s32 536870912, %v1775_v10  ;;  %v1489_v55 = vxor.u32 2147483648, %v1488_v42 }
 0x273   : > { %v2505_v50 = vmul.u32 %v2503_v44, %v11052_v28  ;;  %v2509_v24 = vshll.u32 %v2506_v17, 16  ;;  %v2525_v1 = vand.u32 65535, %v9202_v51  ;;  %v1511_v4 = vadd.s32 3, %v1494_v38 }
 0x274   : > { %v9243_v45 = vshrl.u32 %v1776_v9, 30  ;;  %v2508_v12 = vmul.u32 %v2504_v46, %v11053_v53  ;;  %v2531_v0 = vshll.u32 %v9221_v19, 16  ;;  %v1490_v5 = vsel %vm1369_vm7, %v1489_v55, %v1488_v42 }
 0x275   : > { %v2511_v31 = vshll.u32 %v9227_v20, 16  ;;  %vm2513_vm1 = vc.u32 %v2505_v50, %v2509_v24  ;;  %v2515_v11 = vadd.s32 %v2509_v24, %v2505_v50  ;;  %v9252_v60 = vshll.u32 %v10709_v34, %v8764_v30  ;;  %v11054_v24 = vld [vmem:[#allocation105_spill] sm:$0xff] }
 0x276   : > { %v9257_v51 = vsel %vm9216_vm9, %v11041_v39, %v1490_v5  ;;  %v1778_v2 = vshll.u32 %v9243_v45, 30  ;;  %v2514_v21 = vsel %vm2513_vm1, 1, %v10851_v61  ;;  %v2527_v47 = vmul.u32 %v2525_v1, %v11052_v28 }
 0x277   : > { %v1495_v37 = vmul.f32 %v9257_v51, %v9257_v51  ;;  %v2516_v49 = vadd.s32 %v2514_v21, %v2508_v12  ;;  %vm2517_vm13 = vc.u32 %v2515_v11, %v2511_v31  ;;  %v9266_v30 = vshrl.u32 %v10714_v16, %v8909_v7  ;;  %v11056_v31 = vld [vmem:[#allocation74_spill] sm:$0xff] }
 0x278   : > { %v9268_v44 = vand.u32 3, %v1494_v38  ;;  %v9270_v46 = vsub.s32 %v1775_v10, %v1778_v2  ;;  %v2518_v57 = vsel %vm2517_vm13, 1, %v10851_v61  ;;  %v9273_v9 = vand.u32 3, %v1511_v4  ;;  %v11055_v10 = vld [vmem:[#allocation65_spill] sm:$0xff] }
 0x279   : > { %v1496_v48 = vmul.f32 -0.001358992, %v1495_v37  ;;  %v1503_v42 = vmul.f32 -0.00019511016, %v1495_v37  ;;  %vm2535_vm15 = vc.u32 %v2527_v47, %v2531_v0  ;;  %v2520_v28 = vadd.s32 %v2518_v57, %v2516_v49 }
 0x27a   : > { %vm1780_vm6 = vcmp.lt.s32.totalorder %v9270_v46, 0  ;;  %v1781_v55 = vsub.s32 0, %v9270_v46  ;;  %v2529_v50 = vmul.u32 %v2525_v1, %v11053_v53  ;;  %vm1679_vm14 = vcmp.lt.s32.totalorder %v11054_v24, 0 }
 0x27b   : > { %v1497_v38 = vadd.f32 0.041655596, %v1496_v48  ;;  %v1504_v12 = vadd.f32 0.008332121, %v1503_v42  ;;  %v2468_v5 = vshrl.u32 %v10724_v6, %v11055_v10  ;;  %vm11057_vm4 = vcmp.lt.s32.totalorder %v11043_v40, 4  ;;  %v11061_v10 = vld [vmem:[#allocation72_spill] sm:$0xff] }
 0x27c   : > { %v2489_v4 = vsel %vm11057_vm4, %v11056_v31, 2102212464  ;;  %v1782_v11 = vsel %vm1780_vm6, %v1781_v55, %v9270_v46  ;;  %v2510_v2 = vshrl.u32 %v2506_v17, 16  ;;  %v2536_v21 = vsel %vm2535_vm15, 1, %v10851_v61  ;;  %v11063_v55 = vld [vmem:[#allocation73_spill] sm:$0xff] }
 0x27d   : > { %v2537_v41 = vadd.s32 %v2531_v0, %v2527_v47  ;;  %v1498_v49 = vmul.f32 %v1497_v38, %v1495_v37  ;;  %v1505_v57 = vmul.f32 %v1504_v12, %v1495_v37  ;;  %v1783_v1 = vclz %v1782_v11 }
 0x27e   : > { %v2530_v52 = vmul.u32 %v2526_v13, %v11053_v53  ;;  %vm1517_vm7 = vcmp.eq.s32.totalorder %v9273_v9, 2  ;;  %v11058_v48 = vand.u32 2147483647, %v11054_v24  ;;  %vm11062_vm12 = vcmp.lt.s32.totalorder %v11043_v40, 1 }
 0x27f   : > { %v2488_v17 = vsel %vm11062_vm12, %v2468_v5, %v11061_v10  ;;  %vm11064_vm9 = vcmp.lt.s32.totalorder %v11043_v40, 3  ;;  %v2521_v47 = vadd.s32 %v2520_v28, %v2510_v2  ;;  %v2533_v38 = vshll.u32 %v2529_v50, 16 }
 0x280   : > { %vm9290_vm11 = vcmp.le.f32.partialorder %v11058_v48, 0.7853982  ;;  %v2490_v0 = vsel %vm11064_vm9, %v11063_v55, %v2489_v4  ;;  %v1499_v12 = vadd.f32 -0.4999988, %v1498_v49  ;;  %v1506_v13 = vadd.f32 -0.16666654, %v1505_v57 }
 0x281   : > { %v6379_v53 = vadd.s32 4294967294, %v1783_v1  ;;  %v2538_v31 = vadd.s32 %v2536_v21, %v2530_v52  ;;  %vm1514_vm1 = vcmp.eq.s32.totalorder %v9273_v9, 0  ;;  %vm4451_vm13 = vcmp.eq.s32.totalorder %v9268_v44, 0 }
 0x282   : > { %vm4454_vm15 = vcmp.eq.s32.totalorder %v9268_v44, 2  ;;  %v1771_v11 = vadd.s32 %v9173_v32, %v9167_v18  ;;  %v1801_v5 = vsub.s32 4, %v9243_v45  ;;  %v2512_v48 = vshrl.u32 %v9227_v20, 16 }
 0x283   : > { %vm2539_vm6 = vc.u32 %v2537_v41, %v2533_v38  ;;  %v1500_v28 = vmul.f32 %v1499_v12, %v1495_v37  ;;  %v1507_v4 = vmul.f32 %v1506_v13, %v1495_v37  ;;  %vm1513_vm4 = vcmp.lt.s32.totalorder %v9273_v9, 2  ;;  %v11070_v9 = vld [vmem:[#allocation147_spill] sm:$0xff] }
 0x284   : > { %vm4450_vm12 = vcmp.lt.s32.totalorder %v9268_v44, 2  ;;  %vm6380_vm9 = vcmp.lt.s32.totalorder %v6379_v53, 0  ;;  %v2540_v52 = vsel %vm2539_vm6, 1, %v10851_v61  ;;  %vm1510_vm5 = vweird.f32 %v11041_v39 }
 0x285   : > { %v1786_v2 = vsel %vm6380_vm9, 0, %v6379_v53  ;;  %v2491_v18 = vsel %vm2485_vm0, %v2488_v17, %v2490_v0  ;;  %v2532_v32 = vshrl.u32 %v9221_v19, 16  ;;  %v2542_v21 = vadd.s32 %v2540_v52, %v2538_v31  ;;  %v11067_v52 = vld [vmem:[#allocation150_spill] sm:$0xff] }
 0x286   : > { %v1501_v20 = vadd.f32 1.0, %v1500_v28  ;;  %v1508_v49 = vadd.f32 1.0, %v1507_v4  ;;  %v1787_v57 = vsub.s32 32, %v1786_v2  ;;  %v9314_v37 = vadd.s32 %v2521_v47, %v2512_v48  ;;  %v11065_v28 = vld [vmem:[#allocation66_spill] sm:$0xff] }
 0x287   : > { %v1791_v1 = vsub.s32 4294967266, %v1786_v2  ;;  %v1802_v10 = vsel %vm1679_vm14, %v1801_v5, %v9243_v45  ;;  %v2534_v55 = vshrl.u32 %v2529_v50, 16  ;;  %v2543_v12 = vadd.s32 %v2542_v21, %v2532_v32 }
 0x288   : > { %v1509_v13 = vmul.f32 %v1508_v49, %v9257_v51  ;;  %v1518_v53 = vxor.u32 2147483648, %v1501_v20  ;;  %v1789_v40 = vshrl.u32 %v1771_v11, %v1787_v57  ;;  %v9320_v17 = vadd.s32 %v2537_v41, %v2533_v38  ;;  %v11066_v38 = vld [vmem:[#allocation139_spill] sm:$0xff] }
 0x289   : > { %v1788_v19 = vshll.u32 %v9270_v46, %v1786_v2  ;;  %v1792_v0 = vadd.s32 127, %v1791_v1  ;;  %v2544_v31 = vadd.s32 %v2543_v12, %v2534_v55  ;;  %v2545_v47 = vmul.u32 %v11065_v28, %v2491_v18  ;;  %v11068_v2 = vld [vmem:[#allocation148_spill] sm:$0xff] }
 0x28a   : > { %v1515_v48 = vxor.u32 2147483648, %v1509_v13  ;;  %v1519_v4 = vsel %vm1517_vm7, %v1518_v53, %v1509_v13  ;;  %v1804_v45 = vsel %vm9290_vm11, 0, %v1802_v10  ;;  %vm2547_vm0 = vc.u32 %v9314_v37, %v9320_v17 }
 0x28b   : > { %v1790_v51 = vor.u32 %v1789_v40, %v1788_v19  ;;  %v1793_v50 = vshll.u32 %v1792_v0, 23  ;;  %v2548_v41 = vadd.s32 1, %v2544_v31  ;;  %vm1865_vm6 = vcmp.lt.s32.totalorder %v11066_v38, 2 }
 0x28c   : > { %v1516_v46 = vsel %vm1514_vm1, %v1501_v20, %v1515_v48  ;;  %v4453_v11 = vsel %vm4451_vm13, %v1501_v20, %v1515_v48  ;;  %v4456_v5 = vsel %vm4454_vm15, %v1518_v53, %v1509_v13  ;;  %v1879_v18 = vsel %vm1865_vm6, %v11068_v2, %v11067_v52  ;;  %v11071_v53 = vld [vmem:[#allocation146_spill] sm:$0xff] }
 0x28d   : > { %v1520_v32 = vsel %vm1513_vm4, %v1516_v46, %v1519_v4  ;;  %v4457_v21 = vsel %vm4450_vm12, %v4453_v11, %v4456_v5  ;;  %v1794_v49 = vor.u32 4788187, %v1793_v50  ;;  %v2549_v57 = vsel %vm2547_vm0, %v2548_v41, %v2544_v31  ;;  %v11073_v4 = vld [vmem:[#allocation149_spill] sm:$0xff]  ;;  %v11075_v2 = vld [vmem:[#allocation142_spill] sm:$0xff] }
 0x28e   : > { %v9347_v1 = vsel %vm1510_vm5, nan, %v1520_v32  ;;  %v4458_v20 = vsel %vm1510_vm5, nan, %v4457_v21  ;;  %v2550_v10 = vadd.s32 %v2549_v57, %v2545_v47  ;;  %v1883_v55 = vand.u32 65535, %v1879_v18  ;;  %v11072_v47 = vld [vmem:[#allocation145_spill] sm:$0xff] }
 0x28f   : > { %11069 = vst [vmem:[#allocation80_spill] sm:$0xff] %v9347_v1  ;;  %6186 = vrot.lane.b32.xlu2 %v4458_v20, %s6595_s30  ;;  %v1795_v12 = vand.u32 2147483647, %v1794_v49  ;;  %v1797_v13 = vcvt.s32.f32 %v1790_v51  ;;  %v1875_v44 = vsel %vm1865_vm6, %v11071_v53, %v11070_v9  ;;  %v1884_v40 = vshrl.u32 %v1879_v18, 16  ;;  %v11074_v41 = vld [vmem:[#allocation133_spill] sm:$0xff] }
 0x290   : > { %v9358_v19 = vor.u32 %v9137_v8, %v9075_v58  ;;  %v9362_v39 = vor.u32 %v9239_v63, %v9212_v27  ;;  %vm2639_vm5 = vcmp.lt.s32.totalorder %v8737_v15, 1  ;;  %v2551_v0 = vadd.s32 536870912, %v2550_v10 }
 0x291   : > { %v1798_v28 = vmul.f32 %v1797_v13, %v1795_v12  ;;  %v1886_v48 = vmul.u32 %v1884_v40, %v11072_v47  ;;  %v9369_v51 = vmul.u32 %v1883_v55, %v11073_v4  ;;  %v9375_v58 = vsel %vm2639_vm5, %v9231_v29, %v9235_v26 }
 0x292   : > { %v1821_v8 = vadd.s32 3, %v1804_v45  ;;  %v9377_v27 = vshrl.u32 %v2551_v0, 30  ;;  %v1906_v63 = vshrl.u32 %v1875_v44, 16  ;;  %v1848_v46 = vshrl.u32 %v10724_v6, %v11074_v41 }
 0x293   : > { %v1799_v50 = vxor.u32 2147483648, %v1798_v28  ;;  %v1885_v11 = vmul.u32 %v1883_v55, %v11072_v47  ;;  %v1889_v5 = vshll.u32 %v1886_v48, 16  ;;  %vm11076_vm7 = vcmp.lt.s32.totalorder %v11066_v38, 4 }
 0x294   : > { %v2553_v52 = vshll.u32 %v9377_v27, 30  ;;  %v1869_v18 = vsel %vm11076_vm7, %v11075_v2, 2102212464  ;;  %v1888_v32 = vmul.u32 %v1884_v40, %v11073_v4  ;;  %v1905_v21 = vand.u32 65535, %v1875_v44  ;;  %v11077_v40 = vld [vmem:[#allocation140_spill] sm:$0xff] }
 0x295   : > { %v1800_v49 = vsel %vm1679_vm14, %v1799_v50, %v1798_v28  ;;  %v1891_v57 = vshll.u32 %v9369_v51, 16  ;;  %vm1893_vm1 = vc.u32 %v1885_v11, %v1889_v5  ;;  %v1895_v20 = vadd.s32 %v1889_v5, %v1885_v11 }
 0x296   : > { %v9393_v55 = vsel %vm9290_vm11, %v11054_v24, %v1800_v49  ;;  %v9395_v12 = vsub.s32 %v2550_v10, %v2553_v52  ;;  %v1894_v13 = vsel %vm1893_vm1, 1, %v10851_v61  ;;  %v9399_v9 = vmul.u32 %v1906_v63, %v11072_v47  ;;  %v11079_v10 = vld [vmem:[#allocation141_spill] sm:$0xff] }
 0x297   : > { %v1805_v53 = vmul.f32 %v9393_v55, %v9393_v55  ;;  %v9403_v44 = vand.u32 3, %v1804_v45  ;;  %vm11078_vm14 = vcmp.lt.s32.totalorder %v11066_v38, 1  ;;  %vm1897_vm13 = vc.u32 %v1895_v20, %v1891_v57 }
 0x298   : > { %v1868_v0 = vsel %vm11078_vm14, %v1848_v46, %v11077_v40  ;;  %vm2555_vm11 = vcmp.lt.s32.totalorder %v9395_v12, 0  ;;  %v2556_v42 = vsub.s32 0, %v9395_v12  ;;  %vm11080_vm15 = vcmp.lt.s32.totalorder %v11066_v38, 3 }
 0x299   : > { %v1870_v28 = vsel %vm11080_vm15, %v11079_v10, %v1869_v18  ;;  %v1896_v50 = vadd.s32 %v1894_v13, %v1888_v32  ;;  %v1806_v41 = vmul.f32 -0.001358992, %v1805_v53  ;;  %v1813_v11 = vmul.f32 -0.00019511016, %v1805_v53 }
 0x29a   : > { %v9413_v5 = vand.u32 3, %v1821_v8  ;;  %v1898_v45 = vsel %vm1897_vm13, 1, %v10851_v61  ;;  %v2546_v52 = vadd.s32 %v9320_v17, %v9314_v37  ;;  %v2557_v46 = vsel %vm2555_vm11, %v2556_v42, %v9395_v12  ;;  %v11081_v17 = vld [vmem:[#allocation41_spill] sm:$0xff] }
 0x29b   : > { %v9420_v2 = vmul.u32 %v1905_v21, %v11073_v4  ;;  %v1911_v49 = vshll.u32 %v9399_v9, 16  ;;  %v1807_v57 = vadd.f32 0.041655596, %v1806_v41  ;;  %v1814_v20 = vadd.f32 0.008332121, %v1813_v11 }
 0x29c   : > { %v2558_v18 = vclz %v2557_v46  ;;  %v9425_v32 = vsel %vm1865_vm6, %v1868_v0, %v1870_v28  ;;  %v1890_v8 = vshrl.u32 %v1886_v48, 16  ;;  %v1892_v13 = vshrl.u32 %v9369_v51, 16 }
 0x29d   : > { %v1900_v40 = vadd.s32 %v1898_v45, %v1896_v50  ;;  %v1907_v37 = vmul.u32 %v1905_v21, %v11072_v47  ;;  %vm2454_vm4 = vcmp.lt.s32.totalorder %v11081_v17, 0  ;;  %v1808_v42 = vmul.f32 %v1807_v57, %v1805_v53 }
 0x29e   : > { %v1815_v10 = vmul.f32 %v1814_v20, %v1805_v53  ;;  %v6394_v31 = vadd.s32 4294967294, %v2558_v18  ;;  %v1910_v1 = vmul.u32 %v1906_v63, %v11073_v4  ;;  %v1913_v11 = vshll.u32 %v9420_v2, 16 }
 0x29f   : > { %v1901_v41 = vadd.s32 %v1900_v40, %v1890_v8  ;;  %vm1915_vm12 = vc.u32 %v1907_v37, %v1911_v49  ;;  %v1917_v38 = vadd.s32 %v1911_v49, %v1907_v37  ;;  %v1809_v0 = vadd.f32 -0.4999988, %v1808_v42 }
 0x2a0   : > { %v1816_v28 = vadd.f32 -0.16666654, %v1815_v10  ;;  %vm4762_vm9 = vcmp.eq.s32.totalorder %v9403_v44, 2  ;;  %vm6395_vm0 = vcmp.lt.s32.totalorder %v6394_v31, 0  ;;  %v1916_v48 = vsel %vm1915_vm12, 1, %v10851_v61 }
 0x2a1   : > { %vm4759_vm6 = vcmp.eq.s32.totalorder %v9403_v44, 0  ;;  %v2561_v47 = vsel %vm6395_vm0, 0, %v6394_v31  ;;  %v2576_v51 = vsub.s32 4, %v9377_v27  ;;  %v1918_v21 = vadd.s32 %v1916_v48, %v1910_v1 }
 0x2a2   : > { %vm1919_vm7 = vc.u32 %v1917_v38, %v1913_v11  ;;  %v1810_v4 = vmul.f32 %v1809_v0, %v1805_v53  ;;  %v1817_v63 = vmul.f32 %v1816_v28, %v1805_v53  ;;  %vm1823_vm1 = vcmp.lt.s32.totalorder %v9413_v5, 2 }
 0x2a3   : > { %vm4758_vm14 = vcmp.lt.s32.totalorder %v9403_v44, 2  ;;  %v2562_v50 = vsub.s32 32, %v2561_v47  ;;  %v1912_v45 = vshrl.u32 %v9399_v9, 16  ;;  %vm1820_vm13 = vweird.f32 %v11054_v24 }
 0x2a4   : > { %v2563_v46 = vshll.u32 %v9395_v12, %v2561_v47  ;;  %v2566_v49 = vsub.s32 4294967266, %v2561_v47  ;;  %v9441_v57 = vadd.s32 %v1901_v41, %v1892_v13  ;;  %v1920_v31 = vsel %vm1919_vm7, 1, %v10851_v61  ;;  %v11082_v41 = vld [vmem:[#allocation137_spill] sm:$0xff] }
 0x2a5   : > { %vm3083_vm11 = vcmp.gt.s32.totalorder %v8417_v14, 0  ;;  %v1811_v1 = vadd.f32 1.0, %v1810_v4  ;;  %v1818_v53 = vadd.f32 1.0, %v1817_v63  ;;  %v2564_v20 = vshrl.u32 %v2546_v52, %v2562_v50 }
 0x2a6   : > { %v1922_v18 = vadd.s32 %v1920_v31, %v1918_v21  ;;  %vm1824_vm15 = vcmp.eq.s32.totalorder %v9413_v5, 0  ;;  %vm1827_vm12 = vcmp.eq.s32.totalorder %v9413_v5, 2  ;;  %v2567_v9 = vadd.s32 127, %v2566_v49  ;;  %v11084_v21 = vld [vmem:[#allocation179_spill] sm:$0xff] }
 0x2a7   : > { %v9447_v8 = vadd.s32 %v1917_v38, %v1913_v11  ;;  %vm2642_vm0 = vcmp.lt.s32.totalorder %v8737_v15, 4  ;;  %v1819_v12 = vmul.f32 %v1818_v53, %v9393_v55  ;;  %v1828_v13 = vxor.u32 2147483648, %v1811_v1 }
 0x2a8   : > { %v2565_v40 = vor.u32 %v2564_v20, %v2563_v46  ;;  %v1923_v37 = vadd.s32 %v1922_v18, %v1912_v45  ;;  %v2568_v42 = vshll.u32 %v2567_v9, 23  ;;  %v2577_v52 = vsel %vm2454_vm4, %v2576_v51, %v9377_v27  ;;  %v11083_v51 = vld [vmem:[#allocation21_spill] sm:$0xff]  ;;  %v11089_v9 = vld [vmem:[#allocation171_spill] sm:$0xff] }
 0x2a9   : > { %v1914_v10 = vshrl.u32 %v9420_v2, 16  ;;  %v1925_v0 = vmul.u32 %v11082_v41, %v9425_v32  ;;  %v1825_v28 = vxor.u32 2147483648, %v1819_v12  ;;  %v1829_v11 = vsel %vm1827_vm12, %v1828_v13, %v1819_v12 }
 0x2aa   : > { %vm1927_vm7 = vc.u32 %v9441_v57, %v9447_v8  ;;  %vm2175_vm8 = vcmp.lt.s32.totalorder %v7721_v25, 2  ;;  %v4764_v55 = vsel %vm4762_vm9, %v1828_v13, %v1819_v12  ;;  %v2569_v38 = vor.u32 4788187, %v2568_v42  ;;  %v11090_v13 = vld [vmem:[#allocation178_spill] sm:$0xff] }
 0x2ab   : > { %v2572_v48 = vcvt.s32.f32 %v2565_v40  ;;  %v1924_v47 = vadd.s32 %v1923_v37, %v1914_v10  ;;  %v4761_v27 = vsel %vm4759_vm6, %v1811_v1, %v1825_v28  ;;  %v1826_v2 = vsel %vm1824_vm15, %v1811_v1, %v1825_v28 }
 0x2ac   : > { %v9470_v32 = vsel %vm2175_vm8, %v7797_v62, %v7850_v3  ;;  %v2189_v4 = vsel %vm2175_vm8, %v11084_v21, %v11083_v51  ;;  %v4765_v63 = vsel %vm4758_vm14, %v4761_v27, %v4764_v55  ;;  %v1830_v50 = vsel %vm1823_vm1, %v1826_v2, %v1829_v11 }
 0x2ad   : > { %v2570_v45 = vand.u32 2147483647, %v2569_v38  ;;  %v1928_v46 = vadd.s32 1, %v1924_v47  ;;  %vm2641_vm9 = vcmp.lt.s32.totalorder %v8737_v15, 3  ;;  %v4766_v49 = vsel %vm1820_vm13, nan, %v4765_v63 }
 0x2ae   : > { %v9485_v62 = vsel %vm1820_vm13, nan, %v1830_v50  ;;  %v2193_v3 = vand.u32 65535, %v2189_v4  ;;  %v2194_v31 = vshrl.u32 %v2189_v4, 16  ;;  %6190 = vrot.lane.b32.xlu1 %v4766_v49, %s6595_s30  ;;  %v11086_v44 = vand.u32 2147483647, %v11081_v17  ;;  %v11092_v4 = vld [vmem:[#allocation33_spill] sm:$0xff] }
 0x2af   : > { %11085 = vst [vmem:[#allocation6_spill] sm:$0xff] %v9485_v62  ;;  %v2573_v1 = vmul.f32 %v2572_v48, %v2570_v45  ;;  %v1929_v53 = vsel %vm1927_vm7, %v1928_v46, %v1924_v47  ;;  %v2216_v20 = vshrl.u32 %v9470_v32, 16  ;;  %v2648_v37 = vsel %vm2642_vm0, %v9362_v39, 920167782 }
 0x2b0   : > { %vm9490_vm6 = vcmp.le.f32.partialorder %v11086_v44, 0.7853982  ;;  %v1930_v18 = vadd.s32 %v1929_v53, %v1925_v0  ;;  %v9501_v12 = vmul.u32 %v2194_v31, %v11089_v9  ;;  %v9504_v40 = vmul.u32 %v2193_v3, %v11090_v13 }
 0x2b1   : > { %v2579_v24 = vsel %vm9490_vm6, 0, %v2577_v52  ;;  %v9513_v42 = vsel %vm2639_vm5, %v9235_v26, %v9358_v19  ;;  %v3084_v52 = vsel %vm3083_vm11, %v8417_v14, 0  ;;  %v2574_v10 = vxor.u32 2147483648, %v2573_v1 }
 0x2b2   : > { %v1931_v41 = vadd.s32 536870912, %v1930_v18  ;;  %v2195_v0 = vmul.u32 %v2193_v3, %v11089_v9  ;;  %v2199_v28 = vshll.u32 %v9501_v12, 16  ;;  %v9521_v11 = vmul.u32 %v2216_v20, %v11089_v9 }
 0x2b3   : > { %v2575_v55 = vsel %vm2454_vm4, %v2574_v10, %v2573_v1  ;;  %v2596_v38 = vadd.s32 3, %v2579_v24  ;;  %v2201_v48 = vshll.u32 %v9504_v40, 16  ;;  %v2215_v47 = vand.u32 65535, %v9470_v32 }
 0x2b4   : > { %v9530_v14 = vsel %vm9490_vm6, %v11081_v17, %v2575_v55  ;;  %v9532_v27 = vshrl.u32 %v1931_v41, 30  ;;  %vm2203_vm1 = vc.u32 %v2195_v0, %v2199_v28  ;;  %v2205_v2 = vadd.s32 %v2199_v28, %v2195_v0  ;;  %v11095_v28 = vld [vmem:[#allocation165_spill] sm:$0xff] }
 0x2b5   : > { %v11091_v51 = vor.u32 %v9266_v30, %v9252_v60  ;;  %v11093_v63 = vor.u32 8388608, %v11092_v4  ;;  %v2580_v32 = vmul.f32 %v9530_v14, %v9530_v14  ;;  %v2204_v45 = vsel %vm2203_vm1, 1, %v10851_v61 }
 0x2b6   : > { %v1933_v46 = vshll.u32 %v9532_v27, 30  ;;  %v2198_v49 = vmul.u32 %v2194_v31, %v11090_v13  ;;  %vm2207_vm4 = vc.u32 %v2205_v2, %v2201_v48  ;;  %v2221_v60 = vshll.u32 %v9521_v11, 16 }
 0x2b7   : > { %v9539_v21 = vsel %vm2642_vm0, %v11091_v51, 1326507024  ;;  %v9543_v50 = vshll.u32 %v11093_v63, 8  ;;  %v9554_v30 = vsel %vm2641_vm9, %v9358_v19, %v2648_v37  ;;  %v2581_v3 = vmul.f32 -0.001358992, %v2580_v32 }
 0x2b8   : > { %v2588_v44 = vmul.f32 -0.00019511016, %v2580_v32  ;;  %v9556_v5 = vand.u32 3, %v2579_v24  ;;  %v9558_v1 = vand.u32 3, %v2596_v38  ;;  %v9560_v53 = vsub.s32 %v1930_v18, %v1933_v46 }
 0x2b9   : > { %11094 = vst [vmem:[#allocation88_spill] sm:$0xff] %v9543_v50  ;;  %v2206_v10 = vadd.s32 %v2204_v45, %v2198_v49  ;;  %v2217_v41 = vmul.u32 %v2215_v47, %v11089_v9  ;;  %v2582_v31 = vadd.f32 0.041655596, %v2581_v3  ;;  %v2158_v55 = vshrl.u32 %v10724_v6, %v11095_v28  ;;  %v11096_v9 = vld [vmem:[#allocation177_spill] sm:$0xff] }
 0x2ba   : > { %v2589_v0 = vadd.f32 0.008332121, %v2588_v44  ;;  %v2208_v48 = vsel %vm2207_vm4, 1, %v10851_v61  ;;  %vm1935_vm14 = vcmp.lt.s32.totalorder %v9560_v53, 0  ;;  %v1936_v37 = vsub.s32 0, %v9560_v53  ;;  %v11097_v45 = vld [vmem:[#allocation173_spill] sm:$0xff] }
 0x2bb   : > { %v9569_v24 = vmul.u32 %v2215_v47, %v11090_v13  ;;  %vm2225_vm13 = vc.u32 %v2217_v41, %v2221_v60  ;;  %v9571_v18 = vshrl.u32 %v3084_v52, 5  ;;  %v2583_v38 = vmul.f32 %v2582_v31, %v2580_v32 }
 0x2bc   : > { %v2590_v2 = vmul.f32 %v2589_v0, %v2580_v32  ;;  %v2179_v51 = vsel %vm2177_vm3, %v11096_v9, 2102212464  ;;  %v9576_v4 = vand.u32 31, %v3084_v52  ;;  %v1937_v63 = vsel %vm1935_vm14, %v1936_v37, %v9560_v53  ;;  %v11098_v52 = vld [vmem:[#allocation174_spill] sm:$0xff] }
 0x2bd   : > { %v2178_v46 = vsel %vm2174_vm2, %v2158_v55, %v11097_v45  ;;  %v2210_v49 = vadd.s32 %v2208_v48, %v2206_v10  ;;  %v2584_v47 = vadd.f32 -0.4999988, %v2583_v38  ;;  %v1938_v44 = vclz %v1937_v63 }
 0x2be   : > { %v2591_v3 = vadd.f32 -0.16666654, %v2590_v2  ;;  %v2226_v28 = vsel %vm2225_vm13, 1, %v10851_v61  ;;  %vm2599_vm11 = vcmp.eq.s32.totalorder %v9558_v1, 0  ;;  %vm5529_vm15 = vcmp.eq.s32.totalorder %v9556_v5, 0 }
 0x2bf   : > { %vm5532_vm3 = vcmp.eq.s32.totalorder %v9556_v5, 2  ;;  %v2180_v31 = vsel %vm2176_vm10, %v11098_v52, %v2179_v51  ;;  %v2200_v0 = vshrl.u32 %v9501_v12, 16  ;;  %v2220_v55 = vmul.u32 %v2216_v20, %v11090_v13  ;;  %v11099_v20 = vld [vmem:[#allocation92_spill] sm:$0xff] }
 0x2c0   : > { %v2223_v10 = vshll.u32 %v9569_v24, 16  ;;  %v2585_v48 = vmul.f32 %v2584_v47, %v2580_v32  ;;  %v2592_v37 = vmul.f32 %v2591_v3, %v2580_v32  ;;  %vm2598_vm2 = vcmp.lt.s32.totalorder %v9558_v1, 2 }
 0x2c1   : > { %vm5528_vm12 = vcmp.lt.s32.totalorder %v9556_v5, 2  ;;  %v6382_v38 = vadd.s32 4294967294, %v1938_v44  ;;  %v2227_v2 = vadd.s32 %v2221_v60, %v2217_v41  ;;  %vm2595_vm7 = vweird.f32 %v11081_v17 }
 0x2c2   : > { %vm2602_vm6 = vcmp.eq.s32.totalorder %v9558_v1, 2  ;;  %v1926_v9 = vadd.s32 %v9447_v8, %v9441_v57  ;;  %v2211_v12 = vadd.s32 %v2210_v49, %v2200_v0  ;;  %v2228_v51 = vadd.s32 %v2226_v28, %v2220_v55 }
 0x2c3   : > { %vm1834_vm10 = vcmp.lt.s32.totalorder %v11099_v20, 0  ;;  %v2586_v13 = vadd.f32 1.0, %v2585_v48  ;;  %v2593_v63 = vadd.f32 1.0, %v2592_v37  ;;  %vm6383_vm1 = vcmp.lt.s32.totalorder %v6382_v38, 0 }
 0x2c4   : > { %vm2229_vm4 = vc.u32 %v2227_v2, %v2223_v10  ;;  %v1941_v32 = vsel %vm6383_vm1, 0, %v6382_v38  ;;  %v2181_v45 = vsel %vm2175_vm8, %v2178_v46, %v2180_v31  ;;  %v2202_v60 = vshrl.u32 %v9504_v40, 16 }
 0x2c5   : > { %v2230_v41 = vsel %vm2229_vm4, 1, %v10851_v61  ;;  %v2594_v47 = vmul.f32 %v2593_v63, %v9530_v14  ;;  %v2603_v3 = vxor.u32 2147483648, %v2586_v13  ;;  %v1942_v57 = vsub.s32 32, %v1941_v32 }
 0x2c6   : > { %v2222_v8 = vshrl.u32 %v9521_v11, 16  ;;  %v1946_v49 = vsub.s32 4294967266, %v1941_v32  ;;  %v1956_v44 = vsub.s32 4, %v9532_v27  ;;  %v9606_v28 = vadd.s32 %v2211_v12, %v2202_v60  ;;  %v11103_v60 = vld [vmem:[#allocation120_spill] sm:$0xff] }
 0x2c7   : > { %v2232_v52 = vadd.s32 %v2230_v41, %v2228_v51  ;;  %v2600_v0 = vxor.u32 2147483648, %v2594_v47  ;;  %v2604_v25 = vsel %vm2602_vm6, %v2603_v3, %v2594_v47  ;;  %v1943_v40 = vshll.u32 %v9560_v53, %v1941_v32  ;;  %v11102_v32 = vld [vmem:[#allocation123_spill] sm:$0xff] }
 0x2c8   : > { %v1944_v46 = vshrl.u32 %v1926_v9, %v1942_v57  ;;  %v1947_v31 = vadd.s32 127, %v1946_v49  ;;  %v2224_v14 = vshrl.u32 %v9569_v24, 16  ;;  %v9612_v55 = vadd.s32 %v2227_v2, %v2223_v10  ;;  %v11105_v57 = vld [vmem:[#allocation124_spill] sm:$0xff] }
 0x2c9   : > { %v2233_v48 = vadd.s32 %v2232_v52, %v2222_v8  ;;  %v2601_v11 = vsel %vm2599_vm11, %v2586_v13, %v2600_v0  ;;  %v5531_v37 = vsel %vm5529_vm15, %v2586_v13, %v2600_v0  ;;  %v5534_v38 = vsel %vm5532_vm3, %v2603_v3, %v2594_v47  ;;  %v11101_v13 = vld [vmem:[#allocation108_spill] sm:$0xff]  ;;  %v11106_v8 = vld [vmem:[#allocation121_spill] sm:$0xff] }
 0x2ca   : > { %v1945_v12 = vor.u32 %v1944_v46, %v1943_v40  ;;  %v2605_v53 = vsel %vm2598_vm2, %v2601_v11, %v2604_v25  ;;  %v5535_v9 = vsel %vm5528_vm12, %v5531_v37, %v5534_v38  ;;  %v1948_v24 = vshll.u32 %v1947_v31, 23  ;;  %v11104_v47 = vld [vmem:[#allocation168_spill] sm:$0xff] }
 0x2cb   : > { %v2234_v10 = vadd.s32 %v2233_v48, %v2224_v14  ;;  %v9626_v2 = vsel %vm2595_vm7, nan, %v2605_v53  ;;  %v5536_v51 = vsel %vm2595_vm7, nan, %v5535_v9  ;;  %vm2237_vm8 = vc.u32 %v9606_v28, %v9612_v55  ;;  %v11110_v14 = vld [vmem:[#allocation106_spill] sm:$0xff] }
 0x2cc   : > { %11100 = vst [vmem:[#allocation102_spill] sm:$0xff] %v9626_v2  ;;  %vm2950_vm14 = vcmp.lt.s32.totalorder %v11101_v13, 2  ;;  %6200 = vrot.lane.b32.xlu0 %v5536_v51, %s6595_s30  ;;  %v1949_v1 = vor.u32 4788187, %v1948_v24  ;;  %v1957_v5 = vsel %vm1834_vm10, %v1956_v44, %v9532_v27  ;;  %v1952_v17 = vcvt.s32.f32 %v1945_v12  ;;  %v11111_v12 = vld [vmem:[#allocation107_spill] sm:$0xff] }
 0x2cd   : > { %v2238_v63 = vadd.s32 1, %v2234_v10  ;;  %v9641_v41 = vsel %vm2950_vm14, %v11103_v60, %v11102_v32  ;;  %v2235_v3 = vmul.u32 %v11104_v47, %v2181_v45  ;;  %v2964_v49 = vsel %vm2950_vm14, %v11106_v8, %v11105_v57 }
 0x2ce   : > { %v2991_v52 = vshrl.u32 %v9641_v41, 16  ;;  %v1950_v0 = vand.u32 2147483647, %v1949_v1  ;;  %v2968_v27 = vand.u32 65535, %v2964_v49  ;;  %v2969_v44 = vshrl.u32 %v2964_v49, 16 }
 0x2cf   : > { %v2239_v25 = vsel %vm2237_vm8, %v2238_v63, %v2234_v10  ;;  %v9653_v40 = vsel %vm2641_vm9, %v9362_v39, %v9539_v21  ;;  %v11107_v46 = vand.u32 2147483647, %v11099_v20  ;;  %v9671_v39 = vsub.s32 32, %v9576_v4 }
 0x2d0   : > { %v2240_v31 = vadd.s32 %v2239_v25, %v2235_v3  ;;  %v9662_v48 = vmul.u32 %v2991_v52, %v11110_v14  ;;  %v1953_v11 = vmul.f32 %v1952_v17, %v1950_v0  ;;  %v2971_v38 = vmul.u32 %v2969_v44, %v11110_v14 }
 0x2d1   : > { %vm9657_vm13 = vcmp.le.f32.partialorder %v11107_v46, 0.7853982  ;;  %v9668_v53 = vmul.u32 %v2968_v27, %v11111_v12  ;;  %v9674_v21 = vand.u32 65535, %v9543_v50  ;;  %v9677_v9 = vshrl.u32 %v9543_v50, 16 }
 0x2d2   : > { %v1959_v37 = vsel %vm9657_vm13, 0, %v1957_v5  ;;  %v2241_v24 = vadd.s32 536870912, %v2240_v31  ;;  %v1954_v10 = vxor.u32 2147483648, %v1953_v11  ;;  %v2970_v51 = vmul.u32 %v2968_v27, %v11110_v14 }
 0x2d3   : > { %11112 = vst [vmem:[#allocation98_spill] sm:$0xff] %v9674_v21  ;;  %v2974_v1 = vshll.u32 %v2971_v38, 16  ;;  %v2990_v5 = vand.u32 65535, %v9641_v41  ;;  %v1976_v63 = vadd.s32 3, %v1959_v37  ;;  %v2973_v60 = vmul.u32 %v2969_v44, %v11111_v12 }
 0x2d4   : > { %11113 = vst [vmem:[#allocation104_spill] sm:$0xff] %v9677_v9  ;;  %v9681_v32 = vshrl.u32 %v2241_v24, 30  ;;  %v2996_v17 = vshll.u32 %v9662_v48, 16  ;;  %v1955_v47 = vsel %vm1834_vm10, %v1954_v10, %v1953_v11  ;;  %v2976_v3 = vshll.u32 %v9668_v53, 16 }
 0x2d5   : > { %vm2978_vm11 = vc.u32 %v2970_v51, %v2974_v1  ;;  %v2980_v57 = vadd.s32 %v2974_v1, %v2970_v51  ;;  %v9690_v8 = vshll.u32 %v10724_v6, %v9576_v4  ;;  %v9695_v41 = vsel %vm9657_vm13, %v11099_v20, %v1955_v47 }
 0x2d6   : > { %v2243_v49 = vshll.u32 %v9681_v32, 30  ;;  %v2979_v0 = vsel %vm2978_vm11, 1, %v10851_v61  ;;  %v1960_v25 = vmul.f32 %v9695_v41, %v9695_v41  ;;  %v2992_v44 = vmul.u32 %v2990_v5, %v11110_v14 }
 0x2d7   : > { %v2981_v27 = vadd.s32 %v2979_v0, %v2973_v60  ;;  %vm2982_vm15 = vc.u32 %v2980_v57, %v2976_v3  ;;  %v9704_v46 = vshll.u32 %v10706_v59, %v9576_v4  ;;  %v9706_v11 = vand.u32 3, %v1959_v37  ;;  %v11114_v3 = vld [vmem:[#allocation130_spill] sm:$0xff]  ;;  %v11116_v0 = vld [vmem:[#allocation115_spill] sm:$0xff] }
 0x2d8   : > { %v9708_v45 = vsub.s32 %v2240_v31, %v2243_v49  ;;  %v2983_v24 = vsel %vm2982_vm15, 1, %v10851_v61  ;;  %v1961_v10 = vmul.f32 -0.001358992, %v1960_v25  ;;  %v1968_v51 = vmul.f32 -0.00019511016, %v1960_v25  ;;  %v11115_v31 = vld [vmem:[#allocation101_spill] sm:$0xff] }
 0x2d9   : > { %v9711_v1 = vand.u32 3, %v1976_v63  ;;  %vm3000_vm3 = vc.u32 %v2992_v44, %v2996_v17  ;;  %v2985_v14 = vadd.s32 %v2983_v24, %v2981_v27  ;;  %v2994_v47 = vmul.u32 %v2990_v5, %v11111_v12 }
 0x2da   : > { %vm2245_vm2 = vcmp.lt.s32.totalorder %v9708_v45, 0  ;;  %v2246_v60 = vsub.s32 0, %v9708_v45  ;;  %vm2144_vm12 = vcmp.lt.s32.totalorder %v11114_v3, 0  ;;  %v1962_v37 = vadd.f32 0.041655596, %v1961_v10 }
 0x2db   : > { %v1969_v57 = vadd.f32 0.008332121, %v1968_v51  ;;  %v2933_v49 = vshrl.u32 %v10724_v6, %v11115_v31  ;;  %vm11117_vm7 = vcmp.lt.s32.totalorder %v11101_v13, 4  ;;  %v2975_v62 = vshrl.u32 %v2971_v38, 16  ;;  %v11121_v31 = vld [vmem:[#allocation112_spill] sm:$0xff] }
 0x2dc   : > { %v2954_v63 = vsel %vm11117_vm7, %v11116_v0, 2102212464  ;;  %v2247_v2 = vsel %vm2245_vm2, %v2246_v60, %v9708_v45  ;;  %v3001_v50 = vsel %vm3000_vm3, 1, %v10851_v61  ;;  %v3002_v9 = vadd.s32 %v2996_v17, %v2992_v44  ;;  %v11123_v60 = vld [vmem:[#allocation114_spill] sm:$0xff] }
 0x2dd   : > { %v1963_v27 = vmul.f32 %v1962_v37, %v1960_v25  ;;  %v1970_v24 = vmul.f32 %v1969_v57, %v1960_v25  ;;  %v2248_v5 = vclz %v2247_v2  ;;  %v2995_v21 = vmul.u32 %v2991_v52, %v11111_v12 }
 0x2de   : > { %vm1982_vm6 = vcmp.eq.s32.totalorder %v9711_v1, 2  ;;  %v11118_v10 = vand.u32 2147483647, %v11114_v3  ;;  %vm11122_vm1 = vcmp.lt.s32.totalorder %v11101_v13, 1  ;;  %vm11124_vm4 = vcmp.lt.s32.totalorder %v11101_v13, 3 }
 0x2df   : > { %v2953_v38 = vsel %vm11122_vm1, %v2933_v49, %v11121_v31  ;;  %v2955_v17 = vsel %vm11124_vm4, %v11123_v60, %v2954_v63  ;;  %v2986_v44 = vadd.s32 %v2985_v14, %v2975_v62  ;;  %v2998_v2 = vshll.u32 %v2994_v47, 16 }
 0x2e0   : > { %vm9728_vm10 = vcmp.le.f32.partialorder %v11118_v10, 0.7853982  ;;  %v1964_v37 = vadd.f32 -0.4999988, %v1963_v27  ;;  %v1971_v52 = vadd.f32 -0.16666654, %v1970_v24  ;;  %v3003_v57 = vadd.s32 %v3001_v50, %v2995_v21 }
 0x2e1   : > { %v6388_v12 = vadd.s32 4294967294, %v2248_v5  ;;  %vm1979_vm8 = vcmp.eq.s32.totalorder %v9711_v1, 0  ;;  %vm4913_vm13 = vcmp.eq.s32.totalorder %v9706_v11, 0  ;;  %vm4916_vm11 = vcmp.eq.s32.totalorder %v9706_v11, 2 }
 0x2e2   : > { %v2236_v0 = vadd.s32 %v9612_v55, %v9606_v28  ;;  %v2266_v49 = vsub.s32 4, %v9681_v32  ;;  %v2977_v10 = vshrl.u32 %v9668_v53, 16  ;;  %vm3004_vm15 = vc.u32 %v3002_v9, %v2998_v2 }
 0x2e3   : > { %v1965_v62 = vmul.f32 %v1964_v37, %v1960_v25  ;;  %v1972_v14 = vmul.f32 %v1971_v52, %v1960_v25  ;;  %vm1978_vm3 = vcmp.lt.s32.totalorder %v9711_v1, 2  ;;  %vm4912_vm2 = vcmp.lt.s32.totalorder %v9706_v11, 2  ;;  %v11130_v1 = vld [vmem:[#allocation175_spill] sm:$0xff] }
 0x2e4   : > { %vm6389_vm7 = vcmp.lt.s32.totalorder %v6388_v12, 0  ;;  %v3005_v50 = vsel %vm3004_vm15, 1, %v10851_v61  ;;  %vm1975_vm1 = vweird.f32 %v11099_v20  ;;  %v2956_v28 = vsel %vm2950_vm14, %v2953_v38, %v2955_v17 }
 0x2e5   : > { %v2251_v21 = vsel %vm6389_vm7, 0, %v6388_v12  ;;  %v2997_v55 = vshrl.u32 %v9662_v48, 16  ;;  %v3007_v63 = vadd.s32 %v3005_v50, %v3003_v57  ;;  %v1966_v53 = vadd.f32 1.0, %v1965_v62  ;;  %v11125_v62 = vld [vmem:[#allocation97_spill] sm:$0xff]  ;;  %v11127_v50 = vld [vmem:[#allocation176_spill] sm:$0xff] }
 0x2e6   : > { %v1973_v27 = vadd.f32 1.0, %v1972_v14  ;;  %v2252_v24 = vsub.s32 32, %v2251_v21  ;;  %v9752_v25 = vadd.s32 %v2986_v44, %v2977_v10  ;;  %v2256_v5 = vsub.s32 4294967266, %v2251_v21 }
 0x2e7   : > { %v2267_v31 = vsel %vm2144_vm12, %v2266_v49, %v9681_v32  ;;  %v2999_v60 = vshrl.u32 %v2994_v47, 16  ;;  %v3008_v37 = vadd.s32 %v3007_v63, %v2997_v55  ;;  %v1983_v12 = vxor.u32 2147483648, %v1966_v53 }
 0x2e8   : > { %v1974_v52 = vmul.f32 %v1973_v27, %v9695_v41  ;;  %v2254_v13 = vshrl.u32 %v2236_v0, %v2252_v24  ;;  %v9758_v38 = vadd.s32 %v3002_v9, %v2998_v2  ;;  %v2253_v48 = vshll.u32 %v9708_v45, %v2251_v21  ;;  %v11126_v2 = vld [vmem:[#allocation164_spill] sm:$0xff] }
 0x2e9   : > { %v2257_v17 = vadd.s32 127, %v2256_v5  ;;  %v3009_v57 = vadd.s32 %v3008_v37, %v2999_v60  ;;  %v3010_v44 = vmul.u32 %v11125_v62, %v2956_v28  ;;  %v2269_v32 = vsel %vm9728_vm10, 0, %v2267_v31  ;;  %v11128_v21 = vld [vmem:[#allocation172_spill] sm:$0xff] }
 0x2ea   : > { %v1980_v10 = vxor.u32 2147483648, %v1974_v52  ;;  %v1984_v14 = vsel %vm1982_vm6, %v1983_v12, %v1974_v52  ;;  %vm3012_vm14 = vc.u32 %v9752_v25, %v9758_v38  ;;  %v2255_v41 = vor.u32 %v2254_v13, %v2253_v48 }
 0x2eb   : > { %v2258_v47 = vshll.u32 %v2257_v17, 23  ;;  %v3013_v9 = vadd.s32 1, %v3009_v57  ;;  %vm2330_vm4 = vcmp.lt.s32.totalorder %v11126_v2, 2  ;;  %v4918_v49 = vsel %vm4916_vm11, %v1983_v12, %v1974_v52  ;;  %v11131_v12 = vld [vmem:[#allocation170_spill] sm:$0xff] }
 0x2ec   : > { %v1981_v45 = vsel %vm1979_vm8, %v1966_v53, %v1980_v10  ;;  %v4915_v0 = vsel %vm4913_vm13, %v1966_v53, %v1980_v10  ;;  %v2344_v28 = vsel %vm2330_vm4, %v11128_v21, %v11127_v50  ;;  %v2262_v52 = vcvt.s32.f32 %v2255_v41  ;;  %v11132_v10 = vld [vmem:[#allocation160_spill] sm:$0xff]  ;;  %v11133_v41 = vld [vmem:[#allocation161_spill] sm:$0xff] }
 0x2ed   : > { %v1985_v55 = vsel %vm1978_vm3, %v1981_v45, %v1984_v14  ;;  %v4919_v63 = vsel %vm4912_vm2, %v4915_v0, %v4918_v49  ;;  %v2259_v27 = vor.u32 4788187, %v2258_v47  ;;  %v3014_v24 = vsel %vm3012_vm14, %v3013_v9, %v3009_v57  ;;  %v11134_v50 = vld [vmem:[#allocation156_spill] sm:$0xff] }
 0x2ee   : > { %v9785_v5 = vsel %vm1975_vm1, nan, %v1985_v55  ;;  %v4920_v53 = vsel %vm1975_vm1, nan, %v4919_v63  ;;  %v3015_v31 = vadd.s32 %v3014_v24, %v3010_v44  ;;  %v2348_v60 = vand.u32 65535, %v2344_v28  ;;  %v11135_v63 = vld [vmem:[#allocation169_spill] sm:$0xff] }
 0x2ef   : > { %11129 = vst [vmem:[#allocation103_spill] sm:$0xff] %v9785_v5  ;;  %6192 = vrot.lane.b32.xlu2 %v4920_v53, %s6595_s30  ;;  %v2260_v37 = vand.u32 2147483647, %v2259_v27  ;;  %v2340_v11 = vsel %vm2330_vm4, %v11131_v12, %v11130_v1  ;;  %v2349_v13 = vshrl.u32 %v2344_v28, 16  ;;  %v9796_v48 = vshll.u32 %v10707_v22, %v9576_v4 }
 0x2f0   : > { %v9800_v20 = vshll.u32 %v10708_v35, %v9576_v4  ;;  %v9804_v17 = vshll.u32 %v10709_v34, %v9576_v4  ;;  %v3016_v57 = vadd.s32 536870912, %v3015_v31  ;;  %v9808_v62 = vshrl.u32 %v10706_v59, %v9671_v39 }
 0x2f1   : > { %v2263_v44 = vmul.f32 %v2262_v52, %v2260_v37  ;;  %v2351_v14 = vmul.u32 %v2349_v13, %v11132_v10  ;;  %v9812_v47 = vmul.u32 %v2348_v60, %v11133_v41  ;;  %v9816_v9 = vshrl.u32 %v10707_v22, %v9671_v39 }
 0x2f2   : > { %v2286_v45 = vadd.s32 3, %v2269_v32  ;;  %v9818_v0 = vshrl.u32 %v3016_v57, 30  ;;  %v2371_v4 = vshrl.u32 %v2340_v11, 16  ;;  %v2313_v21 = vshrl.u32 %v10724_v6, %v11134_v50 }
 0x2f3   : > { %v2264_v49 = vxor.u32 2147483648, %v2263_v44  ;;  %v2350_v59 = vmul.u32 %v2348_v60, %v11132_v10  ;;  %v2354_v28 = vshll.u32 %v2351_v14, 16  ;;  %vm11136_vm6 = vcmp.lt.s32.totalorder %v11126_v2, 4 }
 0x2f4   : > { %v3018_v55 = vshll.u32 %v9818_v0, 30  ;;  %v2334_v27 = vsel %vm11136_vm6, %v11135_v63, 2102212464  ;;  %v2353_v22 = vmul.u32 %v2349_v13, %v11133_v41  ;;  %v2370_v24 = vand.u32 65535, %v2340_v11 }
 0x2f5   : > { %v2265_v53 = vsel %vm2144_vm12, %v2264_v49, %v2263_v44  ;;  %v2356_v37 = vshll.u32 %v9812_v47, 16  ;;  %vm2358_vm8 = vc.u32 %v2350_v59, %v2354_v28  ;;  %v2360_v52 = vadd.s32 %v2354_v28, %v2350_v59  ;;  %v11137_v44 = vld [vmem:[#allocation166_spill] sm:$0xff] }
 0x2f6   : > { %v9834_v60 = vsel %vm9728_vm10, %v11114_v3, %v2265_v53  ;;  %v9836_v1 = vsub.s32 %v3015_v31, %v3018_v55  ;;  %v2359_v12 = vsel %vm2358_vm8, 1, %v10851_v61  ;;  %v9840_v57 = vmul.u32 %v2371_v4, %v11132_v10  ;;  %v11139_v31 = vld [vmem:[#allocation167_spill] sm:$0xff] }
 0x2f7   : > { %v2270_v11 = vmul.f32 %v9834_v60, %v9834_v60  ;;  %v9844_v13 = vand.u32 3, %v2269_v32  ;;  %vm11138_vm12 = vcmp.lt.s32.totalorder %v11126_v2, 1  ;;  %vm2362_vm13 = vc.u32 %v2360_v52, %v2356_v37 }
 0x2f8   : > { %v2333_v49 = vsel %vm11138_vm12, %v2313_v21, %v11137_v44  ;;  %vm3020_vm10 = vcmp.lt.s32.totalorder %v9836_v1, 0  ;;  %v3021_v51 = vsub.s32 0, %v9836_v1  ;;  %vm11140_vm11 = vcmp.lt.s32.totalorder %v11126_v2, 3 }
 0x2f9   : > { %v2335_v50 = vsel %vm11140_vm11, %v11139_v31, %v2334_v27  ;;  %v2361_v59 = vadd.s32 %v2359_v12, %v2353_v22  ;;  %v2271_v28 = vmul.f32 -0.001358992, %v2270_v11  ;;  %v2278_v55 = vmul.f32 -0.00019511016, %v2270_v11 }
 0x2fa   : > { %v9854_v63 = vand.u32 3, %v2286_v45  ;;  %v2363_v32 = vsel %vm2362_vm13, 1, %v10851_v61  ;;  %v3011_v53 = vadd.s32 %v9758_v38, %v9752_v25  ;;  %v3022_v21 = vsel %vm3020_vm10, %v3021_v51, %v9836_v1  ;;  %v11141_v38 = vld [vmem:[#allocation67_spill] sm:$0xff] }
 0x2fb   : > { %v9861_v37 = vmul.u32 %v2370_v24, %v11133_v41  ;;  %v2376_v52 = vshll.u32 %v9840_v57, 16  ;;  %v2272_v44 = vadd.f32 0.041655596, %v2271_v28  ;;  %v2279_v5 = vadd.f32 0.008332121, %v2278_v55 }
 0x2fc   : > { %v3023_v27 = vclz %v3022_v21  ;;  %v9866_v22 = vsel %vm2330_vm4, %v2333_v49, %v2335_v50  ;;  %v2355_v45 = vshrl.u32 %v2351_v14, 16  ;;  %v2357_v12 = vshrl.u32 %v9812_v47, 16 }
 0x2fd   : > { %v2365_v31 = vadd.s32 %v2363_v32, %v2361_v59  ;;  %v2372_v25 = vmul.u32 %v2370_v24, %v11132_v10  ;;  %vm2919_vm15 = vcmp.lt.s32.totalorder %v11141_v38, 0  ;;  %v2273_v51 = vmul.f32 %v2272_v44, %v2270_v11 }
 0x2fe   : > { %v2280_v43 = vmul.f32 %v2279_v5, %v2270_v11  ;;  %v6403_v54 = vadd.s32 4294967294, %v3023_v27  ;;  %v2375_v36 = vmul.u32 %v2371_v4, %v11133_v41  ;;  %v2378_v55 = vshll.u32 %v9861_v37, 16 }
 0x2ff   : > { %v2366_v28 = vadd.s32 %v2365_v31, %v2355_v45  ;;  %vm2380_vm3 = vc.u32 %v2372_v25, %v2376_v52  ;;  %v2382_v2 = vadd.s32 %v2376_v52, %v2372_v25  ;;  %v2274_v49 = vadd.f32 -0.4999988, %v2273_v51 }
 0x300   : > { %v2281_v50 = vadd.f32 -0.16666654, %v2280_v43  ;;  %vm5224_vm2 = vcmp.eq.s32.totalorder %v9844_v13, 2  ;;  %vm6404_vm7 = vcmp.lt.s32.totalorder %v6403_v54, 0  ;;  %v2381_v14 = vsel %vm2380_vm3, 1, %v10851_v61 }
 0x301   : > { %vm5221_vm1 = vcmp.eq.s32.totalorder %v9844_v13, 0  ;;  %v3026_v10 = vsel %vm6404_vm7, 0, %v6403_v54  ;;  %v3041_v5 = vsub.s32 4, %v9818_v0  ;;  %v2383_v47 = vadd.s32 %v2381_v14, %v2375_v36 }
 0x302   : > { %vm2384_vm14 = vc.u32 %v2382_v2, %v2378_v55  ;;  %v2275_v41 = vmul.f32 %v2274_v49, %v2270_v11  ;;  %v2282_v4 = vmul.f32 %v2281_v50, %v2270_v11  ;;  %vm2288_vm4 = vcmp.lt.s32.totalorder %v9854_v63, 2 }
 0x303   : > { %vm5220_vm6 = vcmp.lt.s32.totalorder %v9844_v13, 2  ;;  %v3027_v24 = vsub.s32 32, %v3026_v10  ;;  %v2377_v43 = vshrl.u32 %v9840_v57, 16  ;;  %vm2285_vm8 = vweird.f32 %v11114_v3 }
 0x304   : > { %v3028_v59 = vshll.u32 %v9836_v1, %v3026_v10  ;;  %v3031_v32 = vsub.s32 4294967266, %v3026_v10  ;;  %v9882_v21 = vadd.s32 %v2366_v28, %v2357_v12  ;;  %v2385_v54 = vsel %vm2384_vm14, 1, %v10851_v61  ;;  %v11142_v28 = vld [vmem:[#allocation154_spill] sm:$0xff] }
 0x305   : > { %v2276_v36 = vadd.f32 1.0, %v2275_v41  ;;  %v2283_v52 = vadd.f32 1.0, %v2282_v4  ;;  %v3029_v44 = vshrl.u32 %v3011_v53, %v3027_v24  ;;  %v2387_v11 = vadd.s32 %v2385_v54, %v2383_v47 }
 0x306   : > { %vm2289_vm12 = vcmp.eq.s32.totalorder %v9854_v63, 0  ;;  %vm2292_vm13 = vcmp.eq.s32.totalorder %v9854_v63, 2  ;;  %v3032_v27 = vadd.s32 127, %v3031_v32  ;;  %v9887_v45 = vadd.s32 %v2382_v2, %v2378_v55 }
 0x307   : > { %v2284_v57 = vmul.f32 %v2283_v52, %v9834_v60  ;;  %v2293_v31 = vxor.u32 2147483648, %v2276_v36  ;;  %v3030_v1 = vor.u32 %v3029_v44, %v3028_v59  ;;  %v2388_v25 = vadd.s32 %v2387_v11, %v2377_v43  ;;  %v11147_v44 = vld [vmem:[#allocation14_spill] sm:$0xff] }
 0x308   : > { %v3033_v12 = vshll.u32 %v3032_v27, 23  ;;  %v3042_v51 = vsel %vm2919_vm15, %v3041_v5, %v9818_v0  ;;  %v2379_v53 = vshrl.u32 %v9861_v37, 16  ;;  %v2390_v49 = vmul.u32 %v11142_v28, %v9866_v22 }
 0x309   : > { %v2290_v50 = vxor.u32 2147483648, %v2284_v57  ;;  %v2294_v14 = vsel %vm2292_vm13, %v2293_v31, %v2284_v57  ;;  %vm2392_vm10 = vc.u32 %v9882_v21, %v9887_v45  ;;  %vm2640_vm11 = vcmp.lt.s32.totalorder %v8737_v15, 2 }
 0x30a   : > { %v5226_v60 = vsel %vm5224_vm2, %v2293_v31, %v2284_v57  ;;  %v3034_v55 = vor.u32 4788187, %v3033_v12  ;;  %v3037_v2 = vcvt.s32.f32 %v3030_v1  ;;  %v2389_v10 = vadd.s32 %v2388_v25, %v2379_v53 }
 0x30b   : > { %v5223_v0 = vsel %vm5221_vm1, %v2276_v36, %v2290_v50  ;;  %v2291_v37 = vsel %vm2289_vm12, %v2276_v36, %v2290_v50  ;;  %v9909_v22 = vsel %vm2640_vm11, %v9375_v58, %v9554_v30  ;;  %v2654_v5 = vsel %vm2640_vm11, %v9513_v42, %v9653_v40  ;;  %v11146_v36 = vld [vmem:[#allocation62_spill] sm:$0xff] }
 0x30c   : > { %v5227_v47 = vsel %vm5220_vm6, %v5223_v0, %v5226_v60  ;;  %v2295_v41 = vsel %vm2288_vm4, %v2291_v37, %v2294_v14  ;;  %v3035_v4 = vand.u32 2147483647, %v3034_v55  ;;  %v2393_v24 = vadd.s32 1, %v2389_v10 }
 0x30d   : > { %v5228_v43 = vsel %vm2285_vm8, nan, %v5227_v47  ;;  %v9923_v58 = vsel %vm2285_vm8, nan, %v2295_v41  ;;  %v2658_v30 = vand.u32 65535, %v2654_v5  ;;  %v2659_v59 = vshrl.u32 %v2654_v5, 16 }
 0x30e   : > { %6196 = vrot.lane.b32.xlu1 %v5228_v43, %s6595_s30  ;;  %v11143_v42 = vand.u32 2147483647, %v11141_v38  ;;  %v3038_v13 = vmul.f32 %v3037_v2, %v3035_v4  ;;  %v2394_v63 = vsel %vm2392_vm10, %v2393_v24, %v2389_v10  ;;  %v2681_v32 = vshrl.u32 %v9909_v22, 16 }
 0x30f   : > { %v2395_v54 = vadd.s32 %v2394_v63, %v2390_v49  ;;  %v9939_v52 = vmul.u32 %v2659_v59, %v11146_v36  ;;  %v9942_v11 = vmul.u32 %v2658_v30, %v11147_v44  ;;  %v3096_v27 = vshrl.u32 %v10708_v35, %v9671_v39 }
 0x310   : > { %vm9928_vm3 = vcmp.le.f32.partialorder %v11143_v42, 0.7853982  ;;  %v3099_v57 = vshrl.u32 %v10709_v34, %v9671_v39  ;;  %v9950_v31 = vshrl.u32 %v10714_v16, %v9671_v39  ;;  %v3039_v1 = vxor.u32 2147483648, %v3038_v13 }
 0x311   : > { %v3044_v3 = vsel %vm9928_vm3, 0, %v3042_v51  ;;  %v2396_v25 = vadd.s32 536870912, %v2395_v54  ;;  %v2660_v12 = vmul.u32 %v2658_v30, %v11146_v36  ;;  %v2664_v51 = vshll.u32 %v9939_v52, 16 }
 0x312   : > { %v9955_v53 = vmul.u32 %v2681_v32, %v11146_v36  ;;  %v3040_v28 = vsel %vm2919_vm15, %v3039_v1, %v3038_v13  ;;  %v3061_v35 = vadd.s32 3, %v3044_v3  ;;  %v2666_v49 = vshll.u32 %v9942_v11, 16 }
 0x313   : > { %v2680_v34 = vand.u32 65535, %v9909_v22  ;;  %v9964_v16 = vsel %vm9928_vm3, %v11141_v38, %v3040_v28  ;;  %v9966_v50 = vshrl.u32 %v2396_v25, 30  ;;  %vm2668_vm2 = vc.u32 %v2660_v12, %v2664_v51 }
 0x314   : > { %v2670_v14 = vadd.s32 %v2664_v51, %v2660_v12  ;;  %v9970_v60 = vor.u32 %v9808_v62, %v9690_v8  ;;  %v9974_v55 = vor.u32 %v9816_v9, %v9704_v46  ;;  %v3045_v2 = vmul.f32 %v9964_v16, %v9964_v16 }
 0x315   : > { %v2669_v10 = vsel %vm2668_vm2, 1, %v10851_v61  ;;  %v2398_v0 = vshll.u32 %v9966_v50, 30  ;;  %v2663_v37 = vmul.u32 %v2659_v59, %v11147_v44  ;;  %v2686_v22 = vshll.u32 %v9955_v53, 16 }
 0x316   : > { %vm2672_vm15 = vc.u32 %v2670_v14, %v2666_v49  ;;  %v9983_v5 = vor.u32 %v3096_v27, %v9796_v48  ;;  %v3046_v8 = vmul.f32 -0.001358992, %v3045_v2  ;;  %v3053_v62 = vmul.f32 -0.00019511016, %v3045_v2 }
 0x317   : > { %v9985_v47 = vand.u32 3, %v3044_v3  ;;  %v9987_v46 = vand.u32 3, %v3061_v35  ;;  %v9989_v9 = vsub.s32 %v2395_v54, %v2398_v0  ;;  %v2671_v41 = vadd.s32 %v2669_v10, %v2663_v37 }
 0x318   : > { %v2682_v4 = vmul.u32 %v2680_v34, %v11146_v36  ;;  %v3047_v24 = vadd.f32 0.041655596, %v3046_v8  ;;  %v3054_v43 = vadd.f32 0.008332121, %v3053_v62  ;;  %v2623_v30 = vshrl.u32 %v10724_v6, %v8909_v7 }
 0x319   : > { %v2673_v59 = vsel %vm2672_vm15, 1, %v10851_v61  ;;  %vm2400_vm7 = vcmp.lt.s32.totalorder %v9989_v9, 0  ;;  %v2401_v48 = vsub.s32 0, %v9989_v9  ;;  %v9998_v42 = vmul.u32 %v2680_v34, %v11147_v44 }
 0x31a   : > { %vm2690_vm1 = vc.u32 %v2682_v4, %v2686_v22  ;;  %v10001_v40 = vor.u32 %v3099_v57, %v9800_v20  ;;  %v3048_v13 = vmul.f32 %v3047_v24, %v3045_v2  ;;  %v3055_v63 = vmul.f32 %v3054_v43, %v3045_v2 }
 0x31b   : > { %v2644_v3 = vsel %vm2642_vm0, %v9358_v19, 2102212464  ;;  %v3103_v7 = vor.u32 %v9950_v31, %v9804_v17  ;;  %v2402_v54 = vsel %vm2400_vm7, %v2401_v48, %v9989_v9  ;;  %v2643_v36 = vsel %vm2639_vm5, %v2623_v30, %v9231_v29 }
 0x31c   : > { %v2675_v27 = vadd.s32 %v2673_v59, %v2671_v41  ;;  %v3049_v1 = vadd.f32 -0.4999988, %v3048_v13  ;;  %v3056_v25 = vadd.f32 -0.16666654, %v3055_v63  ;;  %v2403_v20 = vclz %v2402_v54 }
 0x31d   : > { %v2691_v57 = vsel %vm2690_vm1, 1, %v10851_v61  ;;  %vm3064_vm14 = vcmp.eq.s32.totalorder %v9987_v46, 0  ;;  %vm5991_vm4 = vcmp.eq.s32.totalorder %v9985_v47, 0  ;;  %vm5994_vm0 = vcmp.eq.s32.totalorder %v9985_v47, 2 }
 0x31e   : > { %v2645_v19 = vsel %vm2641_vm9, %v9235_v26, %v2644_v3  ;;  %v2665_v12 = vshrl.u32 %v9939_v52, 16  ;;  %v2685_v29 = vmul.u32 %v2681_v32, %v11147_v44  ;;  %v2688_v51 = vshll.u32 %v9998_v42, 16  ;;  %v11148_v32 = vld [vmem:[#allocation119_spill] sm:$0xff] }
 0x31f   : > { %v3050_v28 = vmul.f32 %v3049_v1, %v3045_v2  ;;  %v3057_v35 = vmul.f32 %v3056_v25, %v3045_v2  ;;  %vm3063_vm5 = vcmp.lt.s32.totalorder %v9987_v46, 2  ;;  %vm5990_vm6 = vcmp.lt.s32.totalorder %v9985_v47, 2 }
 0x320   : > { %v6391_v49 = vadd.s32 4294967294, %v2403_v20  ;;  %v2692_v34 = vadd.s32 %v2686_v22, %v2682_v4  ;;  %vm3060_vm8 = vweird.f32 %v11141_v38  ;;  %vm3067_vm12 = vcmp.eq.s32.totalorder %v9987_v46, 2 }
 0x321   : > { %v2391_v26 = vadd.s32 %v9887_v45, %v9882_v21  ;;  %v2676_v52 = vadd.s32 %v2675_v27, %v2665_v12  ;;  %v2693_v14 = vadd.s32 %v2691_v57, %v2685_v29  ;;  %vm2299_vm9 = vcmp.lt.s32.totalorder %v11148_v32, 0  ;;  %v11150_v29 = vld [vmem:[#allocation30_spill] sm:$0xff] }
 0x322   : > { %v3051_v44 = vadd.f32 1.0, %v3050_v28  ;;  %v3058_v10 = vadd.f32 1.0, %v3057_v35  ;;  %vm6392_vm13 = vcmp.lt.s32.totalorder %v6391_v49, 0  ;;  %vm2694_vm10 = vc.u32 %v2692_v34, %v2688_v51  ;;  %v11151_v28 = vld [vmem:[#allocation84_spill] sm:$0xff] }
 0x323   : > { %v2406_v2 = vsel %vm6392_vm13, 0, %v6391_v49  ;;  %v2646_v0 = vsel %vm2640_vm11, %v2643_v36, %v2645_v19  ;;  %v2667_v37 = vshrl.u32 %v9942_v11, 16  ;;  %v2695_v22 = vsel %vm2694_vm10, 1, %v10851_v61  ;;  %v11149_v19 = vld [vmem:[#allocation95_spill] sm:$0xff] }
 0x324   : > { %v3059_v8 = vmul.f32 %v3058_v10, %v9964_v16  ;;  %v3068_v62 = vxor.u32 2147483648, %v3051_v44  ;;  %v2407_v21 = vsub.s32 32, %v2406_v2  ;;  %v2687_v45 = vshrl.u32 %v9955_v53, 16 }
 0x325   : > { %vm3104_vm3 = vcmp.lt.s32.totalorder %v9571_v18, 1  ;;  %v2411_v41 = vsub.s32 4294967266, %v2406_v2  ;;  %v2421_v4 = vsub.s32 4, %v9966_v50  ;;  %v10037_v24 = vadd.s32 %v2676_v52, %v2667_v37 }
 0x326   : > { %v2697_v43 = vadd.s32 %v2695_v22, %v2693_v14  ;;  %v3065_v15 = vxor.u32 2147483648, %v3059_v8  ;;  %v3069_v11 = vsel %vm3067_vm12, %v3068_v62, %v3059_v8  ;;  %v2408_v30 = vshll.u32 %v9989_v9, %v2406_v2 }
 0x327   : > { %v2409_v59 = vshrl.u32 %v2391_v26, %v2407_v21  ;;  %vm3107_vm11 = vcmp.lt.s32.totalorder %v9571_v18, 4  ;;  %v2412_v16 = vadd.s32 127, %v2411_v41  ;;  %v2689_v53 = vshrl.u32 %v9998_v42, 16 }
 0x328   : > { %v10044_v48 = vadd.s32 %v2692_v34, %v2688_v51  ;;  %v2698_v13 = vadd.s32 %v2697_v43, %v2687_v45  ;;  %v3066_v63 = vsel %vm3064_vm14, %v3051_v44, %v3065_v15  ;;  %v5993_v3 = vsel %vm5991_vm4, %v3051_v44, %v3065_v15 }
 0x329   : > { %v5996_v54 = vsel %vm5994_vm0, %v3068_v62, %v3059_v8  ;;  %v2410_v36 = vor.u32 %v2409_v59, %v2408_v30  ;;  %v3070_v9 = vsel %vm3063_vm5, %v3066_v63, %v3069_v11  ;;  %v2413_v42 = vshll.u32 %v2412_v16, 23  ;;  %v11156_v8 = vld [vmem:[#allocation32_spill] sm:$0xff] }
 0x32a   : > { %v5997_v27 = vsel %vm5990_vm6, %v5993_v3, %v5996_v54  ;;  %v2699_v1 = vadd.s32 %v2698_v13, %v2689_v53  ;;  %v10058_v25 = vsel %vm3060_vm8, nan, %v3070_v9  ;;  %vm2702_vm2 = vc.u32 %v10037_v24, %v10044_v48 }
 0x32b   : > { %v5998_v20 = vsel %vm3060_vm8, nan, %v5997_v27  ;;  %vm2795_vm15 = vcmp.lt.s32.totalorder %v8322_v23, 2  ;;  %v2414_v46 = vor.u32 4788187, %v2413_v42  ;;  %v2422_v47 = vsel %vm2299_vm9, %v2421_v4, %v9966_v50 }
 0x32c   : > { %6206 = vrot.lane.b32.xlu0 %v5998_v20, %s6595_s30  ;;  %v2703_v57 = vadd.s32 1, %v2699_v1  ;;  %v10073_v12 = vsel %vm2795_vm15, %v11149_v19, %v9065_v56  ;;  %v2417_v38 = vcvt.s32.f32 %v2410_v36  ;;  %v2700_v51 = vmul.u32 %v11150_v29, %v2646_v0 }
 0x32d   : > { %v2809_v35 = vsel %vm2795_vm15, %v11151_v28, %v9130_v33  ;;  %v2836_v49 = vshrl.u32 %v10073_v12, 16  ;;  %v2415_v34 = vand.u32 2147483647, %v2414_v46  ;;  %v10085_v56 = vsel %vm3104_vm3, %v9970_v60, %v9974_v55  ;;  %v11155_v33 = vld [vmem:[#allocation36_spill] sm:$0xff]  ;;  %v11157_v46 = vld [vmem:[#allocation79_spill] sm:$0xff] }
 0x32e   : > { %v2704_v26 = vsel %vm2702_vm2, %v2703_v57, %v2699_v1  ;;  %v2813_v50 = vand.u32 65535, %v2809_v35  ;;  %v2814_v52 = vshrl.u32 %v2809_v35, 16  ;;  %v11152_v14 = vand.u32 2147483647, %v11148_v32 }
 0x32f   : > { %v2705_v10 = vadd.s32 %v2704_v26, %v2700_v51  ;;  %v10094_v2 = vmul.u32 %v2836_v49, %v11155_v33  ;;  %v2418_v0 = vmul.f32 %v2417_v38, %v2415_v34  ;;  %v3113_v21 = vsel %vm3107_vm11, %v10001_v40, 920167782  ;;  %v11159_v38 = vld [vmem:[#allocation23_spill] sm:$0xff] }
 0x330   : > { %vm10089_vm7 = vcmp.le.f32.partialorder %v11152_v14, 0.7853982  ;;  %v2816_v22 = vmul.u32 %v2814_v52, %v11155_v33  ;;  %v10100_v62 = vmul.u32 %v2813_v50, %v11156_v8  ;;  %v10109_v45 = vsel %vm3104_vm3, %v9974_v55, %v9983_v5  ;;  %v11162_v14 = vld [vmem:[#allocation20_spill] sm:$0xff] }
 0x331   : > { %v2424_v37 = vsel %vm10089_vm7, 0, %v2422_v47  ;;  %v3117_v41 = vsel %vm3107_vm11, %v3103_v7, 1326507024  ;;  %v2706_v4 = vadd.s32 536870912, %v2705_v10  ;;  %v2419_v43 = vxor.u32 2147483648, %v2418_v0 }
 0x332   : > { %v2815_v15 = vmul.u32 %v2813_v50, %v11155_v33  ;;  %v2819_v11 = vshll.u32 %v2816_v22, 16  ;;  %v2835_v30 = vand.u32 65535, %v10073_v12  ;;  %v2441_v59 = vadd.s32 3, %v2424_v37  ;;  %v11160_v50 = vld [vmem:[#allocation91_spill] sm:$0xff] }
 0x333   : > { %v10118_v16 = vshrl.u32 %v2706_v4, 30  ;;  %v2818_v53 = vmul.u32 %v2814_v52, %v11156_v8  ;;  %v2841_v13 = vshll.u32 %v10094_v2, 16  ;;  %vm3106_vm1 = vcmp.lt.s32.totalorder %v9571_v18, 3 }
 0x334   : > { %v2420_v17 = vsel %vm2299_vm9, %v2419_v43, %v2418_v0  ;;  %v2821_v31 = vshll.u32 %v10100_v62, 16  ;;  %vm2823_vm14 = vc.u32 %v2815_v15, %v2819_v11  ;;  %v2825_v7 = vadd.s32 %v2819_v11, %v2815_v15 }
 0x335   : > { %v10129_v63 = vsel %vm10089_vm7, %v11148_v32, %v2420_v17  ;;  %v10131_v3 = vand.u32 3, %v2424_v37  ;;  %v2708_v54 = vshll.u32 %v10118_v16, 30  ;;  %v2824_v36 = vsel %vm2823_vm14, 1, %v10851_v61 }
 0x336   : > { %v2425_v9 = vmul.f32 %v10129_v63, %v10129_v63  ;;  %v2826_v27 = vadd.s32 %v2824_v36, %v2818_v53  ;;  %vm2827_vm4 = vc.u32 %v2825_v7, %v2821_v31  ;;  %v2837_v42 = vmul.u32 %v2835_v30, %v11155_v33 }
 0x337   : > { %v10138_v1 = vand.u32 3, %v2441_v59  ;;  %v10140_v20 = vsub.s32 %v2705_v10, %v2708_v54  ;;  %vm11158_vm0 = vcmp.lt.s32.totalorder %v8322_v23, 4  ;;  %v2828_v57 = vsel %vm2827_vm4, 1, %v10851_v61 }
 0x338   : > { %v2799_v47 = vsel %vm11158_vm0, %v11157_v46, 2102212464  ;;  %v2426_v19 = vmul.f32 -0.001358992, %v2425_v9  ;;  %v2433_v12 = vmul.f32 -0.00019511016, %v2425_v9  ;;  %v2778_v29 = vshrl.u32 %v10724_v6, %v11159_v38 }
 0x339   : > { %vm2845_vm5 = vc.u32 %v2837_v42, %v2841_v13  ;;  %vm2710_vm6 = vcmp.lt.s32.totalorder %v10140_v20, 0  ;;  %v2711_v51 = vsub.s32 0, %v10140_v20  ;;  %v2830_v28 = vadd.s32 %v2828_v57, %v2826_v27 }
 0x33a   : > { %v2839_v35 = vmul.u32 %v2835_v30, %v11156_v8  ;;  %v2427_v34 = vadd.f32 0.041655596, %v2426_v19  ;;  %v2434_v26 = vadd.f32 0.008332121, %v2433_v12  ;;  %vm11161_vm8 = vcmp.lt.s32.totalorder %v8322_v23, 1  ;;  %v11164_v30 = vld [vmem:[#allocation159_spill] sm:$0xff] }
 0x33b   : > { %v2798_v52 = vsel %vm11161_vm8, %v2778_v29, %v11160_v50  ;;  %vm11163_vm12 = vcmp.lt.s32.totalorder %v8322_v23, 3  ;;  %v2712_v10 = vsel %vm2710_vm6, %v2711_v51, %v10140_v20  ;;  %v2820_v33 = vshrl.u32 %v2816_v22, 16 }
 0x33c   : > { %v2800_v44 = vsel %vm11163_vm12, %v11162_v14, %v2799_v47  ;;  %v2846_v0 = vsel %vm2845_vm5, 1, %v10851_v61  ;;  %v2847_v37 = vadd.s32 %v2841_v13, %v2837_v42  ;;  %v2428_v4 = vmul.f32 %v2427_v34, %v2425_v9 }
 0x33d   : > { %v2435_v43 = vmul.f32 %v2434_v26, %v2425_v9  ;;  %v2713_v15 = vclz %v2712_v10  ;;  %v2840_v11 = vmul.u32 %v2836_v49, %v11156_v8  ;;  %vm2609_vm9 = vcmp.lt.s32.totalorder %v11164_v30, 0  ;;  %v11165_v26 = vld [vmem:[#allocation64_spill] sm:$0xff] }
 0x33e   : > { %v10164_v59 = vsel %vm3106_vm1, %v9983_v5, %v3113_v21  ;;  %v3118_v53 = vsel %vm3106_vm1, %v10001_v40, %v3117_v41  ;;  %v2831_v22 = vadd.s32 %v2830_v28, %v2820_v33  ;;  %v2843_v17 = vshll.u32 %v2839_v35, 16 }
 0x33f   : > { %v2429_v31 = vadd.f32 -0.4999988, %v2428_v4  ;;  %v2436_v13 = vadd.f32 -0.16666654, %v2435_v43  ;;  %v6397_v7 = vadd.s32 4294967294, %v2713_v15  ;;  %v2848_v54 = vadd.s32 %v2846_v0, %v2840_v11 }
 0x340   : > { %vm2444_vm13 = vcmp.eq.s32.totalorder %v10138_v1, 0  ;;  %vm5375_vm10 = vcmp.eq.s32.totalorder %v10131_v3, 0  ;;  %vm5378_vm2 = vcmp.eq.s32.totalorder %v10131_v3, 2  ;;  %v2701_v49 = vadd.s32 %v10044_v48, %v10037_v24 }
 0x341   : > { %v2801_v8 = vsel %vm2795_vm15, %v2798_v52, %v2800_v44  ;;  %v2822_v40 = vshrl.u32 %v10100_v62, 16  ;;  %vm2849_vm7 = vc.u32 %v2847_v37, %v2843_v17  ;;  %v2430_v21 = vmul.f32 %v2429_v31, %v2425_v9 }
 0x342   : > { %v2437_v41 = vmul.f32 %v2436_v13, %v2425_v9  ;;  %vm2443_vm14 = vcmp.lt.s32.totalorder %v10138_v1, 2  ;;  %vm5374_vm4 = vcmp.lt.s32.totalorder %v10131_v3, 2  ;;  %vm6398_vm0 = vcmp.lt.s32.totalorder %v6397_v7, 0 }
 0x343   : > { %v2850_v36 = vsel %vm2849_vm7, 1, %v10851_v61  ;;  %vm2440_vm5 = vweird.f32 %v11148_v32  ;;  %v2716_v27 = vsel %vm6398_vm0, 0, %v6397_v7  ;;  %v2731_v24 = vsub.s32 4, %v10118_v16 }
 0x344   : > { %v2842_v23 = vshrl.u32 %v10094_v2, 16  ;;  %v2852_v48 = vadd.s32 %v2850_v36, %v2848_v54  ;;  %v2431_v42 = vadd.f32 1.0, %v2430_v21  ;;  %v2438_v62 = vadd.f32 1.0, %v2437_v41  ;;  %v11170_v21 = vld [vmem:[#allocation104_spill] sm:$0xff] }
 0x345   : > { %v2717_v46 = vsub.s32 32, %v2716_v27  ;;  %v10183_v47 = vadd.s32 %v2831_v22, %v2822_v40  ;;  %vm2447_vm15 = vcmp.eq.s32.totalorder %v10138_v1, 2  ;;  %v2721_v9 = vsub.s32 4294967266, %v2716_v27 }
 0x346   : > { %v2844_v57 = vshrl.u32 %v2839_v35, 16  ;;  %v2853_v19 = vadd.s32 %v2852_v48, %v2842_v23  ;;  %v2439_v12 = vmul.f32 %v2438_v62, %v10129_v63  ;;  %v2448_v38 = vxor.u32 2147483648, %v2431_v42 }
 0x347   : > { %v2719_v29 = vshrl.u32 %v2701_v49, %v2717_v46  ;;  %v10187_v51 = vadd.s32 %v2847_v37, %v2843_v17  ;;  %v2718_v28 = vshll.u32 %v10140_v20, %v2716_v27  ;;  %v2722_v2 = vadd.s32 127, %v2721_v9 }
 0x348   : > { %v2854_v34 = vadd.s32 %v2853_v19, %v2844_v57  ;;  %v2855_v50 = vmul.u32 %v11165_v26, %v2801_v8  ;;  %v2445_v52 = vxor.u32 2147483648, %v2439_v12  ;;  %v2449_v14 = vsel %vm2447_vm15, %v2448_v38, %v2439_v12  ;;  %v11169_v8 = vld [vmem:[#allocation98_spill] sm:$0xff] }
 0x349   : > { %v2732_v44 = vsel %vm2609_vm9, %v2731_v24, %v10118_v16  ;;  %vm2857_vm6 = vc.u32 %v10183_v47, %v10187_v51  ;;  %v2720_v63 = vor.u32 %v2719_v29, %v2718_v28  ;;  %v2723_v35 = vshll.u32 %v2722_v2, 23 }
 0x34a   : > { %v2858_v10 = vadd.s32 1, %v2854_v34  ;;  %vm3105_vm8 = vcmp.lt.s32.totalorder %v9571_v18, 2  ;;  %v2446_v20 = vsel %vm2444_vm13, %v2431_v42, %v2445_v52  ;;  %v5377_v33 = vsel %vm5375_vm10, %v2431_v42, %v2445_v52 }
 0x34b   : > { %v5380_v0 = vsel %vm5378_vm2, %v2448_v38, %v2439_v12  ;;  %v3119_v16 = vsel %vm3105_vm8, %v10109_v45, %v3118_v53  ;;  %v2450_v37 = vsel %vm2443_vm14, %v2446_v20, %v2449_v14  ;;  %v2724_v43 = vor.u32 4788187, %v2723_v35 }
 0x34c   : > { %v5381_v4 = vsel %vm5374_vm4, %v5377_v33, %v5380_v0  ;;  %v2859_v15 = vsel %vm2857_vm6, %v2858_v10, %v2854_v34  ;;  %v10212_v11 = vsel %vm2440_vm5, nan, %v2450_v37  ;;  %v3123_v31 = vand.u32 65535, %v3119_v16 }
 0x34d   : > { %v5382_v22 = vsel %vm2440_vm5, nan, %v5381_v4  ;;  %v2860_v17 = vadd.s32 %v2859_v15, %v2855_v50  ;;  %v2725_v45 = vand.u32 2147483647, %v2724_v43  ;;  %v2727_v53 = vcvt.s32.f32 %v2720_v63 }
 0x34e   : > { %6198 = vrot.lane.b32.xlu2 %v5382_v22, %s6595_s30  ;;  %v3115_v3 = vsel %vm3105_vm8, %v10085_v56, %v10164_v59  ;;  %v3124_v1 = vshrl.u32 %v3119_v16, 16  ;;  %v11166_v13 = vand.u32 2147483647, %v11164_v30  ;;  %v10231_v41 = vmul.u32 %v3123_v31, %v11170_v21 }
 0x34f   : > { %v2861_v32 = vadd.s32 536870912, %v2860_v17  ;;  %v2728_v54 = vmul.f32 %v2727_v53, %v2725_v45  ;;  %v3146_v56 = vshrl.u32 %v3115_v3, 16  ;;  %v3125_v27 = vmul.u32 %v3123_v31, %v11169_v8 }
 0x350   : > { %vm10223_vm12 = vcmp.le.f32.partialorder %v11166_v13, 0.7853982  ;;  %v3126_v40 = vmul.u32 %v3124_v1, %v11169_v8  ;;  %v3128_v42 = vmul.u32 %v3124_v1, %v11170_v21  ;;  %v3145_v62 = vand.u32 65535, %v3115_v3 }
 0x351   : > { %v2734_v49 = vsel %vm10223_vm12, 0, %v2732_v44  ;;  %v10233_v36 = vshrl.u32 %v2861_v32, 30  ;;  %v2729_v59 = vxor.u32 2147483648, %v2728_v54  ;;  %v3131_v9 = vshll.u32 %v10231_v41, 16 }
 0x352   : > { %v3129_v24 = vshll.u32 %v3126_v40, 16  ;;  %v2751_v23 = vadd.s32 3, %v2734_v49  ;;  %v3148_v29 = vmul.u32 %v3146_v56, %v11169_v8  ;;  %v10250_v52 = vand.u32 3, %v2734_v49 }
 0x353   : > { %v2863_v48 = vshll.u32 %v10233_v36, 30  ;;  %v2730_v46 = vsel %vm2609_vm9, %v2729_v59, %v2728_v54  ;;  %v3149_v35 = vmul.u32 %v3145_v62, %v11170_v21  ;;  %v2856_v0 = vadd.s32 %v10187_v51, %v10183_v47 }
 0x354   : > { %vm3133_vm13 = vc.u32 %v3125_v27, %v3129_v24  ;;  %v3135_v57 = vadd.s32 %v3129_v24, %v3125_v27  ;;  %v2733_v19 = vsel %vm10223_vm12, %v11164_v30, %v2730_v46  ;;  %v10253_v44 = vand.u32 3, %v2751_v23 }
 0x355   : > { %v10244_v12 = vsub.s32 %v2860_v17, %v2863_v48  ;;  %v3134_v38 = vsel %vm3133_vm13, 1, %v10851_v61  ;;  %v2735_v28 = vmul.f32 %v2733_v19, %v2733_v19  ;;  %v3151_v10 = vshll.u32 %v3148_v29, 16 }
 0x356   : > { %vm3137_vm10 = vc.u32 %v3135_v57, %v3131_v9  ;;  %v3136_v34 = vadd.s32 %v3134_v38, %v3128_v42  ;;  %v3088_v37 = vshrl.u32 %v10724_v6, %v9671_v39  ;;  %v3109_v4 = vsel %vm3107_vm11, %v9983_v5, 2102212464 }
 0x357   : > { %vm2865_vm2 = vcmp.lt.s32.totalorder %v10244_v12, 0  ;;  %v2866_v2 = vsub.s32 0, %v10244_v12  ;;  %v2736_v26 = vmul.f32 -0.001358992, %v2735_v28  ;;  %v2743_v50 = vmul.f32 -0.00019511016, %v2735_v28 }
 0x358   : > { %v3138_v14 = vsel %vm3137_vm10, 1, %v10851_v61  ;;  %v3147_v15 = vmul.u32 %v3145_v62, %v11169_v8  ;;  %v3130_v45 = vshrl.u32 %v3126_v40, 16  ;;  %v3150_v53 = vmul.u32 %v3146_v56, %v11170_v21 }
 0x359   : > { %v2867_v63 = vsel %vm2865_vm2, %v2866_v2, %v10244_v12  ;;  %v2737_v20 = vadd.f32 0.041655596, %v2736_v26  ;;  %v2744_v33 = vadd.f32 0.008332121, %v2743_v50  ;;  %v3140_v43 = vadd.s32 %v3138_v14, %v3136_v34 }
 0x35a   : > { %v2868_v16 = vclz %v2867_v63  ;;  %v3153_v3 = vshll.u32 %v3149_v35, 16  ;;  %vm3155_vm9 = vc.u32 %v3147_v15, %v3151_v10  ;;  %v3157_v47 = vadd.s32 %v3151_v10, %v3147_v15 }
 0x35b   : > { %v2738_v22 = vmul.f32 %v2737_v20, %v2735_v28  ;;  %v2745_v17 = vmul.f32 %v2744_v33, %v2735_v28  ;;  %v3156_v6 = vsel %vm3155_vm9, 1, %v10851_v61  ;;  %vm5683_vm14 = vcmp.eq.s32.totalorder %v10250_v52, 0  ;;  %v11171_v33 = vld [vmem:[#allocation88_spill] sm:$0xff] }
 0x35c   : > { %v6400_v31 = vadd.s32 4294967294, %v2868_v16  ;;  %vm5686_vm11 = vcmp.eq.s32.totalorder %v10250_v52, 2  ;;  %v3141_v5 = vadd.s32 %v3140_v43, %v3130_v45  ;;  %v3158_v13 = vadd.s32 %v3156_v6, %v3150_v53 }
 0x35d   : > { %v2739_v51 = vadd.f32 -0.4999988, %v2738_v22  ;;  %v2746_v1 = vadd.f32 -0.16666654, %v2745_v17  ;;  %vm3159_vm4 = vc.u32 %v3157_v47, %v3153_v3  ;;  %vm5682_vm0 = vcmp.lt.s32.totalorder %v10250_v52, 2  ;;  %v11172_v52 = vld [vmem:[#allocation152_spill] sm:$0xff] }
 0x35e   : > { %vm6401_vm7 = vcmp.lt.s32.totalorder %v6400_v31, 0  ;;  %v3132_v49 = vshrl.u32 %v10231_v41, 16  ;;  %vm2750_vm5 = vweird.f32 %v11164_v30  ;;  %v3152_v21 = vshrl.u32 %v3148_v29, 16 }
 0x35f   : > { %v2871_v39 = vsel %vm6401_vm7, 0, %v6400_v31  ;;  %v2740_v7 = vmul.f32 %v2739_v51, %v2735_v28  ;;  %v2747_v32 = vmul.f32 %v2746_v1, %v2735_v28  ;;  %v3160_v56 = vsel %vm3159_vm4, 1, %v10851_v61 }
 0x360   : > { %v2872_v54 = vsub.s32 32, %v2871_v39  ;;  %v2873_v8 = vshll.u32 %v10244_v12, %v2871_v39  ;;  %v2876_v40 = vsub.s32 4294967266, %v2871_v39  ;;  %v3162_v23 = vadd.s32 %v3160_v56, %v3158_v13 }
 0x361   : > { %v2741_v59 = vadd.f32 1.0, %v2740_v7  ;;  %v2748_v27 = vadd.f32 1.0, %v2747_v32  ;;  %v3108_v42 = vsel %vm3104_vm3, %v3088_v37, %v9970_v60  ;;  %v3110_v41 = vsel %vm3106_vm1, %v9974_v55, %v3109_v4 }
 0x362   : > { %v2874_v24 = vshrl.u32 %v2856_v0, %v2872_v54  ;;  %v2877_v48 = vadd.s32 127, %v2876_v40  ;;  %v10280_v62 = vadd.s32 %v3141_v5, %v3132_v49  ;;  %v3163_v12 = vadd.s32 %v3162_v23, %v3152_v21 }
 0x363   : > { %v2749_v46 = vmul.f32 %v2748_v27, %v2733_v19  ;;  %v2758_v9 = vxor.u32 2147483648, %v2741_v59  ;;  %vm2757_vm15 = vcmp.eq.s32.totalorder %v10253_v44, 2  ;;  %v3154_v38 = vshrl.u32 %v3149_v35, 16 }
 0x364   : > { %v2875_v57 = vor.u32 %v2874_v24, %v2873_v8  ;;  %v2878_v61 = vshll.u32 %v2877_v48, 23  ;;  %v3161_v29 = vadd.s32 %v3157_v47, %v3153_v3  ;;  %vm2753_vm6 = vcmp.lt.s32.totalorder %v10253_v44, 2 }
 0x365   : > { %vm2754_vm12 = vcmp.eq.s32.totalorder %v10253_v44, 0  ;;  %v2755_v60 = vxor.u32 2147483648, %v2749_v46  ;;  %v2759_v28 = vsel %vm2757_vm15, %v2758_v9, %v2749_v46  ;;  %v3111_v55 = vsel %vm3105_vm8, %v3108_v42, %v3110_v41 }
 0x366   : > { %v2879_v2 = vor.u32 4788187, %v2878_v61  ;;  %v3164_v34 = vadd.s32 %v3163_v12, %v3154_v38  ;;  %vm3167_vm3 = vc.u32 %v10280_v62, %v3161_v29  ;;  %v5688_v26 = vsel %vm5686_vm11, %v2758_v9, %v2749_v46 }
 0x367   : > { %v5685_v19 = vsel %vm5683_vm14, %v2741_v59, %v2755_v60  ;;  %v2756_v50 = vsel %vm2754_vm12, %v2741_v59, %v2755_v60  ;;  %v2882_v14 = vcvt.s32.f32 %v2875_v57  ;;  %v3165_v0 = vmul.u32 %v11171_v33, %v3111_v55  ;;  %v11174_v33 = vld [vmem:[#allocation24_spill] sm:$0xff] }
 0x368   : > { %v5689_v44 = vsel %vm5682_vm0, %v5685_v19, %v5688_v26  ;;  %v2760_v63 = vsel %vm2753_vm6, %v2756_v50, %v2759_v28  ;;  %v2880_v35 = vand.u32 2147483647, %v2879_v2  ;;  %v3168_v10 = vadd.s32 1, %v3164_v34 }
 0x369   : > { %v5690_v18 = vsel %vm2750_vm5, nan, %v5689_v44  ;;  %v10298_v20 = vsel %vm2750_vm5, nan, %v2760_v63  ;;  %vm2764_vm1 = vcmp.lt.s32.totalorder %v11172_v52, 0  ;;  %v2886_v15 = vsub.s32 4, %v10233_v36 }
 0x36a   : > { %6202 = vrot.lane.b32.xlu1 %v5690_v18, %s6595_s30  ;;  %v2883_v16 = vmul.f32 %v2882_v14, %v2880_v35  ;;  %v3169_v37 = vsel %vm3167_vm3, %v3168_v10, %v3164_v34  ;;  %v11173_v17 = vand.u32 2147483647, %v11172_v52  ;;  %v3166_v57 = vadd.s32 %v3161_v29, %v10280_v62  ;;  %v6175_v35 = vpop.permute.xlu2 %6174  ;;  %v6173_v10 = vpop.permute.xlu1 %6172 }
 0x36b   : > { %v3170_v4 = vadd.s32 %v3169_v37, %v3165_v0  ;;  %v2887_v3 = vsel %vm2764_vm1, %v2886_v15, %v10233_v36  ;;  %vm2905_vm2 = vweird.f32 %v11172_v52  ;;  %vm6229_vm5 = vcmask 523264  }
 0x36c   : > { %v2884_v43 = vxor.u32 2147483648, %v2883_v16  ;;  %vm2763_vm8 = vcmp.le.f32.partialorder %v11173_v17, 0.7853982  ;;  %v6231_v0 = vsel %vm6229_vm5, %v11174_v33, %v6175_v35 }
 0x36d   : > { %v3171_v22 = vadd.s32 536870912, %v3170_v4  ;;  %v2889_v39 = vsel %vm2763_vm8, 0, %v2887_v3  ;;  %6250 = vst [vmem:[%s10328_s5 + $0x8] sm:$0xff] %v6231_v0 }
 0x36e   : > { %v2885_v31 = vsel %vm2764_vm1, %v2884_v43, %v2883_v16  ;;  %v2906_v49 = vadd.s32 3, %v2889_v39  ;;  %v5835_v23 = vand.u32 3, %v2889_v39  ;;  %v11175_v16 = vld [vmem:[#allocation31_spill] sm:$0xff] }
 0x36f   : > { %v2888_v30 = vsel %vm2763_vm8, %v11172_v52, %v2885_v31  ;;  %v10307_v45 = vshrl.u32 %v3171_v22, 30  ;;  %v6230_v37 = vsel %vm6229_vm5, %v11175_v16, %v6173_v10  ;;  %v11176_v43 = vld [vmem:[#allocation35_spill] sm:$0xff] }
 0x370   : > { %v2890_v53 = vmul.f32 %v2888_v30, %v2888_v30  ;;  %v2907_v24 = vand.u32 3, %v2906_v49  ;;  %vm5836_vm7 = vcmp.lt.s32.totalorder %v5835_v23, 2  ;;  %vm5837_vm14 = vcmp.eq.s32.totalorder %v5835_v23, 0  ;;  %6249 = vst [vmem:[%s10328_s5] sm:$0xff] %v6230_v37 }
 0x371   : > { %v3173_v47 = vshll.u32 %v10307_v45, 30  ;;  %vm5840_vm4 = vcmp.eq.s32.totalorder %v5835_v23, 2 }
 0x372   : > { %v2891_v51 = vmul.f32 -0.001358992, %v2890_v53  ;;  %v2898_v1 = vmul.f32 -0.00019511016, %v2890_v53  ;;  %vm2912_vm9 = vcmp.eq.s32.totalorder %v2907_v24, 2  ;;  %vm2909_vm11 = vcmp.eq.s32.totalorder %v2907_v24, 0  ;;  %v6181_v3 = vpop.permute.xlu2 %6180 }
 0x373   : > { %v3174_v6 = vsub.s32 %v3170_v4, %v3173_v47  ;;  %vm2908_vm0 = vcmp.lt.s32.totalorder %v2907_v24, 2  ;;  %v6177_v4 = vpop.permute.xlu0 %6176  ;;  %v6179_v47 = vpop.permute.xlu1 %6178 }
 0x374   : > { %v2892_v5 = vadd.f32 0.041655596, %v2891_v51  ;;  %v2899_v13 = vadd.f32 0.008332121, %v2898_v1  ;;  %v6232_v52 = vsel %vm6229_vm5, %v11176_v43, %v6177_v4 }
 0x375   : > { %vm3175_vm13 = vcmp.lt.s32.totalorder %v3174_v6, 0  ;;  %v3176_v7 = vsub.s32 0, %v3174_v6  ;;  %6251 = vst [vmem:[%s10328_s5 + $0x10] sm:$0xff] %v6232_v52 }
 0x376   : > { %v2893_v32 = vmul.f32 %v2892_v5, %v2890_v53  ;;  %v2900_v54 = vmul.f32 %v2899_v13, %v2890_v53  ;;  %v11180_v5 = vld [vmem:[#allocation26_spill] sm:$0xff] }
 0x377   : > { %v3177_v8 = vsel %vm3175_vm13, %v3176_v7, %v3174_v6  ;;  %v6233_v13 = vsel %vm6229_vm5, %v11180_v5, %v6179_v47 }
 0x378   : > { %v2894_v40 = vadd.f32 -0.4999988, %v2893_v32  ;;  %v2901_v21 = vadd.f32 -0.16666654, %v2900_v54  ;;  %v3178_v56 = vclz %v3177_v8  ;;  %v11181_v54 = vld [vmem:[#allocation18_spill] sm:$0xff]  ;;  %6252 = vst [vmem:[%s10328_s5 + $0x18] sm:$0xff] %v6233_v13 }
 0x37a   : > { %v2895_v59 = vmul.f32 %v2894_v40, %v2890_v53  ;;  %v2902_v36 = vmul.f32 %v2901_v21, %v2890_v53  ;;  %v6406_v27 = vadd.s32 4294967294, %v3178_v56  ;;  %v3196_v53 = vsub.s32 4, %v10307_v45  ;;  %v6187_v24 = vpop.permute.xlu2 %6186 }
 0x37b   : > { %v6183_v7 = vpop.permute.xlu0 %6182  ;;  %v6185_v23 = vpop.permute.xlu1 %6184 }
 0x37c   : > { %v2896_v48 = vadd.f32 1.0, %v2895_v59  ;;  %v2903_v42 = vadd.f32 1.0, %v2902_v36  ;;  %vm6407_vm10 = vcmp.lt.s32.totalorder %v6406_v27, 0  ;;  %v6235_v49 = vsel %vm6229_vm5, %v11181_v54, %v6183_v7 }
 0x37d   : > { %v3181_v41 = vsel %vm6407_vm10, 0, %v6406_v27  ;;  %6254 = vst [vmem:[%s10328_s5 + $0x28] sm:$0xff] %v6235_v49 }
 0x37e   : > { %v2904_v46 = vmul.f32 %v2903_v42, %v2888_v30  ;;  %v2913_v9 = vxor.u32 2147483648, %v2896_v48  ;;  %v3182_v12 = vsub.s32 32, %v3181_v41  ;;  %v3186_v61 = vsub.s32 4294967266, %v3181_v41  ;;  %v11177_v30 = vld [vmem:[#allocation63_spill] sm:$0xff] }
 0x37f   : > { %v3183_v2 = vshll.u32 %v3174_v6, %v3181_v41  ;;  %vm3074_vm15 = vcmp.lt.s32.totalorder %v11177_v30, 0  ;;  %v11178_v51 = vand.u32 2147483647, %v11177_v30  ;;  %v11179_v6 = vld [vmem:[#allocation76_spill] sm:$0xff] }
 0x380   : > { %v2910_v38 = vxor.u32 2147483648, %v2904_v46  ;;  %v2914_v60 = vsel %vm2912_vm9, %v2913_v9, %v2904_v46  ;;  %v3184_v28 = vshrl.u32 %v3166_v57, %v3182_v12  ;;  %v3187_v55 = vadd.s32 127, %v3186_v61  ;;  %v11182_v41 = vld [vmem:[#allocation80_spill] sm:$0xff]  ;;  %v11184_v61 = vld [vmem:[#allocation25_spill] sm:$0xff] }
 0x381   : > { %v5842_v62 = vsel %vm5840_vm4, %v2913_v9, %v2904_v46  ;;  %vm3073_vm6 = vcmp.le.f32.partialorder %v11178_v51, 0.7853982  ;;  %v6234_v39 = vsel %vm6229_vm5, %v11179_v6, %v6181_v3  ;;  %v3197_v40 = vsel %vm3074_vm15, %v3196_v53, %v10307_v45  ;;  %v11183_v9 = vld [vmem:[#allocation90_spill] sm:$0xff]  ;;  %v11187_v3 = vld [vmem:[#allocation85_spill] sm:$0xff] }
 0x382   : > { %v2911_v34 = vsel %vm2909_vm11, %v2896_v48, %v2910_v38  ;;  %v5839_v19 = vsel %vm5837_vm14, %v2896_v48, %v2910_v38  ;;  %v3185_v50 = vor.u32 %v3184_v28, %v3183_v2  ;;  %v3188_v14 = vshll.u32 %v3187_v55, 23  ;;  %6253 = vst [vmem:[%s10328_s5 + $0x20] sm:$0xff] %v6234_v39  ;;  %v11186_v53 = vld [vmem:[#allocation6_spill] sm:$0xff] }
 0x383   : > { %v2915_v29 = vsel %vm2908_vm0, %v2911_v34, %v2914_v60  ;;  %v5843_v26 = vsel %vm5836_vm7, %v5839_v19, %v5842_v62  ;;  %v3199_v59 = vsel %vm3073_vm6, 0, %v3197_v40  ;;  %v6237_v46 = vsel %vm6229_vm5, %v11182_v41, %v6187_v24  ;;  %v6189_v12 = vpop.permute.xlu0 %6188  ;;  %v11188_v6 = vld [vmem:[#allocation102_spill] sm:$0xff] }
 0x384   : > { %v10319_v44 = vsel %vm2905_vm2, nan, %v2915_v29  ;;  %v5844_v63 = vsel %vm2905_vm2, nan, %v5843_v26  ;;  %v3189_v18 = vor.u32 4788187, %v3188_v14  ;;  %v3192_v22 = vcvt.s32.f32 %v3185_v50  ;;  %6256 = vst [vmem:[%s10328_s5 + $0x38] sm:$0xff] %v6237_v46  ;;  %v6193_v26 = vpop.permute.xlu2 %6192 }
 0x385   : > { %6204 = vrot.lane.b32.xlu2 %v5844_v63, %s6595_s30  ;;  %v6236_v57 = vsel %vm6229_vm5, %v11183_v9, %v6185_v23  ;;  %v3216_v45 = vadd.s32 3, %v3199_v59  ;;  %v6238_v38 = vsel %vm6229_vm5, %v11184_v61, %v6189_v12  ;;  %v6143_v29 = vand.u32 3, %v3199_v59  ;;  %v11185_v63 = vld [vmem:[#allocation103_spill] sm:$0xff] }
 0x386   : > { %v3190_v15 = vand.u32 2147483647, %v3189_v18  ;;  %6255 = vst [vmem:[%s10328_s5 + $0x30] sm:$0xff] %v6236_v57  ;;  %v6240_v35 = vsel %vm6229_vm5, %v11185_v63, %v6193_v26  ;;  %vm3215_vm2 = vweird.f32 %v11177_v30 }
 0x387   : > { %6257 = vst [vmem:[%s10328_s5 + $0x40] sm:$0xff] %v6238_v38  ;;  %v3217_v34 = vand.u32 3, %v3216_v45  ;;  %vm6144_vm1 = vcmp.lt.s32.totalorder %v6143_v29, 2  ;;  %vm6145_vm8 = vcmp.eq.s32.totalorder %v6143_v29, 0  ;;  %vm6148_vm13 = vcmp.eq.s32.totalorder %v6143_v29, 2 }
 0x388   : > { %v3193_v17 = vmul.f32 %v3192_v22, %v3190_v15  ;;  %6259 = vst [vmem:[%s10328_s5 + $0x50] sm:$0xff] %v6240_v35 }
 0x389   : > { %vm3222_vm12 = vcmp.eq.s32.totalorder %v3217_v34, 2  ;;  %vm3219_vm3 = vcmp.eq.s32.totalorder %v3217_v34, 0  ;;  %vm3218_vm10 = vcmp.lt.s32.totalorder %v3217_v34, 2 }
 0x38a   : > { %v3194_v31 = vxor.u32 2147483648, %v3193_v17 }
 0x38c   : > { %v3195_v1 = vsel %vm3074_vm15, %v3194_v31, %v3193_v17  ;;  %v6191_v17 = vpop.permute.xlu1 %6190  ;;  %v6195_v31 = vpop.permute.xlu0 %6194 }
 0x38d   : > { %v3198_v32 = vsel %vm3073_vm6, %v11177_v30, %v3195_v1  ;;  %v6239_v30 = vsel %vm6229_vm5, %v11186_v53, %v6191_v17  ;;  %v6241_v47 = vsel %vm6229_vm5, %v11187_v3, %v6195_v31 }
 0x38e   : > { %v3200_v8 = vmul.f32 %v3198_v32, %v3198_v32  ;;  %6258 = vst [vmem:[%s10328_s5 + $0x48] sm:$0xff] %v6239_v30 }
 0x38f   : > { %6260 = vst [vmem:[%s10328_s5 + $0x58] sm:$0xff] %v6241_v47 }
 0x390   : > { %v3201_v21 = vmul.f32 -0.001358992, %v3200_v8  ;;  %v3208_v56 = vmul.f32 -0.00019511016, %v3200_v8 }
 0x392   : > { %v3202_v36 = vadd.f32 0.041655596, %v3201_v21  ;;  %v3209_v27 = vadd.f32 0.008332121, %v3208_v56 }
 0x394   : > { %v3203_v48 = vmul.f32 %v3202_v36, %v3200_v8  ;;  %v3210_v42 = vmul.f32 %v3209_v27, %v3200_v8  ;;  %v6197_v51 = vpop.permute.xlu1 %6196  ;;  %v6201_v1 = vpop.permute.xlu0 %6200 }
 0x395   : > { %v6244_v39 = vsel %vm6229_vm5, %v11188_v6, %v6201_v1 }
 0x396   : > { %v3204_v60 = vadd.f32 -0.4999988, %v3203_v48  ;;  %v3211_v28 = vadd.f32 -0.16666654, %v3210_v42  ;;  %6263 = vst [vmem:[%s10328_s5 + $0x70] sm:$0xff] %v6244_v39 }
 0x398   : > { %v3205_v2 = vmul.f32 %v3204_v60, %v3200_v8  ;;  %v3212_v55 = vmul.f32 %v3211_v28, %v3200_v8 }
 0x39a   : > { %v3206_v19 = vadd.f32 1.0, %v3205_v2  ;;  %v3213_v62 = vadd.f32 1.0, %v3212_v55 }
 0x39c   : > { %v3214_v50 = vmul.f32 %v3213_v62, %v3198_v32  ;;  %v3223_v14 = vxor.u32 2147483648, %v3206_v19 }
 0x39e   : > { %v3220_v10 = vxor.u32 2147483648, %v3214_v50  ;;  %v3224_v18 = vsel %vm3222_vm12, %v3223_v14, %v3214_v50  ;;  %v6150_v0 = vsel %vm6148_vm13, %v3223_v14, %v3214_v50  ;;  %v6207_v5 = vpop.permute.xlu0 %6206 }
 0x39f   : > { %v6247_v13 = vsel %vm6229_vm5, %v10058_v25, %v6207_v5 }
 0x3a0   : > { %v6147_v33 = vsel %vm6145_vm8, %v3206_v19, %v3220_v10  ;;  %v3221_v16 = vsel %vm3219_vm3, %v3206_v19, %v3220_v10  ;;  %6266 = vst [vmem:[%s10328_s5 + $0x88] sm:$0xff] %v6247_v13 }
 0x3a1   : > { %v6151_v37 = vsel %vm6144_vm1, %v6147_v33, %v6150_v0  ;;  %v3225_v4 = vsel %vm3218_vm10, %v3221_v16, %v3224_v18 }
 0x3a2   : > { %v6152_v43 = vsel %vm3215_vm2, nan, %v6151_v37  ;;  %v3226_v52 = vsel %vm3215_vm2, nan, %v3225_v4 }
 0x3a3   : > { %6208 = vrot.lane.b32.xlu1 %v6152_v43, %s6595_s30 }
 0x3a8   : > { %v6199_v15 = vpop.permute.xlu2 %6198 }
 0x3a9   : > { %v6243_v22 = vsel %vm6229_vm5, %v10212_v11, %v6199_v15  ;;  %v6242_v11 = vsel %vm6229_vm5, %v9923_v58, %v6197_v51 }
 0x3aa   : > { %6262 = vst [vmem:[%s10328_s5 + $0x68] sm:$0xff] %v6243_v22 }
 0x3ab   : > { %6261 = vst [vmem:[%s10328_s5 + $0x60] sm:$0xff] %v6242_v11 }
 0x3dc   : > { %v6203_v7 = vpop.permute.xlu1 %6202 }
 0x3dd   : > { %v6245_v32 = vsel %vm6229_vm5, %v10298_v20, %v6203_v7 }
 0x3de   : > { %6264 = vst [vmem:[%s10328_s5 + $0x78] sm:$0xff] %v6245_v32 }
 0x3df   : > { %v6205_v54 = vpop.permute.xlu2 %6204 }
 0x3e0   : > { %v6246_v58 = vsel %vm6229_vm5, %v10319_v44, %v6205_v54 }
 0x3e1   : > { %6265 = vst [vmem:[%s10328_s5 + $0x80] sm:$0xff] %v6246_v58 }
 0x415   : > { %v6209_v25 = vpop.permute.xlu1 %6208 }
 0x416   : > { %v6248_v49 = vsel %vm6229_vm5, %v3226_v52, %v6209_v25 }
 0x417   : > { %6267 = vst [vmem:[%s10328_s5 + $0x90] sm:$0xff] %v6248_v49 }
 0x418   : > { %6551 = shalt.err (!%p6548_p3)
}
 0x419   : > { %s6596_s28 = smov 128   ;;  %s6597_s29 = smov 8  }
 0x41a   : > { %6470 = dma.vmem_to_hbm [thread:$0]  (%p6651_p5), %s6282_s16, 2432, %s6284_s17, %s6269_s21, %s6596_s28, %s6596_s28, %s6597_s29  }
 0x41b PF: > { %p6476_p4 = scmp.ge.s32.totalorder %s6586_s12, 2  ;;  %s6298_s30 = sand.u32 1, %s6574_s9  }
 0x41c   : > { %s6299_s3 = scalar_lea.sflag [#allocation3], %s6298_s30 }
 0x41d   : > { %p6473_p7 = pnand %p6476_p4, %p6655_p6 }
 0x41f   : > { %p6474_p8 = pneg %p6473_p7 }
 0x421   : > { %6569 = dma.done.wait (%p6474_p8), %s6299_s3, 2432  }
 0x422   : > { %6571 = vsyncadd (%p6474_p8), %s6299_s3, 4294964864  ;;  %p12_p9 = scmp.ge.s32.totalorder %s6638_s15, 4   ;;  %s11189_s9 = smov %s6578_s10 }
 0x423   : > { %s11190_s10 = smov %s6582_s11  ;;  %s11191_s11 = smov %s6649_s18 }
 0x424   : > { %s11192_s12 = smov %s6638_s15  ;;  %14 = sbr.rel (!%p12_p9) target bundleno = 3 (0x3), region = 63 }
 0x429   :  { %6305 = vsyncpa [#allocation3], 1 }
 0x42a   :  { %6307 = vsyncpa [#allocation3 + $0x1], 1 }

</bundles_post_ra>
